<compile_context>
chip_gen: v5e
topology: v5e:2x2
jax: 0.10.0
libtpu: 0.0.40
codegen_flags: <defaults>
</compile_context>

<pallas_src>
import math

import jax
import jax.numpy as jnp
from jax import lax
from jax.experimental import pallas as pl
from jax.experimental.pallas import tpu as pltpu  # noqa: F401  (TPU backend assumed)

# ---------------- config (small, consistent with DistilGPT2-style arch) ----------------
VOCAB = 128
SEQ = 8
BATCH = 2
HIDDEN = 32
N_HEAD = 2
HEAD_DIM = HIDDEN // N_HEAD
N_LAYER = 2
FFN_DIM = 4 * HIDDEN
NUM_EXPERTS = 4
TOP_K = 2
EPS = 1e-5
TOKENS = BATCH * SEQ


# ---------------------------------- in-kernel math helpers ----------------------------------

def _gelu_tanh(x):
    c = math.sqrt(2.0 / math.pi)
    return 0.5 * x * (1.0 + jnp.tanh(c * (x + 0.044715 * x * x * x)))


def _layernorm(x, g, b):
    mu = jnp.mean(x, axis=-1, keepdims=True)
    xc = x - mu
    var = jnp.mean(xc * xc, axis=-1, keepdims=True)
    return xc * lax.rsqrt(var + EPS) * g + b


def _top2_gates(probs):
    """Top-2 gates from router probs [T, E], renormalized over the top-k."""
    col = lax.broadcasted_iota(jnp.int32, probs.shape, 1)
    m1 = jnp.max(probs, axis=-1, keepdims=True)
    idx1 = jnp.min(jnp.where(probs == m1, col, NUM_EXPERTS), axis=-1, keepdims=True)
    mask1 = col == idx1
    probs_m = jnp.where(mask1, -1.0, probs)
    m2 = jnp.max(probs_m, axis=-1, keepdims=True)
    idx2 = jnp.min(jnp.where(probs_m == m2, col, NUM_EXPERTS), axis=-1, keepdims=True)
    mask2 = col == idx2
    gates = jnp.where(mask1 | mask2, probs, 0.0)
    return gates / jnp.sum(gates, axis=-1, keepdims=True)


# ---------------------------------- fused forward kernel ----------------------------------

def fused_forward_kernel(ids_ref, wte_ref, wpe_ref,
                         ln1_g_ref, ln1_b_ref, attn_w_ref, attn_b_ref,
                         proj_w_ref, proj_b_ref, ln2_g_ref, ln2_b_ref,
                         rw_ref, rb_ref, w1_ref, b1_ref, w2_ref, b2_ref,
                         lnf_g_ref, lnf_b_ref, logits_ref):
    wte = wte_ref[...]                                             # [V, H]

    # ---- token embedding as one-hot @ wte (MXU) + positional embedding ----
    ids = ids_ref[...]                                             # [T, 1] int32
    vcol = lax.broadcasted_iota(jnp.int32, (TOKENS, VOCAB), 1)
    one_hot = (vcol == ids).astype(jnp.float32)                    # [T, V]
    pos = jnp.concatenate([wpe_ref[...]] * BATCH, axis=0)          # [T, H]
    x = jnp.dot(one_hot, wte, preferred_element_type=jnp.float32) + pos

    # ---- causal-mask bias: built ONCE, reused by every layer & head ----
    row = lax.broadcasted_iota(jnp.int32, (SEQ, SEQ), 0)
    colm = lax.broadcasted_iota(jnp.int32, (SEQ, SEQ), 1)
    mask_bias = jnp.where(colm <= row, 0.0, -1e9)

    scale = 1.0 / math.sqrt(HEAD_DIM)

    for li in range(N_LAYER):
        # =============== attention block ===============
        xn = _layernorm(x, ln1_g_ref[li], ln1_b_ref[li])
        qkv = (jnp.dot(xn, attn_w_ref[li], preferred_element_type=jnp.float32)
               + attn_b_ref[li])                                   # [T, 3H] lane-dense
        q = qkv[:, 0 * HIDDEN:1 * HIDDEN]
        k = qkv[:, 1 * HIDDEN:2 * HIDDEN]
        v = qkv[:, 2 * HIDDEN:3 * HIDDEN]

        batch_rows = []
        for b in range(BATCH):
            r0 = b * SEQ
            heads = []
            for hh in range(N_HEAD):
                c0 = hh * HEAD_DIM
                qbh = q[r0:r0 + SEQ, c0:c0 + HEAD_DIM]             # [S, Dh]
                kbh = k[r0:r0 + SEQ, c0:c0 + HEAD_DIM]
                vbh = v[r0:r0 + SEQ, c0:c0 + HEAD_DIM]
                s = lax.dot_general(qbh, kbh, (((1,), (1,)), ((), ())),
                                    preferred_element_type=jnp.float32)
                s = s * scale + mask_bias
                s = s - jnp.max(s, axis=-1, keepdims=True)
                p = jnp.exp(s)
                p = p * pl.reciprocal(jnp.sum(p, axis=-1, keepdims=True), approx=True)
                heads.append(jnp.dot(p, vbh, preferred_element_type=jnp.float32))
            batch_rows.append(jnp.concatenate(heads, axis=-1))     # head merge in-kernel
        attn_out = jnp.concatenate(batch_rows, axis=0)             # [T, H] lane-dense slab

        x = x + (jnp.dot(attn_out, proj_w_ref[li], preferred_element_type=jnp.float32)
                 + proj_b_ref[li])

        # =============== MoE FFN block ===============
        xn = _layernorm(x, ln2_g_ref[li], ln2_b_ref[li])

        # router: linear -> softmax -> top-2 (renormalized)
        rl = jnp.dot(xn, rw_ref[li], preferred_element_type=jnp.float32) + rb_ref[li]
        rl = rl - jnp.max(rl, axis=-1, keepdims=True)
        pe = jnp.exp(rl)
        probs = pe * pl.reciprocal(jnp.sum(pe, axis=-1, keepdims=True), approx=True)
        gates = _top2_gates(probs)                                 # [T, E]

        # experts as two lane-dense GEMMs over the expert-concatenated weight slabs
        h_all = _gelu_tanh(
            jnp.dot(xn, w1_ref[li], preferred_element_type=jnp.float32) + b1_ref[li]
        )                                                          # [T, E*F] = [16, 512]
        h_scaled = jnp.concatenate(
            [h_all[:, e * FFN_DIM:(e + 1) * FFN_DIM] * gates[:, e:e + 1]
             for e in range(NUM_EXPERTS)],
            axis=-1)
        y = jnp.dot(h_scaled, w2_ref[li], preferred_element_type=jnp.float32)   # [T, H]
        y = y + jnp.dot(gates, b2_ref[li], preferred_element_type=jnp.float32)  # gate-weighted b2
        x = x + y

    # ---- final layernorm + tied LM head (contract on shared H axis, no transpose) ----
    xf = _layernorm(x, lnf_g_ref[...], lnf_b_ref[...])
    logits_ref[...] = lax.dot_general(xf, wte, (((1,), (1,)), ((), ())),
                                      preferred_element_type=jnp.float32)       # [T, V]


# ---------------------------------- params & wrapper ----------------------------------

def init_params(key):
    std = 0.02
    ks = jax.random.split(key, 4 + N_LAYER)
    params = {
        "wte": jax.random.normal(ks[0], (VOCAB, HIDDEN), jnp.float32) * std,
        "wpe": jax.random.normal(ks[1], (SEQ, HIDDEN), jnp.float32) * std,
        "lnf_g": jnp.ones((1, HIDDEN), jnp.float32),
        "lnf_b": jnp.zeros((1, HIDDEN), jnp.float32),
        "layers": [],
    }
    for li in range(N_LAYER):
        lk = jax.random.split(ks[4 + li], 8)
        layer = {
            "ln1_g": jnp.ones((1, HIDDEN), jnp.float32),
            "ln1_b": jnp.zeros((1, HIDDEN), jnp.float32),
            "attn_w": jax.random.normal(lk[0], (HIDDEN, 3 * HIDDEN), jnp.float32) * std,
            "attn_b": jnp.zeros((1, 3 * HIDDEN), jnp.float32),
            "proj_w": jax.random.normal(lk[1], (HIDDEN, HIDDEN), jnp.float32) * std,
            "proj_b": jnp.zeros((1, HIDDEN), jnp.float32),
            "ln2_g": jnp.ones((1, HIDDEN), jnp.float32),
            "ln2_b": jnp.zeros((1, HIDDEN), jnp.float32),
            # SimpleTTTRouter: linear d_model -> num_experts
            "router_w": jax.random.normal(lk[2], (HIDDEN, NUM_EXPERTS), jnp.float32) * std,
            "router_b": jnp.zeros((1, NUM_EXPERTS), jnp.float32),
            # MyMoEBlock experts: GPT2-style MLP per expert
            "w1": jax.random.normal(lk[3], (NUM_EXPERTS, HIDDEN, FFN_DIM), jnp.float32) * std,
            "b1": jnp.zeros((NUM_EXPERTS, 1, FFN_DIM), jnp.float32),
            "w2": jax.random.normal(lk[4], (NUM_EXPERTS, FFN_DIM, HIDDEN), jnp.float32) * std,
            "b2": jnp.zeros((NUM_EXPERTS, 1, HIDDEN), jnp.float32),
        }
        params["layers"].append(layer)
    return params


def distilgpt2_moe_forward(params, input_ids):
    B, S = input_ids.shape
    assert (B, S) == (BATCH, SEQ)
    T = B * S
    L = params["layers"]

    def stk(name):
        return jnp.stack([l[name] for l in L], axis=0)

    # Lane-dense MoE weight slabs (experts concatenated along the FFN axis).
    w1c = jnp.stack([l["w1"].transpose(1, 0, 2).reshape(HIDDEN, NUM_EXPERTS * FFN_DIM)
                     for l in L])                                  # [L, H, E*F]
    b1c = jnp.stack([l["b1"].reshape(1, NUM_EXPERTS * FFN_DIM) for l in L])   # [L, 1, E*F]
    w2c = jnp.stack([l["w2"].reshape(NUM_EXPERTS * FFN_DIM, HIDDEN) for l in L])  # [L, E*F, H]
    b2m = jnp.stack([l["b2"].reshape(NUM_EXPERTS, HIDDEN) for l in L])            # [L, E, H]

    ids = input_ids.reshape(T, 1).astype(jnp.int32)

    logits = pl.pallas_call(
        fused_forward_kernel,
        out_shape=jax.ShapeDtypeStruct((T, VOCAB), jnp.float32),
    )(
        ids, params["wte"], params["wpe"],
        stk("ln1_g"), stk("ln1_b"), stk("attn_w"), stk("attn_b"),
        stk("proj_w"), stk("proj_b"), stk("ln2_g"), stk("ln2_b"),
        stk("router_w"), stk("router_b"), w1c, b1c, w2c, b2m,
        params["lnf_g"], params["lnf_b"],
    )
    return logits.reshape(B, S, VOCAB)

# TODO(synk): cross-entropy loss for `labels` is not computed; only .logits are produced,
# matching forward(input_ids) of the reference module in eval mode.


if __name__ == "__main__":
    key = jax.random.PRNGKey(0)
    pkey, dkey = jax.random.split(key)
    params = init_params(pkey)
    input_ids = jax.random.randint(dkey, (BATCH, SEQ), 0, VOCAB, dtype=jnp.int32)

    logits = jax.jit(distilgpt2_moe_forward)(params, input_ids)
    jax.block_until_ready(logits)

    assert logits.shape == (BATCH, SEQ, VOCAB)
    assert bool(jnp.all(jnp.isfinite(logits)))
    print("KERNEL_OK")
</pallas_src>

<mosaic_0001>
module attributes {stable_mosaic.version = 11 : i64} {
  func.func @fused_forward_kernel(%arg0: memref<16x1xi32, #tpu.memory_space<vmem>>, %arg1: memref<128x32xf32, #tpu.memory_space<vmem>>, %arg2: memref<8x32xf32, #tpu.memory_space<vmem>>, %arg3: memref<2x1x32xf32, #tpu.memory_space<vmem>>, %arg4: memref<2x1x32xf32, #tpu.memory_space<vmem>>, %arg5: memref<2x32x96xf32, #tpu.memory_space<vmem>>, %arg6: memref<2x1x96xf32, #tpu.memory_space<vmem>>, %arg7: memref<2x32x32xf32, #tpu.memory_space<vmem>>, %arg8: memref<2x1x32xf32, #tpu.memory_space<vmem>>, %arg9: memref<2x1x32xf32, #tpu.memory_space<vmem>>, %arg10: memref<2x1x32xf32, #tpu.memory_space<vmem>>, %arg11: memref<2x32x4xf32, #tpu.memory_space<vmem>>, %arg12: memref<2x1x4xf32, #tpu.memory_space<vmem>>, %arg13: memref<2x32x512xf32, #tpu.memory_space<vmem>>, %arg14: memref<2x1x512xf32, #tpu.memory_space<vmem>>, %arg15: memref<2x512x32xf32, #tpu.memory_space<vmem>>, %arg16: memref<2x4x32xf32, #tpu.memory_space<vmem>>, %arg17: memref<1x32xf32, #tpu.memory_space<vmem>>, %arg18: memref<1x32xf32, #tpu.memory_space<vmem>>, %arg19: memref<16x128xf32, #tpu.memory_space<vmem>>) attributes {dimension_semantics = [], scalar_prefetch = 0 : i64, scratch_operands = 0 : i64, tpu.core_type = #tpu.core_type<tc>} {
    %c0 = arith.constant 0 : index
    %c0_0 = arith.constant 0 : index
    %0 = vector.load %arg1[%c0, %c0_0] : memref<128x32xf32, #tpu.memory_space<vmem>>, vector<128x32xf32>
    %c0_1 = arith.constant 0 : index
    %c0_2 = arith.constant 0 : index
    %1 = vector.load %arg0[%c0_1, %c0_2] : memref<16x1xi32, #tpu.memory_space<vmem>>, vector<16x1xi32>
    %2 = tpu.iota {dimensions = array<i32: 1>} : vector<16x128xi32>
    %3 = vector.broadcast %1 : vector<16x1xi32> to vector<16x128xi32>
    %4 = arith.cmpi eq, %2, %3 : vector<16x128xi32>
    %5 = arith.extui %4 : vector<16x128xi1> to vector<16x128xi32>
    %6 = arith.sitofp %5 : vector<16x128xi32> to vector<16x128xf32>
    %c0_3 = arith.constant 0 : index
    %c0_4 = arith.constant 0 : index
    %7 = vector.load %arg2[%c0_3, %c0_4] : memref<8x32xf32, #tpu.memory_space<vmem>>, vector<8x32xf32>
    %8 = tpu.concatenate %7, %7 in 0 : vector<8x32xf32>, vector<8x32xf32> -> vector<16x32xf32>
    %cst = arith.constant dense<0.000000e+00> : vector<16x32xf32>
    %9 = tpu.matmul %6, %0, %cst {dimension_numbers = #tpu.dot_dimension_numbers<[1], [0], [0], [1], [0, 0, 1, 1], [], []>} : vector<16x128xf32>, vector<128x32xf32>, vector<16x32xf32> -> vector<16x32xf32>
    %10 = arith.addf %9, %8 : vector<16x32xf32>
    %11 = tpu.iota {dimensions = array<i32: 0>} : vector<8x8xi32>
    %12 = tpu.iota {dimensions = array<i32: 1>} : vector<8x8xi32>
    %13 = arith.cmpi sle, %12, %11 : vector<8x8xi32>
    %cst_5 = arith.constant 0.000000e+00 : f32
    %cst_6 = arith.constant -1.000000e+09 : f32
    %14 = vector.broadcast %cst_5 : f32 to vector<8x8xf32>
    %15 = vector.broadcast %cst_6 : f32 to vector<8x8xf32>
    %16 = arith.select %13, %14, %15 : vector<8x8xi1>, vector<8x8xf32>
    %c0_7 = arith.constant 0 : index
    %c0_8 = arith.constant 0 : index
    %c0_9 = arith.constant 0 : index
    %17 = vector.load %arg3[%c0_7, %c0_8, %c0_9] : memref<2x1x32xf32, #tpu.memory_space<vmem>>, vector<1x1x32xf32>
    %18 = vector.shape_cast %17 : vector<1x1x32xf32> to vector<1x32xf32>
    %c0_10 = arith.constant 0 : index
    %c0_11 = arith.constant 0 : index
    %c0_12 = arith.constant 0 : index
    %19 = vector.load %arg4[%c0_10, %c0_11, %c0_12] : memref<2x1x32xf32, #tpu.memory_space<vmem>>, vector<1x1x32xf32>
    %20 = vector.shape_cast %19 : vector<1x1x32xf32> to vector<1x32xf32>
    %cst_13 = arith.constant dense<0.000000e+00> : vector<16xf32>
    %21 = vector.multi_reduction <add>, %10, %cst_13 [1] : vector<16x32xf32> to vector<16xf32>
    %22 = vector.shape_cast %21 : vector<16xf32> to vector<16x1xf32>
    %cst_14 = arith.constant 3.200000e+01 : f32
    %23 = vector.broadcast %cst_14 : f32 to vector<16x1xf32>
    %24 = arith.divf %22, %23 : vector<16x1xf32>
    %25 = vector.broadcast %24 : vector<16x1xf32> to vector<16x32xf32>
    %26 = arith.subf %10, %25 : vector<16x32xf32>
    %27 = arith.mulf %26, %26 : vector<16x32xf32>
    %cst_15 = arith.constant dense<0.000000e+00> : vector<16xf32>
    %28 = vector.multi_reduction <add>, %27, %cst_15 [1] : vector<16x32xf32> to vector<16xf32>
    %29 = vector.shape_cast %28 : vector<16xf32> to vector<16x1xf32>
    %cst_16 = arith.constant 3.200000e+01 : f32
    %30 = vector.broadcast %cst_16 : f32 to vector<16x1xf32>
    %31 = arith.divf %29, %30 : vector<16x1xf32>
    %cst_17 = arith.constant 9.99999974E-6 : f32
    %32 = vector.broadcast %cst_17 : f32 to vector<16x1xf32>
    %33 = arith.addf %31, %32 : vector<16x1xf32>
    %34 = math.rsqrt %33 : vector<16x1xf32>
    %35 = vector.broadcast %34 : vector<16x1xf32> to vector<16x32xf32>
    %36 = arith.mulf %26, %35 : vector<16x32xf32>
    %37 = vector.broadcast %18 : vector<1x32xf32> to vector<16x32xf32>
    %38 = arith.mulf %36, %37 : vector<16x32xf32>
    %39 = vector.broadcast %20 : vector<1x32xf32> to vector<16x32xf32>
    %40 = arith.addf %38, %39 : vector<16x32xf32>
    %c0_18 = arith.constant 0 : index
    %c0_19 = arith.constant 0 : index
    %c0_20 = arith.constant 0 : index
    %41 = vector.load %arg5[%c0_18, %c0_19, %c0_20] : memref<2x32x96xf32, #tpu.memory_space<vmem>>, vector<1x32x96xf32>
    %42 = vector.shape_cast %41 : vector<1x32x96xf32> to vector<32x96xf32>
    %cst_21 = arith.constant dense<0.000000e+00> : vector<16x96xf32>
    %43 = tpu.matmul %40, %42, %cst_21 {dimension_numbers = #tpu.dot_dimension_numbers<[1], [0], [0], [1], [0, 0, 1, 1], [], []>} : vector<16x32xf32>, vector<32x96xf32>, vector<16x96xf32> -> vector<16x96xf32>
    %c0_22 = arith.constant 0 : index
    %c0_23 = arith.constant 0 : index
    %c0_24 = arith.constant 0 : index
    %44 = vector.load %arg6[%c0_22, %c0_23, %c0_24] : memref<2x1x96xf32, #tpu.memory_space<vmem>>, vector<1x1x96xf32>
    %45 = vector.shape_cast %44 : vector<1x1x96xf32> to vector<1x96xf32>
    %46 = vector.broadcast %45 : vector<1x96xf32> to vector<16x96xf32>
    %47 = arith.addf %43, %46 : vector<16x96xf32>
    %48 = vector.extract_strided_slice %47 {offsets = [0, 0], sizes = [16, 32], strides = [1, 1]} : vector<16x96xf32> to vector<16x32xf32>
    %49 = vector.extract_strided_slice %47 {offsets = [0, 32], sizes = [16, 32], strides = [1, 1]} : vector<16x96xf32> to vector<16x32xf32>
    %50 = vector.extract_strided_slice %47 {offsets = [0, 64], sizes = [16, 32], strides = [1, 1]} : vector<16x96xf32> to vector<16x32xf32>
    %51 = vector.extract_strided_slice %48 {offsets = [0, 0], sizes = [8, 16], strides = [1, 1]} : vector<16x32xf32> to vector<8x16xf32>
    %52 = vector.extract_strided_slice %49 {offsets = [0, 0], sizes = [8, 16], strides = [1, 1]} : vector<16x32xf32> to vector<8x16xf32>
    %53 = vector.extract_strided_slice %50 {offsets = [0, 0], sizes = [8, 16], strides = [1, 1]} : vector<16x32xf32> to vector<8x16xf32>
    %cst_25 = arith.constant dense<0.000000e+00> : vector<8x8xf32>
    %54 = tpu.matmul %51, %52, %cst_25 {dimension_numbers = #tpu.dot_dimension_numbers<[1], [1], [0], [0], [0, 0, 1, 0], [], []>} : vector<8x16xf32>, vector<8x16xf32>, vector<8x8xf32> -> vector<8x8xf32>
    %cst_26 = arith.constant 2.500000e-01 : f32
    %55 = vector.broadcast %cst_26 : f32 to vector<8x8xf32>
    %56 = arith.mulf %54, %55 : vector<8x8xf32>
    %57 = arith.addf %56, %16 : vector<8x8xf32>
    %cst_27 = arith.constant dense<0xFF800000> : vector<8xf32>
    %58 = vector.multi_reduction <maximumf>, %57, %cst_27 [1] : vector<8x8xf32> to vector<8xf32>
    %59 = vector.shape_cast %58 : vector<8xf32> to vector<8x1xf32>
    %60 = vector.broadcast %59 : vector<8x1xf32> to vector<8x8xf32>
    %61 = arith.subf %57, %60 : vector<8x8xf32>
    %62 = math.exp %61 : vector<8x8xf32>
    %cst_28 = arith.constant dense<0.000000e+00> : vector<8xf32>
    %63 = vector.multi_reduction <add>, %62, %cst_28 [1] : vector<8x8xf32> to vector<8xf32>
    %64 = vector.shape_cast %63 : vector<8xf32> to vector<8x1xf32>
    %65 = tpu.reciprocal %64 {approx = true} : vector<8x1xf32> -> vector<8x1xf32>
    %66 = vector.broadcast %65 : vector<8x1xf32> to vector<8x8xf32>
    %67 = arith.mulf %62, %66 : vector<8x8xf32>
    %cst_29 = arith.constant dense<0.000000e+00> : vector<8x16xf32>
    %68 = tpu.matmul %67, %53, %cst_29 {dimension_numbers = #tpu.dot_dimension_numbers<[1], [0], [0], [1], [0, 0, 1, 1], [], []>} : vector<8x8xf32>, vector<8x16xf32>, vector<8x16xf32> -> vector<8x16xf32>
    %69 = vector.extract_strided_slice %48 {offsets = [0, 16], sizes = [8, 16], strides = [1, 1]} : vector<16x32xf32> to vector<8x16xf32>
    %70 = vector.extract_strided_slice %49 {offsets = [0, 16], sizes = [8, 16], strides = [1, 1]} : vector<16x32xf32> to vector<8x16xf32>
    %71 = vector.extract_strided_slice %50 {offsets = [0, 16], sizes = [8, 16], strides = [1, 1]} : vector<16x32xf32> to vector<8x16xf32>
    %cst_30 = arith.constant dense<0.000000e+00> : vector<8x8xf32>
    %72 = tpu.matmul %69, %70, %cst_30 {dimension_numbers = #tpu.dot_dimension_numbers<[1], [1], [0], [0], [0, 0, 1, 0], [], []>} : vector<8x16xf32>, vector<8x16xf32>, vector<8x8xf32> -> vector<8x8xf32>
    %cst_31 = arith.constant 2.500000e-01 : f32
    %73 = vector.broadcast %cst_31 : f32 to vector<8x8xf32>
    %74 = arith.mulf %72, %73 : vector<8x8xf32>
    %75 = arith.addf %74, %16 : vector<8x8xf32>
    %cst_32 = arith.constant dense<0xFF800000> : vector<8xf32>
    %76 = vector.multi_reduction <maximumf>, %75, %cst_32 [1] : vector<8x8xf32> to vector<8xf32>
    %77 = vector.shape_cast %76 : vector<8xf32> to vector<8x1xf32>
    %78 = vector.broadcast %77 : vector<8x1xf32> to vector<8x8xf32>
    %79 = arith.subf %75, %78 : vector<8x8xf32>
    %80 = math.exp %79 : vector<8x8xf32>
    %cst_33 = arith.constant dense<0.000000e+00> : vector<8xf32>
    %81 = vector.multi_reduction <add>, %80, %cst_33 [1] : vector<8x8xf32> to vector<8xf32>
    %82 = vector.shape_cast %81 : vector<8xf32> to vector<8x1xf32>
    %83 = tpu.reciprocal %82 {approx = true} : vector<8x1xf32> -> vector<8x1xf32>
    %84 = vector.broadcast %83 : vector<8x1xf32> to vector<8x8xf32>
    %85 = arith.mulf %80, %84 : vector<8x8xf32>
    %cst_34 = arith.constant dense<0.000000e+00> : vector<8x16xf32>
    %86 = tpu.matmul %85, %71, %cst_34 {dimension_numbers = #tpu.dot_dimension_numbers<[1], [0], [0], [1], [0, 0, 1, 1], [], []>} : vector<8x8xf32>, vector<8x16xf32>, vector<8x16xf32> -> vector<8x16xf32>
    %87 = tpu.concatenate %68, %86 in 1 : vector<8x16xf32>, vector<8x16xf32> -> vector<8x32xf32>
    %88 = vector.extract_strided_slice %48 {offsets = [8, 0], sizes = [8, 16], strides = [1, 1]} : vector<16x32xf32> to vector<8x16xf32>
    %89 = vector.extract_strided_slice %49 {offsets = [8, 0], sizes = [8, 16], strides = [1, 1]} : vector<16x32xf32> to vector<8x16xf32>
    %90 = vector.extract_strided_slice %50 {offsets = [8, 0], sizes = [8, 16], strides = [1, 1]} : vector<16x32xf32> to vector<8x16xf32>
    %cst_35 = arith.constant dense<0.000000e+00> : vector<8x8xf32>
    %91 = tpu.matmul %88, %89, %cst_35 {dimension_numbers = #tpu.dot_dimension_numbers<[1], [1], [0], [0], [0, 0, 1, 0], [], []>} : vector<8x16xf32>, vector<8x16xf32>, vector<8x8xf32> -> vector<8x8xf32>
    %cst_36 = arith.constant 2.500000e-01 : f32
    %92 = vector.broadcast %cst_36 : f32 to vector<8x8xf32>
    %93 = arith.mulf %91, %92 : vector<8x8xf32>
    %94 = arith.addf %93, %16 : vector<8x8xf32>
    %cst_37 = arith.constant dense<0xFF800000> : vector<8xf32>
    %95 = vector.multi_reduction <maximumf>, %94, %cst_37 [1] : vector<8x8xf32> to vector<8xf32>
    %96 = vector.shape_cast %95 : vector<8xf32> to vector<8x1xf32>
    %97 = vector.broadcast %96 : vector<8x1xf32> to vector<8x8xf32>
    %98 = arith.subf %94, %97 : vector<8x8xf32>
    %99 = math.exp %98 : vector<8x8xf32>
    %cst_38 = arith.constant dense<0.000000e+00> : vector<8xf32>
    %100 = vector.multi_reduction <add>, %99, %cst_38 [1] : vector<8x8xf32> to vector<8xf32>
    %101 = vector.shape_cast %100 : vector<8xf32> to vector<8x1xf32>
    %102 = tpu.reciprocal %101 {approx = true} : vector<8x1xf32> -> vector<8x1xf32>
    %103 = vector.broadcast %102 : vector<8x1xf32> to vector<8x8xf32>
    %104 = arith.mulf %99, %103 : vector<8x8xf32>
    %cst_39 = arith.constant dense<0.000000e+00> : vector<8x16xf32>
    %105 = tpu.matmul %104, %90, %cst_39 {dimension_numbers = #tpu.dot_dimension_numbers<[1], [0], [0], [1], [0, 0, 1, 1], [], []>} : vector<8x8xf32>, vector<8x16xf32>, vector<8x16xf32> -> vector<8x16xf32>
    %106 = vector.extract_strided_slice %48 {offsets = [8, 16], sizes = [8, 16], strides = [1, 1]} : vector<16x32xf32> to vector<8x16xf32>
    %107 = vector.extract_strided_slice %49 {offsets = [8, 16], sizes = [8, 16], strides = [1, 1]} : vector<16x32xf32> to vector<8x16xf32>
    %108 = vector.extract_strided_slice %50 {offsets = [8, 16], sizes = [8, 16], strides = [1, 1]} : vector<16x32xf32> to vector<8x16xf32>
    %cst_40 = arith.constant dense<0.000000e+00> : vector<8x8xf32>
    %109 = tpu.matmul %106, %107, %cst_40 {dimension_numbers = #tpu.dot_dimension_numbers<[1], [1], [0], [0], [0, 0, 1, 0], [], []>} : vector<8x16xf32>, vector<8x16xf32>, vector<8x8xf32> -> vector<8x8xf32>
    %cst_41 = arith.constant 2.500000e-01 : f32
    %110 = vector.broadcast %cst_41 : f32 to vector<8x8xf32>
    %111 = arith.mulf %109, %110 : vector<8x8xf32>
    %112 = arith.addf %111, %16 : vector<8x8xf32>
    %cst_42 = arith.constant dense<0xFF800000> : vector<8xf32>
    %113 = vector.multi_reduction <maximumf>, %112, %cst_42 [1] : vector<8x8xf32> to vector<8xf32>
    %114 = vector.shape_cast %113 : vector<8xf32> to vector<8x1xf32>
    %115 = vector.broadcast %114 : vector<8x1xf32> to vector<8x8xf32>
    %116 = arith.subf %112, %115 : vector<8x8xf32>
    %117 = math.exp %116 : vector<8x8xf32>
    %cst_43 = arith.constant dense<0.000000e+00> : vector<8xf32>
    %118 = vector.multi_reduction <add>, %117, %cst_43 [1] : vector<8x8xf32> to vector<8xf32>
    %119 = vector.shape_cast %118 : vector<8xf32> to vector<8x1xf32>
    %120 = tpu.reciprocal %119 {approx = true} : vector<8x1xf32> -> vector<8x1xf32>
    %121 = vector.broadcast %120 : vector<8x1xf32> to vector<8x8xf32>
    %122 = arith.mulf %117, %121 : vector<8x8xf32>
    %cst_44 = arith.constant dense<0.000000e+00> : vector<8x16xf32>
    %123 = tpu.matmul %122, %108, %cst_44 {dimension_numbers = #tpu.dot_dimension_numbers<[1], [0], [0], [1], [0, 0, 1, 1], [], []>} : vector<8x8xf32>, vector<8x16xf32>, vector<8x16xf32> -> vector<8x16xf32>
    %124 = tpu.concatenate %105, %123 in 1 : vector<8x16xf32>, vector<8x16xf32> -> vector<8x32xf32>
    %125 = tpu.concatenate %87, %124 in 0 : vector<8x32xf32>, vector<8x32xf32> -> vector<16x32xf32>
    %c0_45 = arith.constant 0 : index
    %c0_46 = arith.constant 0 : index
    %c0_47 = arith.constant 0 : index
    %126 = vector.load %arg7[%c0_45, %c0_46, %c0_47] : memref<2x32x32xf32, #tpu.memory_space<vmem>>, vector<1x32x32xf32>
    %127 = vector.shape_cast %126 : vector<1x32x32xf32> to vector<32x32xf32>
    %cst_48 = arith.constant dense<0.000000e+00> : vector<16x32xf32>
    %128 = tpu.matmul %125, %127, %cst_48 {dimension_numbers = #tpu.dot_dimension_numbers<[1], [0], [0], [1], [0, 0, 1, 1], [], []>} : vector<16x32xf32>, vector<32x32xf32>, vector<16x32xf32> -> vector<16x32xf32>
    %c0_49 = arith.constant 0 : index
    %c0_50 = arith.constant 0 : index
    %c0_51 = arith.constant 0 : index
    %129 = vector.load %arg8[%c0_49, %c0_50, %c0_51] : memref<2x1x32xf32, #tpu.memory_space<vmem>>, vector<1x1x32xf32>
    %130 = vector.shape_cast %129 : vector<1x1x32xf32> to vector<1x32xf32>
    %131 = vector.broadcast %130 : vector<1x32xf32> to vector<16x32xf32>
    %132 = arith.addf %128, %131 : vector<16x32xf32>
    %133 = arith.addf %10, %132 : vector<16x32xf32>
    %c0_52 = arith.constant 0 : index
    %c0_53 = arith.constant 0 : index
    %c0_54 = arith.constant 0 : index
    %134 = vector.load %arg9[%c0_52, %c0_53, %c0_54] : memref<2x1x32xf32, #tpu.memory_space<vmem>>, vector<1x1x32xf32>
    %135 = vector.shape_cast %134 : vector<1x1x32xf32> to vector<1x32xf32>
    %c0_55 = arith.constant 0 : index
    %c0_56 = arith.constant 0 : index
    %c0_57 = arith.constant 0 : index
    %136 = vector.load %arg10[%c0_55, %c0_56, %c0_57] : memref<2x1x32xf32, #tpu.memory_space<vmem>>, vector<1x1x32xf32>
    %137 = vector.shape_cast %136 : vector<1x1x32xf32> to vector<1x32xf32>
    %cst_58 = arith.constant dense<0.000000e+00> : vector<16xf32>
    %138 = vector.multi_reduction <add>, %133, %cst_58 [1] : vector<16x32xf32> to vector<16xf32>
    %139 = vector.shape_cast %138 : vector<16xf32> to vector<16x1xf32>
    %cst_59 = arith.constant 3.200000e+01 : f32
    %140 = vector.broadcast %cst_59 : f32 to vector<16x1xf32>
    %141 = arith.divf %139, %140 : vector<16x1xf32>
    %142 = vector.broadcast %141 : vector<16x1xf32> to vector<16x32xf32>
    %143 = arith.subf %133, %142 : vector<16x32xf32>
    %144 = arith.mulf %143, %143 : vector<16x32xf32>
    %cst_60 = arith.constant dense<0.000000e+00> : vector<16xf32>
    %145 = vector.multi_reduction <add>, %144, %cst_60 [1] : vector<16x32xf32> to vector<16xf32>
    %146 = vector.shape_cast %145 : vector<16xf32> to vector<16x1xf32>
    %cst_61 = arith.constant 3.200000e+01 : f32
    %147 = vector.broadcast %cst_61 : f32 to vector<16x1xf32>
    %148 = arith.divf %146, %147 : vector<16x1xf32>
    %cst_62 = arith.constant 9.99999974E-6 : f32
    %149 = vector.broadcast %cst_62 : f32 to vector<16x1xf32>
    %150 = arith.addf %148, %149 : vector<16x1xf32>
    %151 = math.rsqrt %150 : vector<16x1xf32>
    %152 = vector.broadcast %151 : vector<16x1xf32> to vector<16x32xf32>
    %153 = arith.mulf %143, %152 : vector<16x32xf32>
    %154 = vector.broadcast %135 : vector<1x32xf32> to vector<16x32xf32>
    %155 = arith.mulf %153, %154 : vector<16x32xf32>
    %156 = vector.broadcast %137 : vector<1x32xf32> to vector<16x32xf32>
    %157 = arith.addf %155, %156 : vector<16x32xf32>
    %c0_63 = arith.constant 0 : index
    %c0_64 = arith.constant 0 : index
    %c0_65 = arith.constant 0 : index
    %158 = vector.load %arg11[%c0_63, %c0_64, %c0_65] : memref<2x32x4xf32, #tpu.memory_space<vmem>>, vector<1x32x4xf32>
    %159 = vector.shape_cast %158 : vector<1x32x4xf32> to vector<32x4xf32>
    %cst_66 = arith.constant dense<0.000000e+00> : vector<16x4xf32>
    %160 = tpu.matmul %157, %159, %cst_66 {dimension_numbers = #tpu.dot_dimension_numbers<[1], [0], [0], [1], [0, 0, 1, 1], [], []>} : vector<16x32xf32>, vector<32x4xf32>, vector<16x4xf32> -> vector<16x4xf32>
    %c0_67 = arith.constant 0 : index
    %c0_68 = arith.constant 0 : index
    %c0_69 = arith.constant 0 : index
    %161 = vector.load %arg12[%c0_67, %c0_68, %c0_69] : memref<2x1x4xf32, #tpu.memory_space<vmem>>, vector<1x1x4xf32>
    %162 = vector.shape_cast %161 : vector<1x1x4xf32> to vector<1x4xf32>
    %163 = vector.broadcast %162 : vector<1x4xf32> to vector<16x4xf32>
    %164 = arith.addf %160, %163 : vector<16x4xf32>
    %cst_70 = arith.constant dense<0xFF800000> : vector<16xf32>
    %165 = vector.multi_reduction <maximumf>, %164, %cst_70 [1] : vector<16x4xf32> to vector<16xf32>
    %166 = vector.shape_cast %165 : vector<16xf32> to vector<16x1xf32>
    %167 = vector.broadcast %166 : vector<16x1xf32> to vector<16x4xf32>
    %168 = arith.subf %164, %167 : vector<16x4xf32>
    %169 = math.exp %168 : vector<16x4xf32>
    %cst_71 = arith.constant dense<0.000000e+00> : vector<16xf32>
    %170 = vector.multi_reduction <add>, %169, %cst_71 [1] : vector<16x4xf32> to vector<16xf32>
    %171 = vector.shape_cast %170 : vector<16xf32> to vector<16x1xf32>
    %172 = tpu.reciprocal %171 {approx = true} : vector<16x1xf32> -> vector<16x1xf32>
    %173 = vector.broadcast %172 : vector<16x1xf32> to vector<16x4xf32>
    %174 = arith.mulf %169, %173 : vector<16x4xf32>
    %175 = tpu.iota {dimensions = array<i32: 1>} : vector<16x4xi32>
    %cst_72 = arith.constant dense<0xFF800000> : vector<16xf32>
    %176 = vector.multi_reduction <maximumf>, %174, %cst_72 [1] : vector<16x4xf32> to vector<16xf32>
    %177 = vector.shape_cast %176 : vector<16xf32> to vector<16x1xf32>
    %178 = vector.broadcast %177 : vector<16x1xf32> to vector<16x4xf32>
    %179 = arith.cmpf oeq, %174, %178 : vector<16x4xf32>
    %c4_i32 = arith.constant 4 : i32
    %180 = vector.broadcast %c4_i32 : i32 to vector<16x4xi32>
    %181 = arith.select %179, %175, %180 : vector<16x4xi1>, vector<16x4xi32>
    %cst_73 = arith.constant dense<2147483647> : vector<16xi32>
    %182 = vector.multi_reduction <minsi>, %181, %cst_73 [1] : vector<16x4xi32> to vector<16xi32>
    %183 = vector.shape_cast %182 : vector<16xi32> to vector<16x1xi32>
    %184 = vector.broadcast %183 : vector<16x1xi32> to vector<16x4xi32>
    %185 = arith.cmpi eq, %175, %184 : vector<16x4xi32>
    %cst_74 = arith.constant -1.000000e+00 : f32
    %186 = vector.broadcast %cst_74 : f32 to vector<16x4xf32>
    %187 = arith.select %185, %186, %174 : vector<16x4xi1>, vector<16x4xf32>
    %cst_75 = arith.constant dense<0xFF800000> : vector<16xf32>
    %188 = vector.multi_reduction <maximumf>, %187, %cst_75 [1] : vector<16x4xf32> to vector<16xf32>
    %189 = vector.shape_cast %188 : vector<16xf32> to vector<16x1xf32>
    %190 = vector.broadcast %189 : vector<16x1xf32> to vector<16x4xf32>
    %191 = arith.cmpf oeq, %187, %190 : vector<16x4xf32>
    %c4_i32_76 = arith.constant 4 : i32
    %192 = vector.broadcast %c4_i32_76 : i32 to vector<16x4xi32>
    %193 = arith.select %191, %175, %192 : vector<16x4xi1>, vector<16x4xi32>
    %cst_77 = arith.constant dense<2147483647> : vector<16xi32>
    %194 = vector.multi_reduction <minsi>, %193, %cst_77 [1] : vector<16x4xi32> to vector<16xi32>
    %195 = vector.shape_cast %194 : vector<16xi32> to vector<16x1xi32>
    %196 = vector.broadcast %195 : vector<16x1xi32> to vector<16x4xi32>
    %197 = arith.cmpi eq, %175, %196 : vector<16x4xi32>
    %198 = arith.ori %185, %197 : vector<16x4xi1>
    %cst_78 = arith.constant 0.000000e+00 : f32
    %199 = vector.broadcast %cst_78 : f32 to vector<16x4xf32>
    %200 = arith.select %198, %174, %199 : vector<16x4xi1>, vector<16x4xf32>
    %cst_79 = arith.constant dense<0.000000e+00> : vector<16xf32>
    %201 = vector.multi_reduction <add>, %200, %cst_79 [1] : vector<16x4xf32> to vector<16xf32>
    %202 = vector.shape_cast %201 : vector<16xf32> to vector<16x1xf32>
    %203 = vector.broadcast %202 : vector<16x1xf32> to vector<16x4xf32>
    %204 = arith.divf %200, %203 : vector<16x4xf32>
    %c0_80 = arith.constant 0 : index
    %c0_81 = arith.constant 0 : index
    %c0_82 = arith.constant 0 : index
    %205 = vector.load %arg13[%c0_80, %c0_81, %c0_82] : memref<2x32x512xf32, #tpu.memory_space<vmem>>, vector<1x32x512xf32>
    %206 = vector.shape_cast %205 : vector<1x32x512xf32> to vector<32x512xf32>
    %cst_83 = arith.constant dense<0.000000e+00> : vector<16x512xf32>
    %207 = tpu.matmul %157, %206, %cst_83 {dimension_numbers = #tpu.dot_dimension_numbers<[1], [0], [0], [1], [0, 0, 1, 1], [], []>} : vector<16x32xf32>, vector<32x512xf32>, vector<16x512xf32> -> vector<16x512xf32>
    %c0_84 = arith.constant 0 : index
    %c0_85 = arith.constant 0 : index
    %c0_86 = arith.constant 0 : index
    %208 = vector.load %arg14[%c0_84, %c0_85, %c0_86] : memref<2x1x512xf32, #tpu.memory_space<vmem>>, vector<1x1x512xf32>
    %209 = vector.shape_cast %208 : vector<1x1x512xf32> to vector<1x512xf32>
    %210 = vector.broadcast %209 : vector<1x512xf32> to vector<16x512xf32>
    %211 = arith.addf %207, %210 : vector<16x512xf32>
    %cst_87 = arith.constant 5.000000e-01 : f32
    %212 = vector.broadcast %cst_87 : f32 to vector<16x512xf32>
    %213 = arith.mulf %212, %211 : vector<16x512xf32>
    %cst_88 = arith.constant 4.471500e-02 : f32
    %214 = vector.broadcast %cst_88 : f32 to vector<16x512xf32>
    %215 = arith.mulf %214, %211 : vector<16x512xf32>
    %216 = arith.mulf %215, %211 : vector<16x512xf32>
    %217 = arith.mulf %216, %211 : vector<16x512xf32>
    %218 = arith.addf %211, %217 : vector<16x512xf32>
    %cst_89 = arith.constant 0.797884583 : f32
    %219 = vector.broadcast %cst_89 : f32 to vector<16x512xf32>
    %220 = arith.mulf %219, %218 : vector<16x512xf32>
    %221 = math.tanh %220 : vector<16x512xf32>
    %cst_90 = arith.constant 1.000000e+00 : f32
    %222 = vector.broadcast %cst_90 : f32 to vector<16x512xf32>
    %223 = arith.addf %222, %221 : vector<16x512xf32>
    %224 = arith.mulf %213, %223 : vector<16x512xf32>
    %225 = vector.extract_strided_slice %224 {offsets = [0, 0], sizes = [16, 128], strides = [1, 1]} : vector<16x512xf32> to vector<16x128xf32>
    %226 = vector.extract_strided_slice %204 {offsets = [0, 0], sizes = [16, 1], strides = [1, 1]} : vector<16x4xf32> to vector<16x1xf32>
    %227 = vector.broadcast %226 : vector<16x1xf32> to vector<16x128xf32>
    %228 = arith.mulf %225, %227 : vector<16x128xf32>
    %229 = vector.extract_strided_slice %224 {offsets = [0, 128], sizes = [16, 128], strides = [1, 1]} : vector<16x512xf32> to vector<16x128xf32>
    %230 = vector.extract_strided_slice %204 {offsets = [0, 1], sizes = [16, 1], strides = [1, 1]} : vector<16x4xf32> to vector<16x1xf32>
    %231 = vector.broadcast %230 : vector<16x1xf32> to vector<16x128xf32>
    %232 = arith.mulf %229, %231 : vector<16x128xf32>
    %233 = vector.extract_strided_slice %224 {offsets = [0, 256], sizes = [16, 128], strides = [1, 1]} : vector<16x512xf32> to vector<16x128xf32>
    %234 = vector.extract_strided_slice %204 {offsets = [0, 2], sizes = [16, 1], strides = [1, 1]} : vector<16x4xf32> to vector<16x1xf32>
    %235 = vector.broadcast %234 : vector<16x1xf32> to vector<16x128xf32>
    %236 = arith.mulf %233, %235 : vector<16x128xf32>
    %237 = vector.extract_strided_slice %224 {offsets = [0, 384], sizes = [16, 128], strides = [1, 1]} : vector<16x512xf32> to vector<16x128xf32>
    %238 = vector.extract_strided_slice %204 {offsets = [0, 3], sizes = [16, 1], strides = [1, 1]} : vector<16x4xf32> to vector<16x1xf32>
    %239 = vector.broadcast %238 : vector<16x1xf32> to vector<16x128xf32>
    %240 = arith.mulf %237, %239 : vector<16x128xf32>
    %241 = tpu.concatenate %228, %232, %236, %240 in 1 : vector<16x128xf32>, vector<16x128xf32>, vector<16x128xf32>, vector<16x128xf32> -> vector<16x512xf32>
    %c0_91 = arith.constant 0 : index
    %c0_92 = arith.constant 0 : index
    %c0_93 = arith.constant 0 : index
    %242 = vector.load %arg15[%c0_91, %c0_92, %c0_93] : memref<2x512x32xf32, #tpu.memory_space<vmem>>, vector<1x512x32xf32>
    %243 = vector.shape_cast %242 : vector<1x512x32xf32> to vector<512x32xf32>
    %cst_94 = arith.constant dense<0.000000e+00> : vector<16x32xf32>
    %244 = tpu.matmul %241, %243, %cst_94 {dimension_numbers = #tpu.dot_dimension_numbers<[1], [0], [0], [1], [0, 0, 1, 1], [], []>} : vector<16x512xf32>, vector<512x32xf32>, vector<16x32xf32> -> vector<16x32xf32>
    %c0_95 = arith.constant 0 : index
    %c0_96 = arith.constant 0 : index
    %c0_97 = arith.constant 0 : index
    %245 = vector.load %arg16[%c0_95, %c0_96, %c0_97] : memref<2x4x32xf32, #tpu.memory_space<vmem>>, vector<1x4x32xf32>
    %246 = vector.shape_cast %245 : vector<1x4x32xf32> to vector<4x32xf32>
    %cst_98 = arith.constant dense<0.000000e+00> : vector<16x32xf32>
    %247 = tpu.matmul %204, %246, %cst_98 {dimension_numbers = #tpu.dot_dimension_numbers<[1], [0], [0], [1], [0, 0, 1, 1], [], []>} : vector<16x4xf32>, vector<4x32xf32>, vector<16x32xf32> -> vector<16x32xf32>
    %248 = arith.addf %244, %247 : vector<16x32xf32>
    %249 = arith.addf %133, %248 : vector<16x32xf32>
    %c1 = arith.constant 1 : index
    %c0_99 = arith.constant 0 : index
    %c0_100 = arith.constant 0 : index
    %250 = vector.load %arg3[%c1, %c0_99, %c0_100] : memref<2x1x32xf32, #tpu.memory_space<vmem>>, vector<1x1x32xf32>
    %251 = vector.shape_cast %250 : vector<1x1x32xf32> to vector<1x32xf32>
    %c1_101 = arith.constant 1 : index
    %c0_102 = arith.constant 0 : index
    %c0_103 = arith.constant 0 : index
    %252 = vector.load %arg4[%c1_101, %c0_102, %c0_103] : memref<2x1x32xf32, #tpu.memory_space<vmem>>, vector<1x1x32xf32>
    %253 = vector.shape_cast %252 : vector<1x1x32xf32> to vector<1x32xf32>
    %cst_104 = arith.constant dense<0.000000e+00> : vector<16xf32>
    %254 = vector.multi_reduction <add>, %249, %cst_104 [1] : vector<16x32xf32> to vector<16xf32>
    %255 = vector.shape_cast %254 : vector<16xf32> to vector<16x1xf32>
    %cst_105 = arith.constant 3.200000e+01 : f32
    %256 = vector.broadcast %cst_105 : f32 to vector<16x1xf32>
    %257 = arith.divf %255, %256 : vector<16x1xf32>
    %258 = vector.broadcast %257 : vector<16x1xf32> to vector<16x32xf32>
    %259 = arith.subf %249, %258 : vector<16x32xf32>
    %260 = arith.mulf %259, %259 : vector<16x32xf32>
    %cst_106 = arith.constant dense<0.000000e+00> : vector<16xf32>
    %261 = vector.multi_reduction <add>, %260, %cst_106 [1] : vector<16x32xf32> to vector<16xf32>
    %262 = vector.shape_cast %261 : vector<16xf32> to vector<16x1xf32>
    %cst_107 = arith.constant 3.200000e+01 : f32
    %263 = vector.broadcast %cst_107 : f32 to vector<16x1xf32>
    %264 = arith.divf %262, %263 : vector<16x1xf32>
    %cst_108 = arith.constant 9.99999974E-6 : f32
    %265 = vector.broadcast %cst_108 : f32 to vector<16x1xf32>
    %266 = arith.addf %264, %265 : vector<16x1xf32>
    %267 = math.rsqrt %266 : vector<16x1xf32>
    %268 = vector.broadcast %267 : vector<16x1xf32> to vector<16x32xf32>
    %269 = arith.mulf %259, %268 : vector<16x32xf32>
    %270 = vector.broadcast %251 : vector<1x32xf32> to vector<16x32xf32>
    %271 = arith.mulf %269, %270 : vector<16x32xf32>
    %272 = vector.broadcast %253 : vector<1x32xf32> to vector<16x32xf32>
    %273 = arith.addf %271, %272 : vector<16x32xf32>
    %c1_109 = arith.constant 1 : index
    %c0_110 = arith.constant 0 : index
    %c0_111 = arith.constant 0 : index
    %274 = vector.load %arg5[%c1_109, %c0_110, %c0_111] : memref<2x32x96xf32, #tpu.memory_space<vmem>>, vector<1x32x96xf32>
    %275 = vector.shape_cast %274 : vector<1x32x96xf32> to vector<32x96xf32>
    %cst_112 = arith.constant dense<0.000000e+00> : vector<16x96xf32>
    %276 = tpu.matmul %273, %275, %cst_112 {dimension_numbers = #tpu.dot_dimension_numbers<[1], [0], [0], [1], [0, 0, 1, 1], [], []>} : vector<16x32xf32>, vector<32x96xf32>, vector<16x96xf32> -> vector<16x96xf32>
    %c1_113 = arith.constant 1 : index
    %c0_114 = arith.constant 0 : index
    %c0_115 = arith.constant 0 : index
    %277 = vector.load %arg6[%c1_113, %c0_114, %c0_115] : memref<2x1x96xf32, #tpu.memory_space<vmem>>, vector<1x1x96xf32>
    %278 = vector.shape_cast %277 : vector<1x1x96xf32> to vector<1x96xf32>
    %279 = vector.broadcast %278 : vector<1x96xf32> to vector<16x96xf32>
    %280 = arith.addf %276, %279 : vector<16x96xf32>
    %281 = vector.extract_strided_slice %280 {offsets = [0, 0], sizes = [16, 32], strides = [1, 1]} : vector<16x96xf32> to vector<16x32xf32>
    %282 = vector.extract_strided_slice %280 {offsets = [0, 32], sizes = [16, 32], strides = [1, 1]} : vector<16x96xf32> to vector<16x32xf32>
    %283 = vector.extract_strided_slice %280 {offsets = [0, 64], sizes = [16, 32], strides = [1, 1]} : vector<16x96xf32> to vector<16x32xf32>
    %284 = vector.extract_strided_slice %281 {offsets = [0, 0], sizes = [8, 16], strides = [1, 1]} : vector<16x32xf32> to vector<8x16xf32>
    %285 = vector.extract_strided_slice %282 {offsets = [0, 0], sizes = [8, 16], strides = [1, 1]} : vector<16x32xf32> to vector<8x16xf32>
    %286 = vector.extract_strided_slice %283 {offsets = [0, 0], sizes = [8, 16], strides = [1, 1]} : vector<16x32xf32> to vector<8x16xf32>
    %cst_116 = arith.constant dense<0.000000e+00> : vector<8x8xf32>
    %287 = tpu.matmul %284, %285, %cst_116 {dimension_numbers = #tpu.dot_dimension_numbers<[1], [1], [0], [0], [0, 0, 1, 0], [], []>} : vector<8x16xf32>, vector<8x16xf32>, vector<8x8xf32> -> vector<8x8xf32>
    %cst_117 = arith.constant 2.500000e-01 : f32
    %288 = vector.broadcast %cst_117 : f32 to vector<8x8xf32>
    %289 = arith.mulf %287, %288 : vector<8x8xf32>
    %290 = arith.addf %289, %16 : vector<8x8xf32>
    %cst_118 = arith.constant dense<0xFF800000> : vector<8xf32>
    %291 = vector.multi_reduction <maximumf>, %290, %cst_118 [1] : vector<8x8xf32> to vector<8xf32>
    %292 = vector.shape_cast %291 : vector<8xf32> to vector<8x1xf32>
    %293 = vector.broadcast %292 : vector<8x1xf32> to vector<8x8xf32>
    %294 = arith.subf %290, %293 : vector<8x8xf32>
    %295 = math.exp %294 : vector<8x8xf32>
    %cst_119 = arith.constant dense<0.000000e+00> : vector<8xf32>
    %296 = vector.multi_reduction <add>, %295, %cst_119 [1] : vector<8x8xf32> to vector<8xf32>
    %297 = vector.shape_cast %296 : vector<8xf32> to vector<8x1xf32>
    %298 = tpu.reciprocal %297 {approx = true} : vector<8x1xf32> -> vector<8x1xf32>
    %299 = vector.broadcast %298 : vector<8x1xf32> to vector<8x8xf32>
    %300 = arith.mulf %295, %299 : vector<8x8xf32>
    %cst_120 = arith.constant dense<0.000000e+00> : vector<8x16xf32>
    %301 = tpu.matmul %300, %286, %cst_120 {dimension_numbers = #tpu.dot_dimension_numbers<[1], [0], [0], [1], [0, 0, 1, 1], [], []>} : vector<8x8xf32>, vector<8x16xf32>, vector<8x16xf32> -> vector<8x16xf32>
    %302 = vector.extract_strided_slice %281 {offsets = [0, 16], sizes = [8, 16], strides = [1, 1]} : vector<16x32xf32> to vector<8x16xf32>
    %303 = vector.extract_strided_slice %282 {offsets = [0, 16], sizes = [8, 16], strides = [1, 1]} : vector<16x32xf32> to vector<8x16xf32>
    %304 = vector.extract_strided_slice %283 {offsets = [0, 16], sizes = [8, 16], strides = [1, 1]} : vector<16x32xf32> to vector<8x16xf32>
    %cst_121 = arith.constant dense<0.000000e+00> : vector<8x8xf32>
    %305 = tpu.matmul %302, %303, %cst_121 {dimension_numbers = #tpu.dot_dimension_numbers<[1], [1], [0], [0], [0, 0, 1, 0], [], []>} : vector<8x16xf32>, vector<8x16xf32>, vector<8x8xf32> -> vector<8x8xf32>
    %cst_122 = arith.constant 2.500000e-01 : f32
    %306 = vector.broadcast %cst_122 : f32 to vector<8x8xf32>
    %307 = arith.mulf %305, %306 : vector<8x8xf32>
    %308 = arith.addf %307, %16 : vector<8x8xf32>
    %cst_123 = arith.constant dense<0xFF800000> : vector<8xf32>
    %309 = vector.multi_reduction <maximumf>, %308, %cst_123 [1] : vector<8x8xf32> to vector<8xf32>
    %310 = vector.shape_cast %309 : vector<8xf32> to vector<8x1xf32>
    %311 = vector.broadcast %310 : vector<8x1xf32> to vector<8x8xf32>
    %312 = arith.subf %308, %311 : vector<8x8xf32>
    %313 = math.exp %312 : vector<8x8xf32>
    %cst_124 = arith.constant dense<0.000000e+00> : vector<8xf32>
    %314 = vector.multi_reduction <add>, %313, %cst_124 [1] : vector<8x8xf32> to vector<8xf32>
    %315 = vector.shape_cast %314 : vector<8xf32> to vector<8x1xf32>
    %316 = tpu.reciprocal %315 {approx = true} : vector<8x1xf32> -> vector<8x1xf32>
    %317 = vector.broadcast %316 : vector<8x1xf32> to vector<8x8xf32>
    %318 = arith.mulf %313, %317 : vector<8x8xf32>
    %cst_125 = arith.constant dense<0.000000e+00> : vector<8x16xf32>
    %319 = tpu.matmul %318, %304, %cst_125 {dimension_numbers = #tpu.dot_dimension_numbers<[1], [0], [0], [1], [0, 0, 1, 1], [], []>} : vector<8x8xf32>, vector<8x16xf32>, vector<8x16xf32> -> vector<8x16xf32>
    %320 = tpu.concatenate %301, %319 in 1 : vector<8x16xf32>, vector<8x16xf32> -> vector<8x32xf32>
    %321 = vector.extract_strided_slice %281 {offsets = [8, 0], sizes = [8, 16], strides = [1, 1]} : vector<16x32xf32> to vector<8x16xf32>
    %322 = vector.extract_strided_slice %282 {offsets = [8, 0], sizes = [8, 16], strides = [1, 1]} : vector<16x32xf32> to vector<8x16xf32>
    %323 = vector.extract_strided_slice %283 {offsets = [8, 0], sizes = [8, 16], strides = [1, 1]} : vector<16x32xf32> to vector<8x16xf32>
    %cst_126 = arith.constant dense<0.000000e+00> : vector<8x8xf32>
    %324 = tpu.matmul %321, %322, %cst_126 {dimension_numbers = #tpu.dot_dimension_numbers<[1], [1], [0], [0], [0, 0, 1, 0], [], []>} : vector<8x16xf32>, vector<8x16xf32>, vector<8x8xf32> -> vector<8x8xf32>
    %cst_127 = arith.constant 2.500000e-01 : f32
    %325 = vector.broadcast %cst_127 : f32 to vector<8x8xf32>
    %326 = arith.mulf %324, %325 : vector<8x8xf32>
    %327 = arith.addf %326, %16 : vector<8x8xf32>
    %cst_128 = arith.constant dense<0xFF800000> : vector<8xf32>
    %328 = vector.multi_reduction <maximumf>, %327, %cst_128 [1] : vector<8x8xf32> to vector<8xf32>
    %329 = vector.shape_cast %328 : vector<8xf32> to vector<8x1xf32>
    %330 = vector.broadcast %329 : vector<8x1xf32> to vector<8x8xf32>
    %331 = arith.subf %327, %330 : vector<8x8xf32>
    %332 = math.exp %331 : vector<8x8xf32>
    %cst_129 = arith.constant dense<0.000000e+00> : vector<8xf32>
    %333 = vector.multi_reduction <add>, %332, %cst_129 [1] : vector<8x8xf32> to vector<8xf32>
    %334 = vector.shape_cast %333 : vector<8xf32> to vector<8x1xf32>
    %335 = tpu.reciprocal %334 {approx = true} : vector<8x1xf32> -> vector<8x1xf32>
    %336 = vector.broadcast %335 : vector<8x1xf32> to vector<8x8xf32>
    %337 = arith.mulf %332, %336 : vector<8x8xf32>
    %cst_130 = arith.constant dense<0.000000e+00> : vector<8x16xf32>
    %338 = tpu.matmul %337, %323, %cst_130 {dimension_numbers = #tpu.dot_dimension_numbers<[1], [0], [0], [1], [0, 0, 1, 1], [], []>} : vector<8x8xf32>, vector<8x16xf32>, vector<8x16xf32> -> vector<8x16xf32>
    %339 = vector.extract_strided_slice %281 {offsets = [8, 16], sizes = [8, 16], strides = [1, 1]} : vector<16x32xf32> to vector<8x16xf32>
    %340 = vector.extract_strided_slice %282 {offsets = [8, 16], sizes = [8, 16], strides = [1, 1]} : vector<16x32xf32> to vector<8x16xf32>
    %341 = vector.extract_strided_slice %283 {offsets = [8, 16], sizes = [8, 16], strides = [1, 1]} : vector<16x32xf32> to vector<8x16xf32>
    %cst_131 = arith.constant dense<0.000000e+00> : vector<8x8xf32>
    %342 = tpu.matmul %339, %340, %cst_131 {dimension_numbers = #tpu.dot_dimension_numbers<[1], [1], [0], [0], [0, 0, 1, 0], [], []>} : vector<8x16xf32>, vector<8x16xf32>, vector<8x8xf32> -> vector<8x8xf32>
    %cst_132 = arith.constant 2.500000e-01 : f32
    %343 = vector.broadcast %cst_132 : f32 to vector<8x8xf32>
    %344 = arith.mulf %342, %343 : vector<8x8xf32>
    %345 = arith.addf %344, %16 : vector<8x8xf32>
    %cst_133 = arith.constant dense<0xFF800000> : vector<8xf32>
    %346 = vector.multi_reduction <maximumf>, %345, %cst_133 [1] : vector<8x8xf32> to vector<8xf32>
    %347 = vector.shape_cast %346 : vector<8xf32> to vector<8x1xf32>
    %348 = vector.broadcast %347 : vector<8x1xf32> to vector<8x8xf32>
    %349 = arith.subf %345, %348 : vector<8x8xf32>
    %350 = math.exp %349 : vector<8x8xf32>
    %cst_134 = arith.constant dense<0.000000e+00> : vector<8xf32>
    %351 = vector.multi_reduction <add>, %350, %cst_134 [1] : vector<8x8xf32> to vector<8xf32>
    %352 = vector.shape_cast %351 : vector<8xf32> to vector<8x1xf32>
    %353 = tpu.reciprocal %352 {approx = true} : vector<8x1xf32> -> vector<8x1xf32>
    %354 = vector.broadcast %353 : vector<8x1xf32> to vector<8x8xf32>
    %355 = arith.mulf %350, %354 : vector<8x8xf32>
    %cst_135 = arith.constant dense<0.000000e+00> : vector<8x16xf32>
    %356 = tpu.matmul %355, %341, %cst_135 {dimension_numbers = #tpu.dot_dimension_numbers<[1], [0], [0], [1], [0, 0, 1, 1], [], []>} : vector<8x8xf32>, vector<8x16xf32>, vector<8x16xf32> -> vector<8x16xf32>
    %357 = tpu.concatenate %338, %356 in 1 : vector<8x16xf32>, vector<8x16xf32> -> vector<8x32xf32>
    %358 = tpu.concatenate %320, %357 in 0 : vector<8x32xf32>, vector<8x32xf32> -> vector<16x32xf32>
    %c1_136 = arith.constant 1 : index
    %c0_137 = arith.constant 0 : index
    %c0_138 = arith.constant 0 : index
    %359 = vector.load %arg7[%c1_136, %c0_137, %c0_138] : memref<2x32x32xf32, #tpu.memory_space<vmem>>, vector<1x32x32xf32>
    %360 = vector.shape_cast %359 : vector<1x32x32xf32> to vector<32x32xf32>
    %cst_139 = arith.constant dense<0.000000e+00> : vector<16x32xf32>
    %361 = tpu.matmul %358, %360, %cst_139 {dimension_numbers = #tpu.dot_dimension_numbers<[1], [0], [0], [1], [0, 0, 1, 1], [], []>} : vector<16x32xf32>, vector<32x32xf32>, vector<16x32xf32> -> vector<16x32xf32>
    %c1_140 = arith.constant 1 : index
    %c0_141 = arith.constant 0 : index
    %c0_142 = arith.constant 0 : index
    %362 = vector.load %arg8[%c1_140, %c0_141, %c0_142] : memref<2x1x32xf32, #tpu.memory_space<vmem>>, vector<1x1x32xf32>
    %363 = vector.shape_cast %362 : vector<1x1x32xf32> to vector<1x32xf32>
    %364 = vector.broadcast %363 : vector<1x32xf32> to vector<16x32xf32>
    %365 = arith.addf %361, %364 : vector<16x32xf32>
    %366 = arith.addf %249, %365 : vector<16x32xf32>
    %c1_143 = arith.constant 1 : index
    %c0_144 = arith.constant 0 : index
    %c0_145 = arith.constant 0 : index
    %367 = vector.load %arg9[%c1_143, %c0_144, %c0_145] : memref<2x1x32xf32, #tpu.memory_space<vmem>>, vector<1x1x32xf32>
    %368 = vector.shape_cast %367 : vector<1x1x32xf32> to vector<1x32xf32>
    %c1_146 = arith.constant 1 : index
    %c0_147 = arith.constant 0 : index
    %c0_148 = arith.constant 0 : index
    %369 = vector.load %arg10[%c1_146, %c0_147, %c0_148] : memref<2x1x32xf32, #tpu.memory_space<vmem>>, vector<1x1x32xf32>
    %370 = vector.shape_cast %369 : vector<1x1x32xf32> to vector<1x32xf32>
    %cst_149 = arith.constant dense<0.000000e+00> : vector<16xf32>
    %371 = vector.multi_reduction <add>, %366, %cst_149 [1] : vector<16x32xf32> to vector<16xf32>
    %372 = vector.shape_cast %371 : vector<16xf32> to vector<16x1xf32>
    %cst_150 = arith.constant 3.200000e+01 : f32
    %373 = vector.broadcast %cst_150 : f32 to vector<16x1xf32>
    %374 = arith.divf %372, %373 : vector<16x1xf32>
    %375 = vector.broadcast %374 : vector<16x1xf32> to vector<16x32xf32>
    %376 = arith.subf %366, %375 : vector<16x32xf32>
    %377 = arith.mulf %376, %376 : vector<16x32xf32>
    %cst_151 = arith.constant dense<0.000000e+00> : vector<16xf32>
    %378 = vector.multi_reduction <add>, %377, %cst_151 [1] : vector<16x32xf32> to vector<16xf32>
    %379 = vector.shape_cast %378 : vector<16xf32> to vector<16x1xf32>
    %cst_152 = arith.constant 3.200000e+01 : f32
    %380 = vector.broadcast %cst_152 : f32 to vector<16x1xf32>
    %381 = arith.divf %379, %380 : vector<16x1xf32>
    %cst_153 = arith.constant 9.99999974E-6 : f32
    %382 = vector.broadcast %cst_153 : f32 to vector<16x1xf32>
    %383 = arith.addf %381, %382 : vector<16x1xf32>
    %384 = math.rsqrt %383 : vector<16x1xf32>
    %385 = vector.broadcast %384 : vector<16x1xf32> to vector<16x32xf32>
    %386 = arith.mulf %376, %385 : vector<16x32xf32>
    %387 = vector.broadcast %368 : vector<1x32xf32> to vector<16x32xf32>
    %388 = arith.mulf %386, %387 : vector<16x32xf32>
    %389 = vector.broadcast %370 : vector<1x32xf32> to vector<16x32xf32>
    %390 = arith.addf %388, %389 : vector<16x32xf32>
    %c1_154 = arith.constant 1 : index
    %c0_155 = arith.constant 0 : index
    %c0_156 = arith.constant 0 : index
    %391 = vector.load %arg11[%c1_154, %c0_155, %c0_156] : memref<2x32x4xf32, #tpu.memory_space<vmem>>, vector<1x32x4xf32>
    %392 = vector.shape_cast %391 : vector<1x32x4xf32> to vector<32x4xf32>
    %cst_157 = arith.constant dense<0.000000e+00> : vector<16x4xf32>
    %393 = tpu.matmul %390, %392, %cst_157 {dimension_numbers = #tpu.dot_dimension_numbers<[1], [0], [0], [1], [0, 0, 1, 1], [], []>} : vector<16x32xf32>, vector<32x4xf32>, vector<16x4xf32> -> vector<16x4xf32>
    %c1_158 = arith.constant 1 : index
    %c0_159 = arith.constant 0 : index
    %c0_160 = arith.constant 0 : index
    %394 = vector.load %arg12[%c1_158, %c0_159, %c0_160] : memref<2x1x4xf32, #tpu.memory_space<vmem>>, vector<1x1x4xf32>
    %395 = vector.shape_cast %394 : vector<1x1x4xf32> to vector<1x4xf32>
    %396 = vector.broadcast %395 : vector<1x4xf32> to vector<16x4xf32>
    %397 = arith.addf %393, %396 : vector<16x4xf32>
    %cst_161 = arith.constant dense<0xFF800000> : vector<16xf32>
    %398 = vector.multi_reduction <maximumf>, %397, %cst_161 [1] : vector<16x4xf32> to vector<16xf32>
    %399 = vector.shape_cast %398 : vector<16xf32> to vector<16x1xf32>
    %400 = vector.broadcast %399 : vector<16x1xf32> to vector<16x4xf32>
    %401 = arith.subf %397, %400 : vector<16x4xf32>
    %402 = math.exp %401 : vector<16x4xf32>
    %cst_162 = arith.constant dense<0.000000e+00> : vector<16xf32>
    %403 = vector.multi_reduction <add>, %402, %cst_162 [1] : vector<16x4xf32> to vector<16xf32>
    %404 = vector.shape_cast %403 : vector<16xf32> to vector<16x1xf32>
    %405 = tpu.reciprocal %404 {approx = true} : vector<16x1xf32> -> vector<16x1xf32>
    %406 = vector.broadcast %405 : vector<16x1xf32> to vector<16x4xf32>
    %407 = arith.mulf %402, %406 : vector<16x4xf32>
    %408 = tpu.iota {dimensions = array<i32: 1>} : vector<16x4xi32>
    %cst_163 = arith.constant dense<0xFF800000> : vector<16xf32>
    %409 = vector.multi_reduction <maximumf>, %407, %cst_163 [1] : vector<16x4xf32> to vector<16xf32>
    %410 = vector.shape_cast %409 : vector<16xf32> to vector<16x1xf32>
    %411 = vector.broadcast %410 : vector<16x1xf32> to vector<16x4xf32>
    %412 = arith.cmpf oeq, %407, %411 : vector<16x4xf32>
    %c4_i32_164 = arith.constant 4 : i32
    %413 = vector.broadcast %c4_i32_164 : i32 to vector<16x4xi32>
    %414 = arith.select %412, %408, %413 : vector<16x4xi1>, vector<16x4xi32>
    %cst_165 = arith.constant dense<2147483647> : vector<16xi32>
    %415 = vector.multi_reduction <minsi>, %414, %cst_165 [1] : vector<16x4xi32> to vector<16xi32>
    %416 = vector.shape_cast %415 : vector<16xi32> to vector<16x1xi32>
    %417 = vector.broadcast %416 : vector<16x1xi32> to vector<16x4xi32>
    %418 = arith.cmpi eq, %408, %417 : vector<16x4xi32>
    %cst_166 = arith.constant -1.000000e+00 : f32
    %419 = vector.broadcast %cst_166 : f32 to vector<16x4xf32>
    %420 = arith.select %418, %419, %407 : vector<16x4xi1>, vector<16x4xf32>
    %cst_167 = arith.constant dense<0xFF800000> : vector<16xf32>
    %421 = vector.multi_reduction <maximumf>, %420, %cst_167 [1] : vector<16x4xf32> to vector<16xf32>
    %422 = vector.shape_cast %421 : vector<16xf32> to vector<16x1xf32>
    %423 = vector.broadcast %422 : vector<16x1xf32> to vector<16x4xf32>
    %424 = arith.cmpf oeq, %420, %423 : vector<16x4xf32>
    %c4_i32_168 = arith.constant 4 : i32
    %425 = vector.broadcast %c4_i32_168 : i32 to vector<16x4xi32>
    %426 = arith.select %424, %408, %425 : vector<16x4xi1>, vector<16x4xi32>
    %cst_169 = arith.constant dense<2147483647> : vector<16xi32>
    %427 = vector.multi_reduction <minsi>, %426, %cst_169 [1] : vector<16x4xi32> to vector<16xi32>
    %428 = vector.shape_cast %427 : vector<16xi32> to vector<16x1xi32>
    %429 = vector.broadcast %428 : vector<16x1xi32> to vector<16x4xi32>
    %430 = arith.cmpi eq, %408, %429 : vector<16x4xi32>
    %431 = arith.ori %418, %430 : vector<16x4xi1>
    %cst_170 = arith.constant 0.000000e+00 : f32
    %432 = vector.broadcast %cst_170 : f32 to vector<16x4xf32>
    %433 = arith.select %431, %407, %432 : vector<16x4xi1>, vector<16x4xf32>
    %cst_171 = arith.constant dense<0.000000e+00> : vector<16xf32>
    %434 = vector.multi_reduction <add>, %433, %cst_171 [1] : vector<16x4xf32> to vector<16xf32>
    %435 = vector.shape_cast %434 : vector<16xf32> to vector<16x1xf32>
    %436 = vector.broadcast %435 : vector<16x1xf32> to vector<16x4xf32>
    %437 = arith.divf %433, %436 : vector<16x4xf32>
    %c1_172 = arith.constant 1 : index
    %c0_173 = arith.constant 0 : index
    %c0_174 = arith.constant 0 : index
    %438 = vector.load %arg13[%c1_172, %c0_173, %c0_174] : memref<2x32x512xf32, #tpu.memory_space<vmem>>, vector<1x32x512xf32>
    %439 = vector.shape_cast %438 : vector<1x32x512xf32> to vector<32x512xf32>
    %cst_175 = arith.constant dense<0.000000e+00> : vector<16x512xf32>
    %440 = tpu.matmul %390, %439, %cst_175 {dimension_numbers = #tpu.dot_dimension_numbers<[1], [0], [0], [1], [0, 0, 1, 1], [], []>} : vector<16x32xf32>, vector<32x512xf32>, vector<16x512xf32> -> vector<16x512xf32>
    %c1_176 = arith.constant 1 : index
    %c0_177 = arith.constant 0 : index
    %c0_178 = arith.constant 0 : index
    %441 = vector.load %arg14[%c1_176, %c0_177, %c0_178] : memref<2x1x512xf32, #tpu.memory_space<vmem>>, vector<1x1x512xf32>
    %442 = vector.shape_cast %441 : vector<1x1x512xf32> to vector<1x512xf32>
    %443 = vector.broadcast %442 : vector<1x512xf32> to vector<16x512xf32>
    %444 = arith.addf %440, %443 : vector<16x512xf32>
    %cst_179 = arith.constant 5.000000e-01 : f32
    %445 = vector.broadcast %cst_179 : f32 to vector<16x512xf32>
    %446 = arith.mulf %445, %444 : vector<16x512xf32>
    %cst_180 = arith.constant 4.471500e-02 : f32
    %447 = vector.broadcast %cst_180 : f32 to vector<16x512xf32>
    %448 = arith.mulf %447, %444 : vector<16x512xf32>
    %449 = arith.mulf %448, %444 : vector<16x512xf32>
    %450 = arith.mulf %449, %444 : vector<16x512xf32>
    %451 = arith.addf %444, %450 : vector<16x512xf32>
    %cst_181 = arith.constant 0.797884583 : f32
    %452 = vector.broadcast %cst_181 : f32 to vector<16x512xf32>
    %453 = arith.mulf %452, %451 : vector<16x512xf32>
    %454 = math.tanh %453 : vector<16x512xf32>
    %cst_182 = arith.constant 1.000000e+00 : f32
    %455 = vector.broadcast %cst_182 : f32 to vector<16x512xf32>
    %456 = arith.addf %455, %454 : vector<16x512xf32>
    %457 = arith.mulf %446, %456 : vector<16x512xf32>
    %458 = vector.extract_strided_slice %457 {offsets = [0, 0], sizes = [16, 128], strides = [1, 1]} : vector<16x512xf32> to vector<16x128xf32>
    %459 = vector.extract_strided_slice %437 {offsets = [0, 0], sizes = [16, 1], strides = [1, 1]} : vector<16x4xf32> to vector<16x1xf32>
    %460 = vector.broadcast %459 : vector<16x1xf32> to vector<16x128xf32>
    %461 = arith.mulf %458, %460 : vector<16x128xf32>
    %462 = vector.extract_strided_slice %457 {offsets = [0, 128], sizes = [16, 128], strides = [1, 1]} : vector<16x512xf32> to vector<16x128xf32>
    %463 = vector.extract_strided_slice %437 {offsets = [0, 1], sizes = [16, 1], strides = [1, 1]} : vector<16x4xf32> to vector<16x1xf32>
    %464 = vector.broadcast %463 : vector<16x1xf32> to vector<16x128xf32>
    %465 = arith.mulf %462, %464 : vector<16x128xf32>
    %466 = vector.extract_strided_slice %457 {offsets = [0, 256], sizes = [16, 128], strides = [1, 1]} : vector<16x512xf32> to vector<16x128xf32>
    %467 = vector.extract_strided_slice %437 {offsets = [0, 2], sizes = [16, 1], strides = [1, 1]} : vector<16x4xf32> to vector<16x1xf32>
    %468 = vector.broadcast %467 : vector<16x1xf32> to vector<16x128xf32>
    %469 = arith.mulf %466, %468 : vector<16x128xf32>
    %470 = vector.extract_strided_slice %457 {offsets = [0, 384], sizes = [16, 128], strides = [1, 1]} : vector<16x512xf32> to vector<16x128xf32>
    %471 = vector.extract_strided_slice %437 {offsets = [0, 3], sizes = [16, 1], strides = [1, 1]} : vector<16x4xf32> to vector<16x1xf32>
    %472 = vector.broadcast %471 : vector<16x1xf32> to vector<16x128xf32>
    %473 = arith.mulf %470, %472 : vector<16x128xf32>
    %474 = tpu.concatenate %461, %465, %469, %473 in 1 : vector<16x128xf32>, vector<16x128xf32>, vector<16x128xf32>, vector<16x128xf32> -> vector<16x512xf32>
    %c1_183 = arith.constant 1 : index
    %c0_184 = arith.constant 0 : index
    %c0_185 = arith.constant 0 : index
    %475 = vector.load %arg15[%c1_183, %c0_184, %c0_185] : memref<2x512x32xf32, #tpu.memory_space<vmem>>, vector<1x512x32xf32>
    %476 = vector.shape_cast %475 : vector<1x512x32xf32> to vector<512x32xf32>
    %cst_186 = arith.constant dense<0.000000e+00> : vector<16x32xf32>
    %477 = tpu.matmul %474, %476, %cst_186 {dimension_numbers = #tpu.dot_dimension_numbers<[1], [0], [0], [1], [0, 0, 1, 1], [], []>} : vector<16x512xf32>, vector<512x32xf32>, vector<16x32xf32> -> vector<16x32xf32>
    %c1_187 = arith.constant 1 : index
    %c0_188 = arith.constant 0 : index
    %c0_189 = arith.constant 0 : index
    %478 = vector.load %arg16[%c1_187, %c0_188, %c0_189] : memref<2x4x32xf32, #tpu.memory_space<vmem>>, vector<1x4x32xf32>
    %479 = vector.shape_cast %478 : vector<1x4x32xf32> to vector<4x32xf32>
    %cst_190 = arith.constant dense<0.000000e+00> : vector<16x32xf32>
    %480 = tpu.matmul %437, %479, %cst_190 {dimension_numbers = #tpu.dot_dimension_numbers<[1], [0], [0], [1], [0, 0, 1, 1], [], []>} : vector<16x4xf32>, vector<4x32xf32>, vector<16x32xf32> -> vector<16x32xf32>
    %481 = arith.addf %477, %480 : vector<16x32xf32>
    %482 = arith.addf %366, %481 : vector<16x32xf32>
    %c0_191 = arith.constant 0 : index
    %c0_192 = arith.constant 0 : index
    %483 = vector.load %arg17[%c0_191, %c0_192] : memref<1x32xf32, #tpu.memory_space<vmem>>, vector<1x32xf32>
    %c0_193 = arith.constant 0 : index
    %c0_194 = arith.constant 0 : index
    %484 = vector.load %arg18[%c0_193, %c0_194] : memref<1x32xf32, #tpu.memory_space<vmem>>, vector<1x32xf32>
    %cst_195 = arith.constant dense<0.000000e+00> : vector<16xf32>
    %485 = vector.multi_reduction <add>, %482, %cst_195 [1] : vector<16x32xf32> to vector<16xf32>
    %486 = vector.shape_cast %485 : vector<16xf32> to vector<16x1xf32>
    %cst_196 = arith.constant 3.200000e+01 : f32
    %487 = vector.broadcast %cst_196 : f32 to vector<16x1xf32>
    %488 = arith.divf %486, %487 : vector<16x1xf32>
    %489 = vector.broadcast %488 : vector<16x1xf32> to vector<16x32xf32>
    %490 = arith.subf %482, %489 : vector<16x32xf32>
    %491 = arith.mulf %490, %490 : vector<16x32xf32>
    %cst_197 = arith.constant dense<0.000000e+00> : vector<16xf32>
    %492 = vector.multi_reduction <add>, %491, %cst_197 [1] : vector<16x32xf32> to vector<16xf32>
    %493 = vector.shape_cast %492 : vector<16xf32> to vector<16x1xf32>
    %cst_198 = arith.constant 3.200000e+01 : f32
    %494 = vector.broadcast %cst_198 : f32 to vector<16x1xf32>
    %495 = arith.divf %493, %494 : vector<16x1xf32>
    %cst_199 = arith.constant 9.99999974E-6 : f32
    %496 = vector.broadcast %cst_199 : f32 to vector<16x1xf32>
    %497 = arith.addf %495, %496 : vector<16x1xf32>
    %498 = math.rsqrt %497 : vector<16x1xf32>
    %499 = vector.broadcast %498 : vector<16x1xf32> to vector<16x32xf32>
    %500 = arith.mulf %490, %499 : vector<16x32xf32>
    %501 = vector.broadcast %483 : vector<1x32xf32> to vector<16x32xf32>
    %502 = arith.mulf %500, %501 : vector<16x32xf32>
    %503 = vector.broadcast %484 : vector<1x32xf32> to vector<16x32xf32>
    %504 = arith.addf %502, %503 : vector<16x32xf32>
    %cst_200 = arith.constant dense<0.000000e+00> : vector<16x128xf32>
    %505 = tpu.matmul %504, %0, %cst_200 {dimension_numbers = #tpu.dot_dimension_numbers<[1], [1], [0], [0], [0, 0, 1, 0], [], []>} : vector<16x32xf32>, vector<128x32xf32>, vector<16x128xf32> -> vector<16x128xf32>
    %c0_201 = arith.constant 0 : index
    %c0_202 = arith.constant 0 : index
    %506 = vector.load %arg19[%c0_201, %c0_202] : memref<16x128xf32, #tpu.memory_space<vmem>>, vector<16x128xf32>
    tpu.vector_store %arg19[%c0_201, %c0_202], %505 {strides = array<i32>} : memref<16x128xf32, #tpu.memory_space<vmem>>, vector<16x128xf32>,
    return
  }
}

</mosaic_0001>

<bundles_post_ra>
// kernel: distilgpt2_moe_forward.1
= control target key start
LH: loop header
LB: loop body
LE: loop exit
PB: predicated region body
PF: predicated region fallthrough
CT: control target
= control target key end

     0   :  { %s4150_s0 = inlined_call_operand.vmem [shape: s32[16,1], index: 0, kind: input, shape index: {}]   ;;  %s4151_s1 = inlined_call_operand.vmem [shape: f32[128,32], index: 1, kind: input, shape index: {}]   ;;  %s4152_s2 = inlined_call_operand.vmem [shape: f32[8,32], index: 2, kind: input, shape index: {}]   ;;  %s4153_s3 = inlined_call_operand.vmem [shape: f32[2,1,32], index: 3, kind: input, shape index: {}]   ;;  %s4154_s4 = inlined_call_operand.vmem [shape: f32[2,1,32], index: 4, kind: input, shape index: {}]   ;;  %s4155_s5 = inlined_call_operand.vmem [shape: f32[2,32,96], index: 5, kind: input, shape index: {}]   ;;  %s4156_s6 = inlined_call_operand.vmem [shape: f32[2,1,96], index: 6, kind: input, shape index: {}]   ;;  %s4157_s7 = inlined_call_operand.vmem [shape: f32[2,32,32], index: 7, kind: input, shape index: {}]   ;;  %s4158_s8 = inlined_call_operand.vmem [shape: f32[2,1,32], index: 8, kind: input, shape index: {}]   ;;  %s4159_s9 = inlined_call_operand.vmem [shape: f32[2,1,32], index: 9, kind: input, shape index: {}]   ;;  %s4160_s10 = inlined_call_operand.vmem [shape: f32[2,1,32], index: 10, kind: input, shape index: {}]   ;;  %s4161_s11 = inlined_call_operand.vmem [shape: f32[2,32,4], index: 11, kind: input, shape index: {}]   ;;  %s4162_s12 = inlined_call_operand.vmem [shape: f32[2,1,4], index: 12, kind: input, shape index: {}]   ;;  %s4163_s13 = inlined_call_operand.vmem [shape: f32[2,32,512], index: 13, kind: input, shape index: {}]   ;;  %s4164_s14 = inlined_call_operand.vmem [shape: f32[2,1,512], index: 14, kind: input, shape index: {}]   ;;  %s4165_s15 = inlined_call_operand.vmem [shape: f32[2,512,32], index: 15, kind: input, shape index: {}]   ;;  %s4166_s16 = inlined_call_operand.vmem [shape: f32[2,4,32], index: 16, kind: input, shape index: {}]   ;;  %s4167_s17 = inlined_call_operand.vmem [shape: f32[1,32], index: 17, kind: input, shape index: {}]   ;;  %s4168_s18 = inlined_call_operand.vmem [shape: f32[1,32], index: 18, kind: input, shape index: {}]   ;;  %s4169_s19 = inlined_call_operand.hbm [shape: f32[16,128], index: 19, kind: output, shape index: {}]  }
   0x1   :  { %4180 = sst [smem:[#allocation5_spill]] %s4150_s0 }
   0x2   :  { %4181 = sst [smem:[#allocation6_spill]] %s4151_s1 }
   0x3   :  { %4182 = sst [smem:[#allocation7_spill]] %s4152_s2 }
   0x4   :  { %4183 = sst [smem:[#allocation8_spill]] %s4153_s3 }
   0x5   :  { %4184 = sst [smem:[#allocation9_spill]] %s4164_s14 }
   0x6   :  { %s4185_s20 = sld [smem:[#allocation5_spill]]  ;;  %v2824_v3 = vmov 0  }
   0x7   :  { %s4186_s14 = sld [smem:[#allocation6_spill]]  ;;  %2639 = vset.pattern.permute.xlu0 %v2824_v3  ;;  %2640 = vset.pattern.permute.xlu1 %v2824_v3 }
   0xc   :  { %v79_v0 = vld [vmem:[%s4185_s20] sm:$0xff] }
   0xd   :  { %v78_v1 = vld [vmem:[%s4186_s14 + $0x78] sm:$0xff]  ;;  %v77_v2 = vld [vmem:[%s4186_s14 + $0x70] sm:$0xff]  ;;  %84 = vperm.xlu0 %2639, %v79_v0   ;;  %v76_v4 = vld [vmem:[%s4186_s14 + $0x68] sm:$0xff] }
   0xe   :  { %96 = vmatpush.msra.mxu0 %v78_v1  ;;  %v75_v5 = vld [vmem:[%s4186_s14 + $0x60] sm:$0xff]  ;;  %v74_v6 = vld [vmem:[%s4186_s14 + $0x58] sm:$0xff]  ;;  %v73_v7 = vld [vmem:[%s4186_s14 + $0x50] sm:$0xff] }
   0xf   :  { %v72_v8 = vld [vmem:[%s4186_s14 + $0x48] sm:$0xff] }
  0x10   :  { %97 = vmatpush.msra.mxu0 %v77_v2 }
  0x12   :  { %98 = vmatpush.msra.mxu0 %v76_v4 }
  0x14   :  { %99 = vmatpush.msra.mxu0 %v75_v5 }
  0x16   :  { %100 = vmatpush.msra.mxu0 %v74_v6 }
  0x17   :  { %24 = vsyncpa [#allocation3], 0  ;;  %v71_v9 = vld [vmem:[%s4186_s14 + $0x40] sm:$0xff]  ;;  %v70_v10 = vld [vmem:[%s4186_s14 + $0x38] sm:$0xff]  ;;  %v81_v18 = vlaneseq  ;;  %v2825_v21 = vmov 1.0   ;;  %s4187_s25 = sld [smem:[#allocation7_spill]] }
  0x18   :  { %101 = vmatpush.msra.mxu0 %v73_v7  ;;  %v69_v11 = vld [vmem:[%s4186_s14 + $0x30] sm:$0xff]  ;;  %v68_v12 = vld [vmem:[%s4186_s14 + $0x28] sm:$0xff]  ;;  %v67_v13 = vld [vmem:[%s4186_s14 + $0x20] sm:$0xff]  ;;  %vm125_vm1 = vcmask 261120   ;;  %v2826_v26 = vmov 32.0   ;;  %s4188_s23 = sld [smem:[#allocation8_spill]] }
  0x19   :  { %v66_v14 = vld [vmem:[%s4186_s14 + $0x18] sm:$0xff]  ;;  %v65_v15 = vld [vmem:[%s4186_s14 + $0x10] sm:$0xff]  ;;  %v64_v16 = vld [vmem:[%s4186_s14 + $0x8] sm:$0xff]  ;;  %v2994_v19 = vand.u32 127, %v81_v18  ;;  %2672 = vrcp.f32 %v2826_v26  ;;  %s2827_s27 = smov 80   ;;  %s2828_s28 = smov 96  }
  0x1a   :  { %102 = vmatpush.msra.mxu0 %v72_v8  ;;  %v63_v17 = vld [vmem:[%s4186_s14] sm:$0xff]  ;;  %v80_v38 = vld [vmem:[%s4185_s20 + $0x8] sm:$0xff]  ;;  %v190_v39 = vld [vmem:[%s4155_s5 + $0x18] sm:$0xff]  ;;  %vm227_vm7 = vcmask 130048   ;;  %s2829_s29 = smov 112   ;;  %v120_v8 = vshrl.u32 %v81_v18, 7 }
  0x1b   :  { %213 = vmatpush.msra.mxu1 %v190_v39  ;;  %v189_v40 = vld [vmem:[%s4155_s5 + $0x10] sm:$0xff]  ;;  %v188_v41 = vld [vmem:[%s4155_s5 + $0x8] sm:$0xff]  ;;  %v187_v42 = vld [vmem:[%s4155_s5] sm:$0xff]  ;;  %vm254_vm9 = vcmask 64512   ;;  %s4178_s0 = smov 64   ;;  %s4176_s30 = smov 48  }
  0x1c   :  { %103 = vmatpush.msra.mxu0 %v71_v9  ;;  %v2657_v55 = vld [vmem:[%s4154_s4] ss:$0 sm:$0xff]  ;;  %vm121_vm8 = vcmp.le.s32.totalorder %v2994_v19, %v120_v8  ;;  %s4174_s21 = smov 16   ;;  %s2430_s24 = sshll.u32 %s4169_s19, 4  ;;  %s2431_s24 = int_to_ptr.hbm [resolvable:$true] %s2430_s24 }
  0x1d   :  { %v95_v22 = vld [vmem:[%s4187_s25] sm:$0xff]  ;;  %214 = vmatpush.msra.mxu1 %v189_v40  ;;  %s4192_s25 = smov 16   ;;  %s2839_s3 = smov 8  }
  0x1e   :  { %104 = vmatpush.msra.mxu0 %v70_v10  ;;  %v2656_v52 = vld [vmem:[%s4188_s23] ss:$0 sm:$0xff]  ;;  %v2830_v10 = vmov -1e+09  }
  0x1f   :  { %v2673_v27 = vpop.eup %2672  ;;  %215 = vmatpush.msra.mxu1 %v188_v41  ;;  %v3036_v59 = vld [vmem:[%s4156_s6] ss:$0 sm:$0xff] }
  0x20   :  { %105 = vmatpush.msra.mxu0 %v69_v11  ;;  %v133_v28 = vmul.f32 32.0, %v2673_v27  ;;  %vm137_vm2 = vweird.f32 %v2673_v27  ;;  %v3059_v11 = vsel %vm121_vm8, 0.0, %v2830_v10 }
  0x21   :  { %216 = vmatpush.msra.mxu1 %v187_v42 }
  0x22   :  { %106 = vmatpush.msra.mxu0 %v68_v12  ;;  %v134_v29 = vsub.f32 1.0, %v133_v28 }
  0x24   :  { %107 = vmatpush.msra.mxu0 %v67_v13  ;;  %v135_v30 = vmul.f32 %v2673_v27, %v134_v29 }
  0x26   :  { %108 = vmatpush.msra.mxu0 %v66_v14  ;;  %v136_v31 = vadd.f32 %v2673_v27, %v135_v30 }
  0x28   :  { %109 = vmatpush.msra.mxu0 %v65_v15  ;;  %v3004_v32 = vsel %vm137_vm2, %v2673_v27, %v136_v31 }
  0x2a   :  { %110 = vmatpush.msra.mxu0 %v64_v16 }
  0x2c   :  { %111 = vmatpush.msra.mxu0 %v63_v17 }
  0x7f   :  { %v85_v20 = vpop.permute.xlu0 %84 }
  0x80   :  { %vm89_vm0 = vcmp.eq.s32.totalorder %v2994_v19, %v85_v20 }
  0x81   :  { %2444 = vmatmul.msk.f32.vlgmr.msra.gmra.mxu0 %vm89_vm0, %v2825_v21 }
  0xfe   :  { %v113_v23 = vpop.f32.mrf.mxu0 }
  0xff   :  { %v3000_v24 = vadd.f32 %v113_v23, %v95_v22 }
 0x101   :  { %v126_v25 = vsel %vm125_vm1, %v3000_v24, 0.0 }
 0x102   :  { %127 = vadd.xlane.f32.xlu0 %v126_v25 }
 0x175   :  { %v128_v33 = vpop.xlane.xlu0 %127 }
 0x176   :  { %v139_v34 = vmul.f32 %v3004_v32, %v128_v33 }
 0x178   :  { %v141_v35 = vsub.f32 %v3000_v24, %v139_v34 }
 0x17a   :  { %v143_v36 = vmul.f32 %v141_v35, %v141_v35 }
 0x17c   :  { %v145_v37 = vsel %vm125_vm1, %v143_v36, 0.0 }
 0x17d   :  { %146 = vadd.xlane.f32.xlu1 %v145_v37 }
 0x196   :  { %87 = vperm.xlu1 %2640, %v80_v38  }
 0x1f0   :  { %v147_v43 = vpop.xlane.xlu1 %146 }
 0x1f1   :  { %v151_v44 = vmul.f32 %v147_v43, %v3004_v32 }
 0x1f3   :  { %v153_v45 = vadd.f32 1e-05, %v151_v44 }
 0x1f5   :  { %2674 = vrsqrt.f32 %v153_v45  ;;  %vm161_vm4 = vweird.f32 %v153_v45 }
 0x1fb   :  { %v2675_v46 = vpop.eup %2674 }
 0x1fc   :  { %v156_v47 = vmul.f32 %v2675_v46, %v153_v45  ;;  %vm162_vm3 = vweird.f32 %v2675_v46 }
 0x1fd   :  { %vm163_vm5 = vmor %vm161_vm4, %vm162_vm3  ;;  %vm634_vm4 = vcmask 31744  }
 0x1fe   :  { %v157_v48 = vmul.f32 %v2675_v46, %v156_v47 }
 0x200   :  { %v158_v49 = vmul.f32 0.5, %v157_v48 }
 0x202   :  { %v159_v50 = vsub.f32 1.5, %v158_v49 }
 0x204   :  { %v160_v51 = vmul.f32 %v2675_v46, %v159_v50 }
 0x206   :  { %v164_v53 = vsel %vm163_vm5, %v2675_v46, %v160_v51 }
 0x207   :  { %v175_v54 = vmul.f32 %v164_v53, %v141_v35 }
 0x208   :  { %v88_v56 = vpop.permute.xlu1 %87 }
 0x209   :  { %v180_v57 = vmul.f32 %v2656_v52, %v175_v54  ;;  %vm90_vm6 = vcmp.eq.s32.totalorder %v2994_v19, %v88_v56 }
 0x20a   :  { %2445 = vmatmul.msk.f32.gmra.mxu0 %vm90_vm6, %v2825_v21 }
 0x20b   :  { %v185_v58 = vadd.f32 %v2657_v55, %v180_v57 }
 0x20d   :  { %2446 = vmatmul.msk.f32.vlgmr.msra.gmra.mxu1 %vm125_vm1, %v185_v58 }
 0x287   :  { %v116_v62 = vpop.f32.mrf.mxu0 }
 0x288   :  { %v3045_v63 = vadd.f32 %v116_v62, %v95_v22 }
 0x28a   :  { %v218_v60 = vpop.f32.mrf.mxu1  ;;  %v129_v0 = vsel %vm125_vm1, %v3045_v63, 0.0 }
 0x28b   :  { %v3039_v61 = vadd.f32 %v3036_v59, %v218_v60 }
 0x28d   :  { %294 = vrot.lane.b32.xlu0 %v3039_v61, %s2827_s27  ;;  %225 = vrot.lane.b32.xlu2 %v3039_v61, %s2828_s28 }
 0x2b6   :  { %130 = vadd.xlane.f32.xlu2 %v129_v0 }
 0x2e7   :  { %v226_v1 = vpop.permute.xlu2 %225 }
 0x2e8   :  { %2448 = vmatpush.xpose.msk.msra.mxu2 %vm227_vm7, %v226_v1 }
 0x2eb   :  { %2449 = vmatmul.msk.f32.vlgmr.msra.gmra.mxu2 %vm227_vm7, %v3039_v61 }
 0x2ff   :  { %v295_v35 = vpop.permute.xlu0 %294 }
 0x329   :  { %v131_v2 = vpop.xlane.xlu2 %130 }
 0x32a   :  { %v140_v4 = vmul.f32 %v3004_v32, %v131_v2 }
 0x32c   :  { %v142_v5 = vsub.f32 %v3045_v63, %v140_v4 }
 0x32e   :  { %v144_v6 = vmul.f32 %v142_v5, %v142_v5 }
 0x330   :  { %v148_v7 = vsel %vm125_vm1, %v144_v6, 0.0 }
 0x331   :  { %149 = vadd.xlane.f32.xlu1 %v148_v7 }
 0x34a   :  { %292 = vrot.lane.b32.xlu1 %v3039_v61, %s2829_s29 }
 0x36e   :  { %v249_v9 = vpop.f32.mrf.mxu2 }
 0x36f   :  { %v252_v12 = vmul.f32 0.25, %v249_v9 }
 0x371   :  { %v253_v13 = vadd.f32 %v252_v12, %v3059_v11 }
 0x373   :  { %v255_v14 = vsel %vm254_vm9, %v253_v13, -inf }
 0x374   :  { %256 = vmax.xlane.f32.xlu2 %v255_v14 }
 0x38c   :  { %266 = vrot.lane.b32.xlu2 %v3039_v61, %s4178_s0 }
 0x3a4   :  { %v150_v15 = vpop.xlane.xlu1 %149 }
 0x3a5   :  { %v152_v16 = vmul.f32 %v150_v15, %v3004_v32 }
 0x3a7   :  { %v154_v17 = vadd.f32 1e-05, %v152_v16 }
 0x3a9   :  { %2676 = vrsqrt.f32 %v154_v17  ;;  %vm171_vm11 = vweird.f32 %v154_v17 }
 0x3af   :  { %v2677_v18 = vpop.eup %2676 }
 0x3b0   :  { %v166_v20 = vmul.f32 %v2677_v18, %v154_v17  ;;  %vm172_vm10 = vweird.f32 %v2677_v18 }
 0x3b1   :  { %vm173_vm12 = vmor %vm171_vm11, %vm172_vm10 }
 0x3b2   :  { %v167_v21 = vmul.f32 %v2677_v18, %v166_v20 }
 0x3b4   :  { %v168_v22 = vmul.f32 0.5, %v167_v21 }
 0x3b6   :  { %v169_v23 = vsub.f32 1.5, %v168_v22 }
 0x3b8   :  { %v170_v25 = vmul.f32 %v2677_v18, %v169_v23 }
 0x3ba   :  { %v174_v26 = vsel %vm173_vm12, %v2677_v18, %v170_v25 }
 0x3bb   :  { %v176_v27 = vmul.f32 %v174_v26, %v142_v5 }
 0x3bc   :  { %v293_v43 = vpop.permute.xlu1 %292 }
 0x3bd   :  { %v181_v28 = vmul.f32 %v2656_v52, %v176_v27 }
 0x3bf   :  { %v186_v29 = vadd.f32 %v2657_v55, %v181_v28 }
 0x3c1   :  { %2447 = vmatmul.msk.f32.gmra.mxu1 %vm125_vm1, %v186_v29  ;;  %v505_v29 = vld [vmem:[%s4157_s7 + $0x18] sm:$0xff] }
 0x3e7   :  { %v257_v30 = vpop.xlane.xlu2 %256 }
 0x3e8   :  { %v258_v31 = vsub.f32 %v253_v13, %v257_v30  ;;  %v504_v30 = vld [vmem:[%s4157_s7 + $0x10] sm:$0xff] }
 0x3ea   :  { %v259_v33 = vmul.f32 1.442695, %v258_v31  ;;  %v503_v31 = vld [vmem:[%s4157_s7 + $0x8] sm:$0xff] }
 0x3ec   :  { %2678 = vpow2.f32 %v259_v33 }
 0x3ef   :  { %v267_v34 = vpop.permute.xlu2 %266 }
 0x3f0   :  { %287 = vmatpush.msra.mxu3 %v267_v34  ;;  %v502_v34 = vld [vmem:[%s4157_s7] sm:$0xff] }
 0x3f2   :  { %2451 = vmatpush.xpose.msk.msrb.mxu3 %vm227_vm7, %v295_v35  ;;  %v2679_v36 = vpop.eup %2678 }
 0x3f3   :  { %v261_v37 = vsel %vm254_vm9, %v2679_v36, 0.0 }
 0x3f4   :  { %262 = vadd.xlane.f32.xlu0 %v261_v37 }
 0x43e   :  { %v221_v38 = vpop.f32.mrf.mxu1 }
 0x43f   :  { %v222_v39 = vadd.f32 %v3036_v59, %v221_v38 }
 0x441   :  { %430 = vrot.lane.b32.xlu2 %v222_v39, %s2829_s29  ;;  %432 = vrot.lane.b32.xlu0 %v222_v39, %s2827_s27 }
 0x449   :  { %365 = vrot.lane.b32.xlu0 %v222_v39, %s2828_s28 }
 0x467   :  { %v263_v40 = vpop.xlane.xlu0 %262 }
 0x468   :  { %2680 = vrcp.f32 %v263_v40  ;;  %v2659_v40 = vld [vmem:[%s4158_s8] ss:$0 sm:$0xff] }
 0x46e   :  { %v2681_v41 = vpop.eup %2680 }
 0x46f   :  { %v265_v42 = vmul.f32 %v2681_v41, %v2679_v36 }
 0x471   :  { %2450 = vmatmul.msk.f32.vlgmr.msra.gmra.mxu3 %vm254_vm9, %v265_v42 }
 0x479   :  { %2452 = vmatmul.msk.f32.vlgmr.msrb.gmra.mxu3 %vm227_vm7, %v293_v43 }
 0x49b   :  { %v431_v45 = vpop.permute.xlu2 %430 }
 0x4b3   :  { %v433_v44 = vpop.permute.xlu0 %432 }
 0x4b4   :  { %2457 = vmatpush.xpose.msk.msrb.mxu1 %vm227_vm7, %v433_v44 }
 0x4b7   :  { %2458 = vmatmul.msk.f32.vlgmr.msrb.gmra.mxu1 %vm227_vm7, %v431_v45 }
 0x4bb   :  { %v366_v46 = vpop.permute.xlu0 %365 }
 0x4bc   :  { %2454 = vmatpush.xpose.msk.msra.mxu3 %vm227_vm7, %v366_v46 }
 0x4bf   :  { %2455 = vmatmul.msk.f32.vlgmr.msra.gmra.mxu3 %vm227_vm7, %v222_v39 }
 0x4f4   :  { %v3079_v47 = vpop.f32.mrf.mxu3 }
 0x4fc   :  { %v317_v48 = vpop.f32.mrf.mxu3 }
 0x4fd   :  { %v320_v49 = vmul.f32 0.25, %v317_v48 }
 0x4ff   :  { %v321_v50 = vadd.f32 %v320_v49, %v3059_v11 }
 0x501   :  { %v322_v51 = vsel %vm254_vm9, %v321_v50, -inf }
 0x502   :  { %323 = vmax.xlane.f32.xlu2 %v322_v51 }
 0x534   :  { %v455_v52 = vpop.f32.mrf.mxu1 }
 0x535   :  { %v458_v53 = vmul.f32 0.25, %v455_v52 }
 0x537   :  { %v459_v54 = vadd.f32 %v458_v53, %v3059_v11 }
 0x539   :  { %v460_v55 = vsel %vm254_vm9, %v459_v54, -inf }
 0x53a   :  { %461 = vmax.xlane.f32.xlu0 %v460_v55 }
 0x542   :  { %v388_v56 = vpop.f32.mrf.mxu3 }
 0x543   :  { %v391_v57 = vmul.f32 0.25, %v388_v56 }
 0x545   :  { %v392_v58 = vadd.f32 %v391_v57, %v3059_v11  ;;  %v600_v57 = vld [vmem:[%s4161_s11 + $0x18] sm:$0xff] }
 0x547   :  { %v393_v59 = vsel %vm254_vm9, %v392_v58, -inf }
 0x548   :  { %394 = vmax.xlane.f32.xlu1 %v393_v59  ;;  %v797_v59 = vld [vmem:[%s4163_s13 + $0x70] sm:$0xff] }
 0x549   :  { %867 = vmatpush.msrb.mxu0 %v797_v59 }
 0x561   :  { %471 = vrot.lane.b32.xlu1 %v222_v39, %s4176_s30 }
 0x575   :  { %v324_v60 = vpop.xlane.xlu2 %323 }
 0x576   :  { %v325_v62 = vsub.f32 %v321_v50, %v324_v60  ;;  %v798_v60 = vld [vmem:[%s4163_s13 + $0x78] sm:$0xff] }
 0x577   :  { %890 = vmatpush.msra.mxu1 %v798_v60 }
 0x578   :  { %v326_v0 = vmul.f32 1.442695, %v325_v62  ;;  %v599_v62 = vld [vmem:[%s4161_s11 + $0x10] sm:$0xff] }
 0x57a   :  { %2682 = vpow2.f32 %v326_v0  ;;  %v792_v0 = vld [vmem:[%s4163_s13 + $0x48] sm:$0xff] }
 0x580   :  { %v2683_v1 = vpop.eup %2682 }
 0x581   :  { %v328_v2 = vsel %vm254_vm9, %v2683_v1, 0.0 }
 0x582   :  { %329 = vadd.xlane.f32.xlu2 %v328_v2  ;;  %v794_v2 = vld [vmem:[%s4163_s13 + $0x58] sm:$0xff] }
 0x583   :  { %891 = vmatpush.msra.mxu1 %v794_v2 }
 0x59a   :  { %333 = vrot.lane.b32.xlu2 %v3039_v61, %s4176_s30 }
 0x5ad   :  { %v462_v4 = vpop.xlane.xlu0 %461 }
 0x5ae   :  { %v463_v5 = vsub.f32 %v459_v54, %v462_v4  ;;  %v598_v4 = vld [vmem:[%s4161_s11 + $0x8] sm:$0xff] }
 0x5b0   :  { %v464_v6 = vmul.f32 1.442695, %v463_v5  ;;  %v788_v5 = vld [vmem:[%s4163_s13 + $0x28] sm:$0xff] }
 0x5b2   :  { %2684 = vpow2.f32 %v464_v6  ;;  %v789_v6 = vld [vmem:[%s4163_s13 + $0x30] sm:$0xff] }
 0x5b8   :  { %v2685_v7 = vpop.eup %2684 }
 0x5b9   :  { %v466_v8 = vsel %vm254_vm9, %v2685_v7, 0.0 }
 0x5ba   :  { %467 = vadd.xlane.f32.xlu0 %v466_v8  ;;  %v597_v8 = vld [vmem:[%s4161_s11] sm:$0xff] }
 0x5bb   :  { %v395_v9 = vpop.xlane.xlu1 %394 }
 0x5bc   :  { %v396_v10 = vsub.f32 %v392_v58, %v395_v9  ;;  %v796_v58 = vld [vmem:[%s4163_s13 + $0x68] sm:$0xff] }
 0x5bd   :  { %v784_v9 = vld [vmem:[%s4163_s13 + $0x8] sm:$0xff] }
 0x5be   :  { %v397_v12 = vmul.f32 1.442695, %v396_v10  ;;  %v785_v10 = vld [vmem:[%s4163_s13 + $0x10] sm:$0xff] }
 0x5c0   :  { %2686 = vpow2.f32 %v397_v12  ;;  %v786_v12 = vld [vmem:[%s4163_s13 + $0x18] sm:$0xff] }
 0x5c6   :  { %v2687_v13 = vpop.eup %2686 }
 0x5c7   :  { %v399_v14 = vsel %vm254_vm9, %v2687_v13, 0.0 }
 0x5c8   :  { %400 = vadd.xlane.f32.xlu0 %v399_v14 }
 0x5d3   :  { %v472_v15 = vpop.permute.xlu1 %471 }
 0x5d4   :  { %492 = vmatpush.msrb.mxu3 %v472_v15 }
 0x5d6   :  { %623 = vmatpush.msra.mxu3 %v600_v57 }
 0x5d8   :  { %624 = vmatpush.msra.mxu3 %v599_v62 }
 0x5da   :  { %625 = vmatpush.msra.mxu3 %v598_v4 }
 0x5dc   :  { %404 = vrot.lane.b32.xlu0 %v222_v39, %s4178_s0  ;;  %626 = vmatpush.msra.mxu3 %v597_v8  ;;  %s4189_s0 = sld [smem:[#allocation9_spill]] }
 0x5f5   :  { %v330_v61 = vpop.xlane.xlu2 %329 }
 0x5f6   :  { %2688 = vrcp.f32 %v330_v61 }
 0x5fc   :  { %v2689_v16 = vpop.eup %2688 }
 0x5fd   :  { %v334_v17 = vpop.permute.xlu2 %333  ;;  %v332_v18 = vmul.f32 %v2689_v16, %v2683_v1  ;;  %v793_v1 = vld [vmem:[%s4163_s13 + $0x50] sm:$0xff] }
 0x5fe   :  { %354 = vmatpush.msrb.mxu2 %v334_v17  ;;  %868 = vmatpush.msrb.mxu0 %v793_v1 }
 0x5ff   :  { %2453 = vmatmul.msk.f32.vlgmr.msrb.gmra.mxu2 %vm254_vm9, %v332_v18 }
 0x600   :  { %869 = vmatpush.msrb.mxu0 %v789_v6 }
 0x602   :  { %870 = vmatpush.msrb.mxu0 %v785_v10 }
 0x62d   :  { %v468_v20 = vpop.xlane.xlu0 %467 }
 0x62e   :  { %2690 = vrcp.f32 %v468_v20 }
 0x634   :  { %v2691_v21 = vpop.eup %2690 }
 0x635   :  { %v470_v22 = vmul.f32 %v2691_v21, %v2685_v7  ;;  %v790_v7 = vld [vmem:[%s4163_s13 + $0x38] sm:$0xff] }
 0x636   :  { %892 = vmatpush.msra.mxu1 %v790_v7 }
 0x637   :  { %2459 = vmatmul.msk.f32.vlgmr.msrb.gmra.mxu3 %vm254_vm9, %v470_v22  ;;  %v2660_v22 = vld [vmem:[%s4159_s9] ss:$0 sm:$0xff] }
 0x638   :  { %893 = vmatpush.msra.mxu1 %v786_v12 }
 0x63b   :  { %v401_v23 = vpop.xlane.xlu0 %400 }
 0x63c   :  { %2692 = vrcp.f32 %v401_v23 }
 0x642   :  { %v2693_v25 = vpop.eup %2692 }
 0x643   :  { %v403_v26 = vmul.f32 %v2693_v25, %v2687_v13 }
 0x64e   :  { %v405_v27 = vpop.permute.xlu0 %404 }
 0x64f   :  { %425 = vmatpush.msra.mxu2 %v405_v27 }
 0x650   :  { %2456 = vmatmul.msk.f32.vlgmr.msra.gmra.mxu2 %vm254_vm9, %v403_v26  ;;  %v2661_v26 = vld [vmem:[%s4160_s10] ss:$0 sm:$0xff] }
 0x651   :  { %528 = vmatpush.msrb.mxu2 %v505_v29  ;;  %v795_v29 = vld [vmem:[%s4163_s13 + $0x60] sm:$0xff] }
 0x652   :  { %821 = vmatpush.msrb.mxu3 %v795_v29 }
 0x653   :  { %529 = vmatpush.msrb.mxu2 %v504_v30  ;;  %v791_v30 = vld [vmem:[%s4163_s13 + $0x40] sm:$0xff] }
 0x654   :  { %822 = vmatpush.msrb.mxu3 %v791_v30 }
 0x655   :  { %530 = vmatpush.msrb.mxu2 %v503_v31 }
 0x657   :  { %531 = vmatpush.msrb.mxu2 %v502_v34 }
 0x659   :  { %844 = vmatpush.msra.mxu2 %v796_v58 }
 0x65b   :  { %845 = vmatpush.msra.mxu2 %v792_v0 }
 0x65d   :  { %846 = vmatpush.msra.mxu2 %v788_v5 }
 0x65f   :  { %847 = vmatpush.msra.mxu2 %v784_v9 }
 0x682   :  { %v356_v28 = vpop.f32.mrf.mxu2 }
 0x683   :  { %360 = vrot.lane.b32.xlu2 %v356_v28, %s4174_s21 }
 0x6ba   :  { %v494_v33 = vpop.f32.mrf.mxu3 }
 0x6bb   :  { %498 = vrot.lane.b32.xlu1 %v494_v33, %s4174_s21  ;;  %v787_v33 = vld [vmem:[%s4163_s13 + $0x20] sm:$0xff]  ;;  %s4190_s21 = smov 64  }
 0x6bc   :  { %823 = vmatpush.msrb.mxu3 %v787_v33 }
 0x6d3   :  { %v427_v37 = vpop.f32.mrf.mxu2 }
 0x6dd   :  { %v361_v35 = vpop.permute.xlu2 %360 }
 0x6de   :  { %v363_v36 = vsel %vm227_vm7, %v3079_v47, %v361_v35  ;;  %v783_v35 = vld [vmem:[%s4163_s13] sm:$0xff] }
 0x6df   :  { %2460 = vmatmul.msk.f32.vlgmr.msrb.gmra.mxu2 %vm125_vm1, %v363_v36  ;;  %824 = vmatpush.msrb.mxu3 %v783_v35 }
 0x72d   :  { %v499_v38 = vpop.permute.xlu1 %498 }
 0x72e   :  { %v501_v39 = vsel %vm227_vm7, %v427_v37, %v499_v38 }
 0x72f   :  { %2461 = vmatmul.msk.f32.gmra.mxu2 %vm125_vm1, %v501_v39 }
 0x762   :  { %v533_v41 = vpop.f32.mrf.mxu2 }
 0x763   :  { %v534_v42 = vadd.f32 %v2659_v40, %v533_v41 }
 0x765   :  { %v3120_v43 = vadd.f32 %v534_v42, %v3000_v24 }
 0x767   :  { %v543_v44 = vsel %vm125_vm1, %v3120_v43, 0.0 }
 0x768   :  { %544 = vadd.xlane.f32.xlu2 %v543_v44 }
 0x7b2   :  { %v536_v45 = vpop.f32.mrf.mxu2 }
 0x7b3   :  { %v537_v46 = vadd.f32 %v2659_v40, %v536_v45 }
 0x7b5   :  { %v3125_v47 = vadd.f32 %v537_v46, %v3045_v63 }
 0x7b7   :  { %v546_v48 = vsel %vm125_vm1, %v3125_v47, 0.0 }
 0x7b8   :  { %547 = vadd.xlane.f32.xlu0 %v546_v48 }
 0x7db   :  { %v545_v49 = vpop.xlane.xlu2 %544 }
 0x7dc   :  { %v549_v50 = vmul.f32 %v545_v49, %v3004_v32  ;;  %v2662_v49 = vld [vmem:[%s4162_s12] ss:$0 sm:$0xff] }
 0x7de   :  { %v551_v51 = vsub.f32 %v3120_v43, %v549_v50 }
 0x7e0   :  { %v553_v24 = vmul.f32 %v551_v51, %v551_v51 }
 0x7e2   :  { %v555_v52 = vsel %vm125_vm1, %v553_v24, 0.0 }
 0x7e3   :  { %556 = vadd.xlane.f32.xlu1 %v555_v52 }
 0x82b   :  { %v548_v53 = vpop.xlane.xlu0 %547 }
 0x82c   :  { %v550_v54 = vmul.f32 %v548_v53, %v3004_v32 }
 0x82e   :  { %v3134_v55 = vsub.f32 %v3125_v47, %v550_v54 }
 0x830   :  { %v554_v63 = vmul.f32 %v3134_v55, %v3134_v55 }
 0x832   :  { %v558_v56 = vsel %vm125_vm1, %v554_v63, 0.0 }
 0x833   :  { %559 = vadd.xlane.f32.xlu2 %v558_v56 }
 0x856   :  { %v557_v13 = vpop.xlane.xlu1 %556 }
 0x857   :  { %v561_v14 = vmul.f32 %v557_v13, %v3004_v32 }
 0x859   :  { %v563_v15 = vadd.f32 1e-05, %v561_v14 }
 0x85b   :  { %2694 = vrsqrt.f32 %v563_v15  ;;  %vm571_vm14 = vweird.f32 %v563_v15 }
 0x861   :  { %v2695_v61 = vpop.eup %2694 }
 0x862   :  { %v566_v16 = vmul.f32 %v2695_v61, %v563_v15  ;;  %vm572_vm13 = vweird.f32 %v2695_v61 }
 0x863   :  { %vm573_vm15 = vmor %vm571_vm14, %vm572_vm13 }
 0x864   :  { %v567_v17 = vmul.f32 %v2695_v61, %v566_v16 }
 0x866   :  { %v568_v18 = vmul.f32 0.5, %v567_v17 }
 0x868   :  { %v569_v20 = vsub.f32 1.5, %v568_v18 }
 0x86a   :  { %v570_v21 = vmul.f32 %v2695_v61, %v569_v20 }
 0x86c   :  { %v574_v23 = vsel %vm573_vm15, %v2695_v61, %v570_v21 }
 0x86d   :  { %v585_v25 = vmul.f32 %v574_v23, %v551_v51 }
 0x86f   :  { %v590_v27 = vmul.f32 %v2660_v22, %v585_v25 }
 0x871   :  { %v595_v28 = vadd.f32 %v2661_v26, %v590_v27 }
 0x873   :  { %2462 = vmatmul.msk.f32.vlgmr.msra.gmra.mxu3 %vm125_vm1, %v595_v28  ;;  %2466 = vmatmul.msk.f32.vlgmr.msra.gmra.mxu2 %vm125_vm1, %v595_v28 }
 0x874   :  { %2468 = vmatmul.msk.f32.vlgmr.msrb.gmra.mxu0 %vm125_vm1, %v595_v28  ;;  %2470 = vmatmul.msk.f32.vlgmr.msra.gmra.mxu1 %vm125_vm1, %v595_v28 }
 0x8a6   :  { %v560_v31 = vpop.xlane.xlu2 %559 }
 0x8a7   :  { %v562_v34 = vmul.f32 %v560_v31, %v3004_v32 }
 0x8a9   :  { %v564_v36 = vadd.f32 1e-05, %v562_v34 }
 0x8ab   :  { %2696 = vrsqrt.f32 %v564_v36  ;;  %vm581_vm2 = vweird.f32 %v564_v36 }
 0x8b1   :  { %v2697_v37 = vpop.eup %2696 }
 0x8b2   :  { %v576_v38 = vmul.f32 %v2697_v37, %v564_v36  ;;  %vm582_vm0 = vweird.f32 %v2697_v37 }
 0x8b3   :  { %vm583_vm3 = vmor %vm581_vm2, %vm582_vm0 }
 0x8b4   :  { %v577_v39 = vmul.f32 %v2697_v37, %v576_v38 }
 0x8b6   :  { %v578_v40 = vmul.f32 0.5, %v577_v39 }
 0x8b8   :  { %v579_v41 = vsub.f32 1.5, %v578_v40 }
 0x8ba   :  { %v580_v42 = vmul.f32 %v2697_v37, %v579_v41 }
 0x8bc   :  { %v584_v44 = vsel %vm583_vm3, %v2697_v37, %v580_v42 }
 0x8bd   :  { %v586_v45 = vmul.f32 %v584_v44, %v3134_v55 }
 0x8bf   :  { %v591_v46 = vmul.f32 %v2660_v22, %v586_v45 }
 0x8c1   :  { %v596_v48 = vadd.f32 %v2661_v26, %v591_v46 }
 0x8c3   :  { %2463 = vmatmul.msk.f32.gmra.mxu3 %vm125_vm1, %v596_v48  ;;  %2467 = vmatmul.msk.f32.gmra.mxu2 %vm125_vm1, %v596_v48 }
 0x8c4   :  { %2469 = vmatmul.msk.f32.gmra.mxu0 %vm125_vm1, %v596_v48  ;;  %2471 = vmatmul.msk.f32.gmra.mxu1 %vm125_vm1, %v596_v48 }
 0x8cb   :  { %2464 = vmatmul.msk.f32.vlgmr.msrb.gmra.mxu3 %vm125_vm1, %v595_v28 }
 0x8d3   :  { %2465 = vmatmul.msk.f32.gmra.mxu3 %vm125_vm1, %v596_v48 }
 0x8f6   :  { %v628_v50 = vpop.f32.mrf.mxu3 }
 0x8f7   :  { %v629_v51 = vadd.f32 %v2662_v49, %v628_v50 }
 0x8f9   :  { %v635_v24 = vsel %vm634_vm4, %v629_v51, -inf }
 0x8fa   :  { %636 = vmax.xlane.f32.xlu0 %v635_v24 }
 0x946   :  { %v631_v52 = vpop.f32.mrf.mxu3 }
 0x947   :  { %v632_v53 = vadd.f32 %v2662_v49, %v631_v52 }
 0x949   :  { %v638_v54 = vsel %vm634_vm4, %v632_v53, -inf }
 0x94a   :  { %639 = vmax.xlane.f32.xlu1 %v638_v54 }
 0x96d   :  { %v637_v55 = vpop.xlane.xlu0 %636 }
 0x96e   :  { %v641_v63 = vsub.f32 %v629_v51, %v637_v55 }
 0x970   :  { %v643_v56 = vmul.f32 1.442695, %v641_v63 }
 0x972   :  { %2698 = vpow2.f32 %v643_v56 }
 0x978   :  { %v2699_v57 = vpop.eup %2698 }
 0x979   :  { %v647_v58 = vsel %vm634_vm4, %v2699_v57, 0.0 }
 0x97a   :  { %648 = vadd.xlane.f32.xlu2 %v647_v58 }
 0x9bd   :  { %v640_v59 = vpop.xlane.xlu1 %639 }
 0x9be   :  { %v642_v60 = vsub.f32 %v632_v53, %v640_v59 }
 0x9c0   :  { %v645_v62 = vmul.f32 1.442695, %v642_v60 }
 0x9c2   :  { %2700 = vpow2.f32 %v645_v62 }
 0x9c8   :  { %v2701_v0 = vpop.eup %2700 }
 0x9c9   :  { %v650_v1 = vsel %vm634_vm4, %v2701_v0, 0.0 }
 0x9ca   :  { %651 = vadd.xlane.f32.xlu0 %v650_v1 }
 0x9ed   :  { %v649_v2 = vpop.xlane.xlu2 %648 }
 0x9ee   :  { %2702 = vrcp.f32 %v649_v2 }
 0x9f4   :  { %v2703_v4 = vpop.eup %2702 }
 0x9f5   :  { %v3225_v5 = vmul.f32 %v2703_v4, %v2699_v57 }
 0x9f7   :  { %v657_v6 = vsel %vm634_vm4, %v3225_v5, -inf }
 0x9f8   :  { %658 = vmax.xlane.f32.xlu1 %v657_v6 }
 0xa3d   :  { %v652_v7 = vpop.xlane.xlu0 %651 }
 0xa3e   :  { %2704 = vrcp.f32 %v652_v7 }
 0xa44   :  { %v2705_v8 = vpop.eup %2704 }
 0xa45   :  { %v3229_v9 = vmul.f32 %v2705_v8, %v2701_v0 }
 0xa47   :  { %v660_v10 = vsel %vm634_vm4, %v3229_v9, -inf }
 0xa48   :  { %661 = vmax.xlane.f32.xlu2 %v660_v10 }
 0xa6b   :  { %v659_v12 = vpop.xlane.xlu1 %658 }
 0xa6c   :  { %vm663_vm5 = vcmp.eq.f32.partialorder %v3225_v5, %v659_v12 }
 0xa6d   :  { %v665_v13 = vsel %vm663_vm5, %v2994_v19, 4 }
 0xa6e   :  { %v667_v14 = vsel %vm634_vm4, %v665_v13, 2147483647 }
 0xa6f   :  { %v669_v15 = vshra.s32 %v667_v14, 16  ;;  %v668_v22 = vand.u32 65535, %v667_v14 }
 0xa71   :  { %v671_v61 = vcvt.s32.f32 %v669_v15  ;;  %v670_v25 = vcvt.s32.f32 %v668_v22 }
 0xa73   :  { %672 = vmin.xlane.f32.xlu0 %v671_v61 }
 0xabb   :  { %v662_v16 = vpop.xlane.xlu2 %661 }
 0xabc   :  { %vm664_vm6 = vcmp.eq.f32.partialorder %v3229_v9, %v662_v16 }
 0xabd   :  { %v666_v17 = vsel %vm664_vm6, %v2994_v19, 4 }
 0xabe   :  { %v682_v18 = vsel %vm634_vm4, %v666_v17, 2147483647 }
 0xabf   :  { %v684_v20 = vshra.s32 %v682_v18, 16  ;;  %v683_v27 = vand.u32 65535, %v682_v18 }
 0xac1   :  { %v686_v21 = vcvt.s32.f32 %v684_v20  ;;  %v685_v29 = vcvt.s32.f32 %v683_v27  ;;  %v2834_v20 = vmov 1  }
 0xac2   :  { %2641 = vset.pattern.permute.xlu0 %v2834_v20  ;;  %2643 = vset.pattern.permute.xlu2 %v2834_v20 }
 0xac3   :  { %687 = vmin.xlane.f32.xlu1 %v686_v21 }
 0xae6   :  { %v673_v23 = vpop.xlane.xlu0 %672 }
 0xae7   :  { %vm674_vm8 = vcmp.eq.f32.partialorder %v671_v61, %v673_v23  ;;  %v679_v31 = vcvt.f32.s32 %v673_v23 }
 0xae8   :  { %v675_v26 = vsel %vm674_vm8, %v670_v25, inf  ;;  %vm1084_vm8 = vcmask 1043456  }
 0xae9   :  { %676 = vmin.xlane.f32.xlu2 %v675_v26  ;;  %v680_v34 = vshll.u32 %v679_v31, 16 }
 0xb36   :  { %v688_v28 = vpop.xlane.xlu1 %687 }
 0xb37   :  { %vm689_vm10 = vcmp.eq.f32.partialorder %v686_v21, %v688_v28  ;;  %v694_v39 = vcvt.f32.s32 %v688_v28 }
 0xb38   :  { %v690_v30 = vsel %vm689_vm10, %v685_v29, inf }
 0xb39   :  { %691 = vmin.xlane.f32.xlu0 %v690_v30  ;;  %v695_v41 = vshll.u32 %v694_v39, 16  ;;  %v1045_v39 = vld [vmem:[%s4165_s15 + $0xf0] sm:$0xff] }
 0xb5c   :  { %v677_v33 = vpop.xlane.xlu2 %676 }
 0xb5d   :  { %v678_v35 = vcvt.f32.s32 %v677_v33 }
 0xb5f   :  { %v681_v36 = vadd.s32 %v680_v34, %v678_v35  ;;  %v2835_v34 = vmov 3   ;;  %v2836_v35 = vmov 2  }
 0xb61   :  { %vm697_vm11 = vcmp.eq.s32.totalorder %v2994_v19, %v681_v36  ;;  %v1030_v36 = vld [vmem:[%s4165_s15 + $0x78] sm:$0xff] }
 0xb62   :  { %v699_v37 = vsel %vm697_vm11, -1.0, %v3225_v5  ;;  %1111 = vmatpush.msrb.mxu2 %v1030_v36 }
 0xb63   :  { %v701_v38 = vsel %vm634_vm4, %v699_v37, -inf }
 0xb64   :  { %702 = vmax.xlane.f32.xlu1 %v701_v38  ;;  %v1029_v38 = vld [vmem:[%s4165_s15 + $0x70] sm:$0xff] }
 0xb65   :  { %1112 = vmatpush.msrb.mxu2 %v1029_v38  ;;  %v1017_v38 = vld [vmem:[%s4165_s15 + $0x10] sm:$0xff] }
 0xbac   :  { %v692_v40 = vpop.xlane.xlu0 %691 }
 0xbad   :  { %v693_v42 = vcvt.f32.s32 %v692_v40  ;;  %v1028_v40 = vld [vmem:[%s4165_s15 + $0x68] sm:$0xff] }
 0xbae   :  { %1113 = vmatpush.msrb.mxu2 %v1028_v40 }
 0xbaf   :  { %v696_v44 = vadd.s32 %v695_v41, %v693_v42  ;;  %v1044_v41 = vld [vmem:[%s4165_s15 + $0xe8] sm:$0xff]  ;;  %v1027_v42 = vld [vmem:[%s4165_s15 + $0x60] sm:$0xff] }
 0xbb0   :  { %1114 = vmatpush.msrb.mxu2 %v1027_v42  ;;  %v1016_v42 = vld [vmem:[%s4165_s15 + $0x8] sm:$0xff] }
 0xbb1   :  { %vm698_vm12 = vcmp.eq.s32.totalorder %v2994_v19, %v696_v44  ;;  %v1043_v44 = vld [vmem:[%s4165_s15 + $0xe0] sm:$0xff] }
 0xbb2   :  { %v700_v45 = vsel %vm698_vm12, -1.0, %v3229_v9 }
 0xbb3   :  { %v704_v46 = vsel %vm634_vm4, %v700_v45, -inf }
 0xbb4   :  { %705 = vmax.xlane.f32.xlu2 %v704_v46  ;;  %v1026_v46 = vld [vmem:[%s4165_s15 + $0x58] sm:$0xff] }
 0xbb5   :  { %1115 = vmatpush.msrb.mxu2 %v1026_v46 }
 0xbd7   :  { %v703_v48 = vpop.xlane.xlu1 %702 }
 0xbd8   :  { %vm707_vm13 = vcmp.eq.f32.partialorder %v699_v37, %v703_v48  ;;  %v1046_v37 = vld [vmem:[%s4165_s15 + $0xf8] sm:$0xff] }
 0xbd9   :  { %v709_v49 = vsel %vm707_vm13, %v2994_v19, 4  ;;  %1134 = vmatpush.msrb.mxu1 %v1046_v37  ;;  %v1042_v48 = vld [vmem:[%s4165_s15 + $0xd8] sm:$0xff] }
 0xbda   :  { %v711_v50 = vsel %vm634_vm4, %v709_v49, 2147483647  ;;  %v1078_v49 = vld [vmem:[%s4165_s15 + $0x1f8] sm:$0xff] }
 0xbdb   :  { %v713_v51 = vshra.s32 %v711_v50, 16  ;;  %v712_v56 = vand.u32 65535, %v711_v50  ;;  %1135 = vmatpush.msrb.mxu1 %v1045_v39  ;;  %v1077_v50 = vld [vmem:[%s4165_s15 + $0x1f0] sm:$0xff]  ;;  %v1070_v37 = vld [vmem:[%s4165_s15 + $0x1b8] sm:$0xff] }
 0xbdd   :  { %v715_v24 = vcvt.s32.f32 %v713_v51  ;;  %v714_v58 = vcvt.s32.f32 %v712_v56  ;;  %1136 = vmatpush.msrb.mxu1 %v1044_v41  ;;  %v1025_v51 = vld [vmem:[%s4165_s15 + $0x50] sm:$0xff]  ;;  %v1039_v56 = vld [vmem:[%s4165_s15 + $0xc0] sm:$0xff] }
 0xbde   :  { %1116 = vmatpush.msrb.mxu2 %v1025_v51  ;;  %v1069_v41 = vld [vmem:[%s4165_s15 + $0x1b0] sm:$0xff]  ;;  %v1031_v51 = vld [vmem:[%s4165_s15 + $0x80] sm:$0xff] }
 0xbdf   :  { %716 = vmin.xlane.f32.xlu0 %v715_v24  ;;  %1137 = vmatpush.msrb.mxu1 %v1043_v44  ;;  %v895_v44 = vpop.f32.mrf.mxu1 }
 0xbe1   :  { %1138 = vmatpush.msrb.mxu1 %v1042_v48  ;;  %v1068_v48 = vld [vmem:[%s4165_s15 + $0x1a8] sm:$0xff] }
 0xc27   :  { %v706_v52 = vpop.xlane.xlu2 %705 }
 0xc28   :  { %vm708_vm14 = vcmp.eq.f32.partialorder %v700_v45, %v706_v52  ;;  %v1024_v52 = vld [vmem:[%s4165_s15 + $0x48] sm:$0xff] }
 0xc29   :  { %v710_v53 = vsel %vm708_vm14, %v2994_v19, 4  ;;  %1117 = vmatpush.msrb.mxu2 %v1024_v52  ;;  %v1067_v52 = vld [vmem:[%s4165_s15 + $0x1a0] sm:$0xff] }
 0xc2a   :  { %v726_v54 = vsel %vm634_vm4, %v710_v53, 2147483647  ;;  %v1040_v53 = vld [vmem:[%s4165_s15 + $0xc8] sm:$0xff] }
 0xc2b   :  { %v728_v55 = vshra.s32 %v726_v54, 16  ;;  %v727_v60 = vand.u32 65535, %v726_v54 }
 0xc2d   :  { %v730_v63 = vcvt.s32.f32 %v728_v55  ;;  %v729_v0 = vcvt.s32.f32 %v727_v60  ;;  %v1076_v55 = vld [vmem:[%s4165_s15 + $0x1e8] sm:$0xff]  ;;  %v1038_v60 = vld [vmem:[%s4165_s15 + $0xb8] sm:$0xff] }
 0xc2f   :  { %731 = vmin.xlane.f32.xlu1 %v730_v63 }
 0xc52   :  { %v717_v57 = vpop.xlane.xlu0 %716 }
 0xc53   :  { %vm718_vm15 = vcmp.eq.f32.partialorder %v715_v24, %v717_v57  ;;  %v723_v2 = vcvt.f32.s32 %v717_v57  ;;  %v1041_v24 = vld [vmem:[%s4165_s15 + $0xd0] sm:$0xff] }
 0xc54   :  { %v719_v59 = vsel %vm718_vm15, %v714_v58, inf  ;;  %1139 = vmatpush.msrb.mxu1 %v1041_v24  ;;  %v1075_v58 = vld [vmem:[%s4165_s15 + $0x1e0] sm:$0xff] }
 0xc55   :  { %720 = vmin.xlane.f32.xlu2 %v719_v59  ;;  %v724_v6 = vshll.u32 %v723_v2, 16  ;;  %v1022_v59 = vld [vmem:[%s4165_s15 + $0x38] sm:$0xff]  ;;  %v1021_v2 = vld [vmem:[%s4165_s15 + $0x30] sm:$0xff] }
 0xc56   :  { %1140 = vmatpush.msrb.mxu1 %v1040_v53 }
 0xc58   :  { %1141 = vmatpush.msrb.mxu1 %v1039_v56  ;;  %v1065_v56 = vld [vmem:[%s4165_s15 + $0x190] sm:$0xff] }
 0xc5a   :  { %1142 = vmatpush.msrb.mxu1 %v1038_v60 }
 0xca2   :  { %v732_v62 = vpop.xlane.xlu1 %731 }
 0xca3   :  { %vm733_vm0 = vcmp.eq.f32.partialorder %v730_v63, %v732_v62  ;;  %v738_v13 = vcvt.f32.s32 %v732_v62  ;;  %v1023_v63 = vld [vmem:[%s4165_s15 + $0x40] sm:$0xff]  ;;  %v1074_v62 = vld [vmem:[%s4165_s15 + $0x1d8] sm:$0xff] }
 0xca4   :  { %v734_v1 = vsel %vm733_vm0, %v729_v0, inf  ;;  %1118 = vmatpush.msrb.mxu2 %v1023_v63  ;;  %v3358_v0 = vld [vmem:[%s4189_s0] sm:$0xf] }
 0xca5   :  { %735 = vmin.xlane.f32.xlu0 %v734_v1  ;;  %v739_v15 = vshll.u32 %v738_v13, 16  ;;  %v804_v40 = vperm.slane %v3358_v0, 3 }
 0xca6   :  { %1119 = vmatpush.msrb.mxu2 %v1022_v59 }
 0xca7   :  { %v3443_v24 = vadd.f32 %v895_v44, %v804_v40 }
 0xca8   :  { %1120 = vmatpush.msrb.mxu2 %v1021_v2 }
 0xca9   :  { %v912_v63 = vmul.f32 0.044715, %v3443_v24 }
 0xcab   :  { %v920_v60 = vmul.f32 %v912_v63, %v3443_v24  ;;  %v1048_v63 = vld [vmem:[%s4165_s15 + $0x108] sm:$0xff] }
 0xcc8   :  { %v721_v4 = vpop.xlane.xlu2 %720 }
 0xcc9   :  { %v722_v7 = vcvt.f32.s32 %v721_v4  ;;  %v1037_v4 = vld [vmem:[%s4165_s15 + $0xb0] sm:$0xff] }
 0xcca   :  { %1143 = vmatpush.msrb.mxu1 %v1037_v4  ;;  %v1062_v4 = vld [vmem:[%s4165_s15 + $0x178] sm:$0xff] }
 0xccb   :  { %v725_v8 = vadd.s32 %v724_v6, %v722_v7  ;;  %v802_v6 = vperm.slane %v3358_v0, 1 }
 0xccd   :  { %vm741_vm2 = vcmp.eq.s32.totalorder %v2994_v19, %v725_v8  ;;  %v1073_v8 = vld [vmem:[%s4165_s15 + $0x1d0] sm:$0xff] }
 0xcce   :  { %vm743_vm3 = vmor %vm697_vm11, %vm741_vm2 }
 0xccf   :  { %v745_v10 = vsel %vm743_vm3, %v3225_v5, 0.0  ;;  %v1079_v5 = vld [vmem:[%s4166_s16] sm:$0xf] }
 0xcd0   :  { %v747_v12 = vsel %vm634_vm4, %v745_v10, 0.0  ;;  %2472 = vmatpush.msk.msra.mxu3 %vm1084_vm8, %v1079_v5 }
 0xcd1   :  { %748 = vadd.xlane.f32.xlu1 %v747_v12  ;;  %v801_v12 = vperm.slane %v3358_v0, 0 }
 0xcd2   :  { %1180 = vmatpush.msrb.mxu3 %v1078_v49  ;;  %v1015_v49 = vld [vmem:[%s4165_s15] sm:$0xff] }
 0xcd4   :  { %1181 = vmatpush.msrb.mxu3 %v1077_v50 }
 0xcd6   :  { %1182 = vmatpush.msrb.mxu3 %v1076_v55 }
 0xcd8   :  { %1183 = vmatpush.msrb.mxu3 %v1075_v58  ;;  %v1064_v58 = vld [vmem:[%s4165_s15 + $0x188] sm:$0xff] }
 0xcda   :  { %1184 = vmatpush.msrb.mxu3 %v1074_v62  ;;  %v1063_v62 = vld [vmem:[%s4165_s15 + $0x180] sm:$0xff] }
 0xcdc   :  { %1185 = vmatpush.msrb.mxu3 %v1073_v8 }
 0xd18   :  { %v736_v14 = vpop.xlane.xlu0 %735 }
 0xd19   :  { %v737_v61 = vcvt.f32.s32 %v736_v14 }
 0xd1b   :  { %v740_v16 = vadd.s32 %v739_v15, %v737_v61  ;;  %v1020_v15 = vld [vmem:[%s4165_s15 + $0x28] sm:$0xff] }
 0xd1c   :  { %v1036_v61 = vld [vmem:[%s4165_s15 + $0xa8] sm:$0xff]  ;;  %1121 = vmatpush.msrb.mxu2 %v1020_v15 }
 0xd1d   :  { %vm742_vm5 = vcmp.eq.s32.totalorder %v2994_v19, %v740_v16  ;;  %v826_v16 = vpop.f32.mrf.mxu3  ;;  %1144 = vmatpush.msrb.mxu1 %v1036_v61 }
 0xd1e   :  { %vm744_vm6 = vmor %vm698_vm12, %vm742_vm5 }
 0xd1f   :  { %v3262_v17 = vsel %vm744_vm6, %v3229_v9, 0.0 }
 0xd20   :  { %v750_v18 = vsel %vm634_vm4, %v3262_v17, 0.0 }
 0xd21   :  { %751 = vadd.xlane.f32.xlu2 %v750_v18  ;;  %v1072_v18 = vld [vmem:[%s4165_s15 + $0x1c8] sm:$0xff] }
 0xd22   :  { %1186 = vmatpush.msrb.mxu3 %v1072_v18  ;;  %v1057_v18 = vld [vmem:[%s4165_s15 + $0x150] sm:$0xff] }
 0xd44   :  { %v749_v21 = vpop.xlane.xlu1 %748 }
 0xd45   :  { %2706 = vrcp.f32 %v749_v21  ;;  %v764_v25 = vand.u32 2147483648, %v749_v21  ;;  %v762_v27 = vand.u32 2147483647, %v749_v21  ;;  %vm758_vm11 = vweird.f32 %v749_v21 }
 0xd47   :  { %v765_v29 = vor.u32 1.1754944e-38, %v764_v25  ;;  %vm763_vm13 = vcmp.eq.f32.partialorder %v762_v27, 8.507059e+37  ;;  %v1071_v25 = vld [vmem:[%s4165_s15 + $0x1c0] sm:$0xff] }
 0xd48   :  { %1187 = vmatpush.msrb.mxu3 %v1071_v25 }
 0xd4a   :  { %1188 = vmatpush.msrb.mxu3 %v1070_v37 }
 0xd4b   :  { %v2707_v9 = vpop.eup %2706 }
 0xd4c   :  { %v754_v22 = vmul.f32 %v2707_v9, %v749_v21  ;;  %vm759_vm10 = vweird.f32 %v2707_v9  ;;  %v1019_v21 = vld [vmem:[%s4165_s15 + $0x20] sm:$0xff]  ;;  %1189 = vmatpush.msrb.mxu3 %v1069_v41 }
 0xd4d   :  { %vm760_vm12 = vmor %vm758_vm11, %vm759_vm10  ;;  %1122 = vmatpush.msrb.mxu2 %v1019_v21 }
 0xd4e   :  { %v755_v23 = vsub.f32 1.0, %v754_v22  ;;  %1190 = vmatpush.msrb.mxu3 %v1068_v48 }
 0xd50   :  { %v756_v26 = vmul.f32 %v2707_v9, %v755_v23  ;;  %1191 = vmatpush.msrb.mxu3 %v1067_v52 }
 0xd52   :  { %v757_v28 = vadd.f32 %v2707_v9, %v756_v26  ;;  %v3399_v26 = vadd.f32 %v826_v16, %v801_v12  ;;  %v1058_v16 = vld [vmem:[%s4165_s15 + $0x158] sm:$0xff] }
 0xd54   :  { %v761_v30 = vsel %vm760_vm12, %v2707_v9, %v757_v28  ;;  %v1035_v9 = vld [vmem:[%s4165_s15 + $0xa0] sm:$0xff]  ;;  %v1018_v28 = vld [vmem:[%s4165_s15 + $0x18] sm:$0xff]  ;;  %v909_v39 = vmul.f32 0.044715, %v3399_v26 }
 0xd55   :  { %v766_v31 = vsel %vm763_vm13, %v765_v29, %v761_v30  ;;  %v1034_v29 = vld [vmem:[%s4165_s15 + $0x98] sm:$0xff]  ;;  %1145 = vmatpush.msrb.mxu1 %v1035_v9  ;;  %1123 = vmatpush.msrb.mxu2 %v1018_v28  ;;  %v1056_v9 = vld [vmem:[%s4165_s15 + $0x148] sm:$0xff] }
 0xd56   :  { %v3272_v33 = vmul.f32 %v766_v31, %v745_v10  ;;  %v849_v10 = vpop.f32.mrf.mxu2  ;;  %v917_v50 = vmul.f32 %v909_v39, %v3399_v26 }
 0xd57   :  { %v3391_v22 = vadd.f32 %v849_v10, %v802_v6  ;;  %1146 = vmatpush.msrb.mxu1 %v1034_v29  ;;  %1124 = vmatpush.msrb.mxu2 %v1017_v38  ;;  %v1060_v10 = vld [vmem:[%s4165_s15 + $0x168] sm:$0xff] }
 0xd58   :  { %975 = vperm.xlu1 %2640, %v3272_v33   ;;  %986 = vperm.xlu0 %2641, %v3272_v33   ;;  %v925_v55 = vmul.f32 %v917_v50, %v3399_v26  ;;  %v872_v50 = vpop.f32.mrf.mxu0 }
 0xd59   :  { %2473 = vmatmul.msk.f32.vlgmr.msra.gmra.mxu3 %vm634_vm4, %v3272_v33  ;;  %v910_v36 = vmul.f32 0.044715, %v3391_v22  ;;  %1125 = vmatpush.msrb.mxu2 %v1016_v42  ;;  %v902_v25 = vmul.f32 0.5, %v3391_v22 }
 0xd5a   :  { %v933_v59 = vadd.f32 %v925_v55, %v3399_v26 }
 0xd5b   :  { %v918_v46 = vmul.f32 %v910_v36, %v3391_v22  ;;  %1126 = vmatpush.msrb.mxu2 %v1015_v49  ;;  %v803_v49 = vperm.slane %v3358_v0, 2 }
 0xd5c   :  { %v941_v2 = vmul.f32 0.7978846, %v933_v59  ;;  %v1047_v59 = vld [vmem:[%s4165_s15 + $0x100] sm:$0xff] }
 0xd5d   :  { %v926_v53 = vmul.f32 %v918_v46, %v3391_v22 }
 0xd60   :  { %2642 = vset.pattern.permute.xlu1 %v2835_v34  ;;  %2647 = vset.pattern.permute.xlu0 %v2836_v35 }
 0xd61   :  { %1006 = vperm.xlu1 %2642, %v3272_v33  }
 0xd69   :  { %2645 = vset.pattern.permute.xlu1 %v2824_v3 }
 0xd94   :  { %v3306_v45 = vpop.xlane.xlu2 %751 }
 0xd95   :  { %2708 = vrcp.f32 %v3306_v45  ;;  %v779_v7 = vand.u32 2147483648, %v3306_v45  ;;  %v777_v14 = vand.u32 2147483647, %v3306_v45  ;;  %vm773_vm15 = vweird.f32 %v3306_v45 }
 0xd97   :  { %v780_v23 = vor.u32 1.1754944e-38, %v779_v7  ;;  %vm778_vm2 = vcmp.eq.f32.partialorder %v777_v14, 8.507059e+37  ;;  %v1061_v7 = vld [vmem:[%s4165_s15 + $0x170] sm:$0xff] }
 0xd9b   :  { %v2709_v54 = vpop.eup %2708 }
 0xd9c   :  { %v769_v57 = vmul.f32 %v2709_v54, %v3306_v45  ;;  %vm774_vm14 = vweird.f32 %v2709_v54  ;;  %v1032_v45 = vld [vmem:[%s4165_s15 + $0x88] sm:$0xff] }
 0xd9d   :  { %vm775_vm0 = vmor %vm773_vm15, %vm774_vm14 }
 0xd9e   :  { %v770_v1 = vsub.f32 1.0, %v769_v57  ;;  %v934_v57 = vadd.f32 %v926_v53, %v3391_v22  ;;  %v1053_v22 = vld [vmem:[%s4165_s15 + $0x130] sm:$0xff]  ;;  %v873_v53 = vadd.f32 %v872_v50, %v803_v49 }
 0xda0   :  { %v771_v13 = vmul.f32 %v2709_v54, %v770_v1  ;;  %v942_v1 = vmul.f32 0.7978846, %v934_v57  ;;  %v898_v57 = vpop.f32.mrf.mxu1 }
 0xda2   :  { %v772_v5 = vadd.f32 %v2709_v54, %v771_v13  ;;  %2710 = vtanh.f32 %v942_v1  ;;  %v1059_v13 = vld [vmem:[%s4165_s15 + $0x160] sm:$0xff]  ;;  %v875_v1 = vpop.f32.mrf.mxu0 }
 0xda3   :  { %2712 = vtanh.f32 %v941_v2  ;;  %v829_v2 = vpop.f32.mrf.mxu3 }
 0xda4   :  { %v776_v27 = vsel %vm775_vm0, %v2709_v54, %v772_v5  ;;  %v1066_v54 = vld [vmem:[%s4165_s15 + $0x198] sm:$0xff] }
 0xda5   :  { %v781_v30 = vsel %vm778_vm2, %v780_v23, %v776_v27  ;;  %1192 = vmatpush.msrb.mxu3 %v1066_v54  ;;  %v901_v23 = vmul.f32 0.5, %v3399_v26  ;;  %v1055_v27 = vld [vmem:[%s4165_s15 + $0x140] sm:$0xff]  ;;  %v1054_v26 = vld [vmem:[%s4165_s15 + $0x138] sm:$0xff]  ;;  %v1049_v54 = vld [vmem:[%s4165_s15 + $0x110] sm:$0xff] }
 0xda6   :  { %v782_v31 = vmul.f32 %v781_v30, %v3262_v17  ;;  %v1033_v17 = vld [vmem:[%s4165_s15 + $0x90] sm:$0xff] }
 0xda7   :  { %1147 = vmatpush.msrb.mxu1 %v1033_v17  ;;  %1193 = vmatpush.msrb.mxu3 %v1065_v56  ;;  %v904_v17 = vmul.f32 0.5, %v3443_v24  ;;  %v911_v56 = vmul.f32 0.044715, %v873_v53 }
 0xda8   :  { %1000 = vperm.xlu0 %2647, %v782_v31   ;;  %980 = vperm.xlu1 %2645, %v782_v31   ;;  %v2711_v14 = vpop.eup %2710 }
 0xda9   :  { %990 = vperm.xlu2 %2643, %v782_v31   ;;  %2474 = vmatmul.msk.f32.gmra.mxu3 %vm634_vm4, %v782_v31  ;;  %v2713_v61 = vpop.eup %2712  ;;  %v958_v21 = vadd.f32 1.0, %v2711_v14 }
 0xdaa   :  { %1148 = vmatpush.msrb.mxu1 %v1032_v45  ;;  %1194 = vmatpush.msrb.mxu3 %v1064_v58  ;;  %v957_v5 = vadd.f32 1.0, %v2713_v61  ;;  %v852_v45 = vpop.f32.mrf.mxu2 }
 0xdab   :  { %v966_v29 = vmul.f32 %v958_v21, %v902_v25  ;;  %v853_v46 = vadd.f32 %v852_v45, %v802_v6  ;;  %v1050_v6 = vld [vmem:[%s4165_s15 + $0x118] sm:$0xff] }
 0xdac   :  { %1149 = vmatpush.msrb.mxu1 %v1031_v51  ;;  %1195 = vmatpush.msrb.mxu3 %v1063_v62  ;;  %v965_v28 = vmul.f32 %v957_v5, %v901_v23  ;;  %v1052_v51 = vld [vmem:[%s4165_s15 + $0x128] sm:$0xff]  ;;  %v899_v62 = vadd.f32 %v898_v57, %v804_v40 }
 0xdad   :  { %v914_v48 = vmul.f32 0.044715, %v853_v46 }
 0xdae   :  { %1157 = vmatpush.msra.mxu1 %v1062_v4 }
 0xdaf   :  { %v922_v52 = vmul.f32 %v914_v48, %v853_v46 }
 0xdb0   :  { %2649 = vset.pattern.permute.xlu0 %v2824_v3  ;;  %2648 = vset.pattern.permute.xlu1 %v2836_v35 }
 0xdb1   :  { %2644 = vset.pattern.permute.xlu2 %v2836_v35  ;;  %1158 = vmatpush.msra.mxu1 %v1061_v7  ;;  %v930_v55 = vmul.f32 %v922_v52, %v853_v46  ;;  %v876_v7 = vadd.f32 %v875_v1, %v803_v49  ;;  %v908_v49 = vmul.f32 0.5, %v899_v62 }
 0xdb2   :  { %996 = vperm.xlu2 %2644, %v3272_v33   ;;  %v928_v33 = vmul.f32 %v920_v60, %v3443_v24  ;;  %v919_v60 = vmul.f32 %v911_v56, %v873_v53 }
 0xdb3   :  { %1159 = vmatpush.msra.mxu1 %v1060_v10  ;;  %v938_v58 = vadd.f32 %v930_v55, %v853_v46  ;;  %v830_v10 = vadd.f32 %v829_v2, %v801_v12  ;;  %v915_v14 = vmul.f32 0.044715, %v876_v7  ;;  %v907_v55 = vmul.f32 0.5, %v876_v7 }
 0xdb4   :  { %v936_v8 = vadd.f32 %v928_v33, %v3443_v24  ;;  %v1051_v24 = vld [vmem:[%s4165_s15 + $0x120] sm:$0xff]  ;;  %v927_v4 = vmul.f32 %v919_v60, %v873_v53 }
 0xdb5   :  { %1160 = vmatpush.msra.mxu1 %v1059_v13  ;;  %v946_v33 = vmul.f32 0.7978846, %v938_v58  ;;  %v913_v61 = vmul.f32 0.044715, %v830_v10  ;;  %v923_v21 = vmul.f32 %v915_v14, %v876_v7 }
 0xdb6   :  { %v944_v15 = vmul.f32 0.7978846, %v936_v8  ;;  %v916_v8 = vmul.f32 0.044715, %v899_v62  ;;  %v935_v13 = vadd.f32 %v927_v4, %v873_v53 }
 0xdb7   :  { %1161 = vmatpush.msra.mxu1 %v1058_v16  ;;  %v931_v25 = vmul.f32 %v923_v21, %v876_v7 }
 0xdb8   :  { %2714 = vtanh.f32 %v944_v15  ;;  %v924_v15 = vmul.f32 %v916_v8, %v899_v62  ;;  %v943_v16 = vmul.f32 0.7978846, %v935_v13 }
 0xdb9   :  { %1162 = vmatpush.msra.mxu1 %v1057_v18  ;;  %2716 = vtanh.f32 %v946_v33  ;;  %v939_v12 = vadd.f32 %v931_v25, %v876_v7 }
 0xdba   :  { %2646 = vset.pattern.permute.xlu2 %v2835_v34  ;;  %v932_v5 = vmul.f32 %v924_v15, %v899_v62  ;;  %2718 = vtanh.f32 %v943_v16 }
 0xdbb   :  { %1010 = vperm.xlu2 %2646, %v782_v31   ;;  %1163 = vmatpush.msra.mxu1 %v1056_v9  ;;  %v921_v9 = vmul.f32 %v913_v61, %v830_v10 }
 0xdbc   :  { %v940_v23 = vadd.f32 %v932_v5, %v899_v62 }
 0xdbd   :  { %1164 = vmatpush.msra.mxu1 %v1055_v27  ;;  %v906_v27 = vmul.f32 0.5, %v853_v46 }
 0xdbe   :  { %v2715_v36 = vpop.eup %2714  ;;  %v948_v0 = vmul.f32 0.7978846, %v940_v23 }
 0xdbf   :  { %v960_v39 = vadd.f32 1.0, %v2715_v36  ;;  %1165 = vmatpush.msra.mxu1 %v1054_v26  ;;  %v2717_v18 = vpop.eup %2716  ;;  %v947_v26 = vmul.f32 0.7978846, %v939_v12 }
 0xdc0   :  { %v962_v40 = vadd.f32 1.0, %v2717_v18  ;;  %2720 = vtanh.f32 %v948_v0 }
 0xdc1   :  { %1166 = vmatpush.msra.mxu1 %v1053_v22  ;;  %v968_v41 = vmul.f32 %v960_v39, %v904_v17  ;;  %v903_v39 = vmul.f32 0.5, %v873_v53  ;;  %2722 = vtanh.f32 %v947_v26  ;;  %v2479_v26 = vld [vmem:[%s4155_s5 + $0x30] sm:$0xff] }
 0xdc3   :  { %1167 = vmatpush.msra.mxu1 %v1052_v51 }
 0xdc5   :  { %1168 = vmatpush.msra.mxu1 %v1051_v24 }
 0xdc7   :  { %1169 = vmatpush.msra.mxu1 %v1050_v6 }
 0xdc9   :  { %1170 = vmatpush.msra.mxu1 %v1049_v54  ;;  %v905_v54 = vmul.f32 0.5, %v830_v10 }
 0xdca   :  { %v976_v30 = vpop.permute.xlu1 %975  ;;  %v987_v31 = vpop.permute.xlu0 %986 }
 0xdcb   :  { %v983_v37 = vmul.f32 %v976_v30, %v965_v28  ;;  %v993_v38 = vmul.f32 %v987_v31, %v966_v29  ;;  %1171 = vmatpush.msra.mxu1 %v1048_v63  ;;  %v929_v28 = vmul.f32 %v921_v9, %v830_v10  ;;  %v970_v29 = vmul.f32 %v962_v40, %v906_v27  ;;  %v2719_v31 = vpop.eup %2718 }
 0xdcd   :  { %1127 = vmatmul.f32.vlgmr.msrb.gmra.mxu2 %v983_v37  ;;  %1150 = vmatmul.f32.vlgmr.msrb.gmra.mxu1 %v993_v38  ;;  %v937_v37 = vadd.f32 %v929_v28, %v830_v10  ;;  %v959_v38 = vadd.f32 1.0, %v2719_v31 }
 0xdce   :  { %1172 = vmatpush.msra.mxu1 %v1047_v59 }
 0xdcf   :  { %v945_v22 = vmul.f32 0.7978846, %v937_v37  ;;  %v967_v17 = vmul.f32 %v959_v38, %v903_v39  ;;  %v2480_v38 = vld [vmem:[%s4155_s5 + $0x38] sm:$0xff]  ;;  %v2477_v39 = vld [vmem:[%s4155_s5 + $0x20] sm:$0xff] }
 0xdd0   :  { %1291 = vmatpush.msra.mxu2 %v2480_v38 }
 0xdd1   :  { %2724 = vtanh.f32 %v945_v22  ;;  %v2478_v22 = vld [vmem:[%s4155_s5 + $0x28] sm:$0xff] }
 0xdd2   :  { %1292 = vmatpush.msra.mxu2 %v2479_v26 }
 0xdd3   :  { %v1007_v42 = vpop.permute.xlu1 %1006 }
 0xdd4   :  { %v1013_v44 = vmul.f32 %v1007_v42, %v968_v41  ;;  %v2721_v42 = vpop.eup %2720  ;;  %1293 = vmatpush.msra.mxu2 %v2478_v22 }
 0xdd5   :  { %v964_v45 = vadd.f32 1.0, %v2721_v42  ;;  %v2723_v46 = vpop.eup %2722 }
 0xdd6   :  { %1196 = vmatmul.f32.vlgmr.msrb.gmra.mxu3 %v1013_v44  ;;  %v963_v24 = vadd.f32 1.0, %v2723_v46  ;;  %1294 = vmatpush.msra.mxu2 %v2477_v39 }
 0xdd7   :  { %v2725_v48 = vpop.eup %2724  ;;  %v972_v50 = vmul.f32 %v964_v45, %v908_v49 }
 0xdd8   :  { %v961_v52 = vadd.f32 1.0, %v2725_v48  ;;  %v971_v63 = vmul.f32 %v963_v24, %v907_v55 }
 0xdda   :  { %v969_v53 = vmul.f32 %v961_v52, %v905_v54 }
 0xddc   :  { %v1105_v1 = vpop.f32.mrf.mxu3 }
 0xe03   :  { %v991_v30 = vpop.permute.xlu2 %990 }
 0xe04   :  { %v994_v36 = vmul.f32 %v991_v30, %v970_v29 }
 0xe06   :  { %1153 = vmatmul.f32.gmra.mxu1 %v994_v36 }
 0xe0c   :  { %v997_v41 = vpop.permute.xlu2 %996 }
 0xe0d   :  { %v1003_v44 = vmul.f32 %v997_v41, %v967_v17 }
 0xe0f   :  { %1173 = vmatmul.f32.vlgmr.msra.gmra.mxu1 %v1003_v44 }
 0xe15   :  { %v1011_v51 = vpop.permute.xlu2 %1010 }
 0xe16   :  { %v1014_v6 = vmul.f32 %v1011_v51, %v972_v50  ;;  %v2663_v51 = vld [vmem:[%s4188_s23 + $0x1] ss:$0 sm:$0xff] }
 0xe18   :  { %1199 = vmatmul.f32.gmra.mxu3 %v1014_v6  ;;  %v2664_v6 = vld [vmem:[%s4154_s4 + $0x1] ss:$0 sm:$0xff] }
 0xe1a   :  { %v981_v56 = vpop.permute.xlu1 %980  ;;  %v1001_v57 = vpop.permute.xlu0 %1000 }
 0xe1b   :  { %v984_v58 = vmul.f32 %v981_v56, %v969_v53  ;;  %v1004_v59 = vmul.f32 %v1001_v57, %v971_v63 }
 0xe1d   :  { %1130 = vmatmul.f32.gmra.mxu2 %v984_v58  ;;  %1176 = vmatmul.f32.gmra.mxu1 %v1004_v59 }
 0xe2c   :  { %v1108_v33 = vpop.f32.mrf.mxu3 }
 0xe4a   :  { %v1151_v60 = vpop.f32.mrf.mxu1 }
 0xe50   :  { %v1128_v62 = vpop.f32.mrf.mxu2 }
 0xe51   :  { %v1129_v4 = vadd.f32 %v1128_v62, %v1105_v1 }
 0xe53   :  { %v1152_v8 = vadd.f32 %v1151_v60, %v1129_v4 }
 0xe59   :  { %v1197_v10 = vpop.f32.mrf.mxu3 }
 0xe83   :  { %v1154_v2 = vpop.f32.mrf.mxu1 }
 0xe8c   :  { %v1174_v13 = vpop.f32.mrf.mxu1 }
 0xe8d   :  { %v1175_v14 = vadd.f32 %v1174_v13, %v1152_v8  ;;  %v2665_v13 = vld [vmem:[%s4156_s6 + $0x1] ss:$0 sm:$0xff]  ;;  %s4191_s6 = smov 48  }
 0xe8f   :  { %v1198_v7 = vadd.f32 %v1197_v10, %v1175_v14 }
 0xe91   :  { %v3532_v15 = vadd.f32 %v1198_v7, %v3120_v43 }
 0xe93   :  { %v1209_v61 = vsel %vm125_vm1, %v3532_v15, 0.0 }
 0xe94   :  { %1210 = vadd.xlane.f32.xlu1 %v1209_v61 }
 0xe9a   :  { %v1177_v21 = vpop.f32.mrf.mxu1 }
 0xe9b   :  { %v1200_v40 = vpop.f32.mrf.mxu3 }
 0xea0   :  { %v1131_v16 = vpop.f32.mrf.mxu2 }
 0xea1   :  { %v1132_v18 = vadd.f32 %v1131_v16, %v1108_v33 }
 0xea3   :  { %v1155_v5 = vadd.f32 %v1154_v2, %v1132_v18 }
 0xea5   :  { %v1178_v9 = vadd.f32 %v1177_v21, %v1155_v5 }
 0xea7   :  { %v1201_v23 = vadd.f32 %v1200_v40, %v1178_v9 }
 0xea9   :  { %v3537_v25 = vadd.f32 %v1201_v23, %v3125_v47 }
 0xeab   :  { %v1212_v27 = vsel %vm125_vm1, %v3537_v25, 0.0 }
 0xeac   :  { %1213 = vadd.xlane.f32.xlu0 %v1212_v27 }
 0xf07   :  { %v1211_v43 = vpop.xlane.xlu1 %1210 }
 0xf08   :  { %v1215_v28 = vmul.f32 %v1211_v43, %v3004_v32 }
 0xf0a   :  { %v1217_v29 = vsub.f32 %v3532_v15, %v1215_v28 }
 0xf0c   :  { %v1219_v30 = vmul.f32 %v1217_v29, %v1217_v29 }
 0xf0e   :  { %v1221_v0 = vsel %vm125_vm1, %v1219_v30, 0.0 }
 0xf0f   :  { %1222 = vadd.xlane.f32.xlu2 %v1221_v0 }
 0xf1f   :  { %v1214_v12 = vpop.xlane.xlu0 %1213 }
 0xf20   :  { %v1216_v31 = vmul.f32 %v1214_v12, %v3004_v32 }
 0xf22   :  { %v1218_v36 = vsub.f32 %v3537_v25, %v1216_v31 }
 0xf24   :  { %v1220_v47 = vmul.f32 %v1218_v36, %v1218_v36 }
 0xf26   :  { %v1224_v37 = vsel %vm125_vm1, %v1220_v47, 0.0 }
 0xf27   :  { %1225 = vadd.xlane.f32.xlu1 %v1224_v37 }
 0xf82   :  { %v1223_v17 = vpop.xlane.xlu2 %1222 }
 0xf83   :  { %v1227_v41 = vmul.f32 %v1223_v17, %v3004_v32 }
 0xf85   :  { %v1229_v42 = vadd.f32 1e-05, %v1227_v41 }
 0xf87   :  { %2726 = vrsqrt.f32 %v1229_v42  ;;  %vm1237_vm5 = vweird.f32 %v1229_v42 }
 0xf8d   :  { %v2727_v44 = vpop.eup %2726 }
 0xf8e   :  { %v1232_v45 = vmul.f32 %v2727_v44, %v1229_v42  ;;  %vm1238_vm3 = vweird.f32 %v2727_v44 }
 0xf8f   :  { %vm1239_vm6 = vmor %vm1237_vm5, %vm1238_vm3 }
 0xf90   :  { %v1233_v46 = vmul.f32 %v2727_v44, %v1232_v45 }
 0xf92   :  { %v1234_v48 = vmul.f32 0.5, %v1233_v46 }
 0xf94   :  { %v1235_v49 = vsub.f32 1.5, %v1234_v48 }
 0xf96   :  { %v1236_v50 = vmul.f32 %v2727_v44, %v1235_v49 }
 0xf98   :  { %v1240_v52 = vsel %vm1239_vm6, %v2727_v44, %v1236_v50 }
 0xf99   :  { %v1251_v24 = vmul.f32 %v1240_v52, %v1217_v29 }
 0xf9a   :  { %v1226_v54 = vpop.xlane.xlu1 %1225 }
 0xf9b   :  { %v1256_v55 = vmul.f32 %v2663_v51, %v1251_v24  ;;  %v1228_v53 = vmul.f32 %v1226_v54, %v3004_v32 }
 0xf9d   :  { %v1230_v63 = vadd.f32 1e-05, %v1228_v53  ;;  %v1261_v56 = vadd.f32 %v2664_v6, %v1256_v55 }
 0xf9f   :  { %2728 = vrsqrt.f32 %v1230_v63  ;;  %2482 = vmatmul.msk.f32.vlgmr.msra.gmra.mxu2 %vm125_vm1, %v1261_v56  ;;  %vm1247_vm11 = vweird.f32 %v1230_v63 }
 0xfa5   :  { %v2729_v57 = vpop.eup %2728 }
 0xfa6   :  { %v1242_v58 = vmul.f32 %v2729_v57, %v1230_v63  ;;  %vm1248_vm10 = vweird.f32 %v2729_v57 }
 0xfa7   :  { %vm1249_vm12 = vmor %vm1247_vm11, %vm1248_vm10 }
 0xfa8   :  { %v1243_v59 = vmul.f32 %v2729_v57, %v1242_v58 }
 0xfaa   :  { %v1244_v60 = vmul.f32 0.5, %v1243_v59 }
 0xfac   :  { %v1245_v1 = vsub.f32 1.5, %v1244_v60 }
 0xfae   :  { %v1246_v2 = vmul.f32 %v2729_v57, %v1245_v1 }
 0xfb0   :  { %v1250_v62 = vsel %vm1249_vm12, %v2729_v57, %v1246_v2 }
 0xfb1   :  { %v1252_v33 = vmul.f32 %v1250_v62, %v1218_v36 }
 0xfb3   :  { %v1257_v4 = vmul.f32 %v2663_v51, %v1252_v33 }
 0xfb5   :  { %v1262_v8 = vadd.f32 %v2664_v6, %v1257_v4 }
 0xfb7   :  { %2483 = vmatmul.msk.f32.gmra.mxu2 %vm125_vm1, %v1262_v8 }
0x1022   :  { %v1296_v14 = vpop.f32.mrf.mxu2 }
0x1023   :  { %v1297_v10 = vadd.f32 %v2665_v13, %v1296_v14 }
0x1025   :  { %1303 = vrot.lane.b32.xlu2 %v1297_v10, %s2828_s28  ;;  %1370 = vrot.lane.b32.xlu0 %v1297_v10, %s2827_s27 }
0x103a   :  { %v1299_v7 = vpop.f32.mrf.mxu2 }
0x103b   :  { %v3574_v61 = vadd.f32 %v2665_v13, %v1299_v7 }
0x103d   :  { %1506 = vrot.lane.b32.xlu0 %v3574_v61, %s2829_s29  ;;  %1508 = vrot.lane.b32.xlu2 %v3574_v61, %s2827_s27 }
0x1045   :  { %1342 = vrot.lane.b32.xlu0 %v1297_v10, %s4190_s21 }
0x107f   :  { %v1304_v16 = vpop.permute.xlu2 %1303 }
0x1080   :  { %2484 = vmatpush.xpose.msk.msrb.mxu2 %vm227_vm7, %v1304_v16  ;;  %v2499_v16 = vld [vmem:[%s4157_s7 + $0x38] sm:$0xff] }
0x1083   :  { %2485 = vmatmul.msk.f32.vlgmr.msrb.gmra.mxu2 %vm227_vm7, %v1297_v10 }
0x1097   :  { %v1371_v18 = vpop.permute.xlu0 %1370  ;;  %v1509_v5 = vpop.permute.xlu2 %1508 }
0x1098   :  { %2487 = vmatpush.xpose.msk.msra.mxu3 %vm227_vm7, %v1371_v18  ;;  %2493 = vmatpush.xpose.msk.msra.mxu2 %vm227_vm7, %v1509_v5  ;;  %v2498_v18 = vld [vmem:[%s4157_s7 + $0x30] sm:$0xff]  ;;  %v2497_v5 = vld [vmem:[%s4157_s7 + $0x28] sm:$0xff] }
0x10af   :  { %v1507_v21 = vpop.permute.xlu0 %1506 }
0x10b0   :  { %2494 = vmatmul.msk.f32.vlgmr.msra.gmra.mxu2 %vm227_vm7, %v1507_v21 }
0x10b7   :  { %v1343_v9 = vpop.permute.xlu0 %1342 }
0x10b8   :  { %1363 = vmatpush.msrb.mxu1 %v1343_v9 }
0x1106   :  { %v1326_v40 = vpop.f32.mrf.mxu2 }
0x1107   :  { %v1329_v23 = vmul.f32 0.25, %v1326_v40 }
0x1109   :  { %v1330_v27 = vadd.f32 %v1329_v23, %v3059_v11 }
0x110b   :  { %v1331_v43 = vsel %vm254_vm9, %v1330_v27, -inf }
0x110c   :  { %1332 = vmax.xlane.f32.xlu1 %v1331_v43  ;;  %v2496_v43 = vld [vmem:[%s4157_s7 + $0x20] sm:$0xff] }
0x1125   :  { %1368 = vrot.lane.b32.xlu1 %v1297_v10, %s2829_s29 }
0x112d   :  { %1441 = vrot.lane.b32.xlu1 %v3574_v61, %s2828_s28 }
0x1133   :  { %v1531_v28 = vpop.f32.mrf.mxu2 }
0x1134   :  { %v1534_v29 = vmul.f32 0.25, %v1531_v28 }
0x1136   :  { %v1535_v30 = vadd.f32 %v1534_v29, %v3059_v11 }
0x1138   :  { %v1536_v0 = vsel %vm254_vm9, %v1535_v30, -inf }
0x1157   :  { %1537 = vmax.xlane.f32.xlu1 %v1536_v0 }
0x1170   :  { %1547 = vrot.lane.b32.xlu1 %v3574_v61, %s4191_s6 }
0x117f   :  { %v1333_v12 = vpop.xlane.xlu1 %1332 }
0x1180   :  { %v1334_v31 = vsub.f32 %v1330_v27, %v1333_v12 }
0x1182   :  { %v1335_v36 = vmul.f32 1.442695, %v1334_v31  ;;  %v2666_v31 = vld [vmem:[%s4158_s8 + $0x1] ss:$0 sm:$0xff] }
0x1184   :  { %2730 = vpow2.f32 %v1335_v36 }
0x118a   :  { %v2731_v47 = vpop.eup %2730 }
0x118b   :  { %v1337_v37 = vsel %vm254_vm9, %v2731_v47, 0.0 }
0x118c   :  { %1338 = vadd.xlane.f32.xlu2 %v1337_v37 }
0x1197   :  { %v1369_v38 = vpop.permute.xlu1 %1368 }
0x1198   :  { %2488 = vmatmul.msk.f32.vlgmr.msra.gmra.mxu3 %vm227_vm7, %v1369_v38 }
0x119f   :  { %v1442_v26 = vpop.permute.xlu1 %1441 }
0x11a0   :  { %2490 = vmatpush.xpose.msk.msra.mxu1 %vm227_vm7, %v1442_v26 }
0x11ca   :  { %v1538_v52 = vpop.xlane.xlu1 %1537 }
0x11cb   :  { %v1539_v54 = vsub.f32 %v1535_v30, %v1538_v52  ;;  %v2524_v52 = vld [vmem:[%s4163_s13 + $0xe0] sm:$0xff] }
0x11cc   :  { %1904 = vmatpush.msrb.mxu2 %v2524_v52 }
0x11cd   :  { %v1540_v53 = vmul.f32 1.442695, %v1539_v54  ;;  %v2507_v54 = vld [vmem:[%s4161_s11 + $0x30] sm:$0xff] }
0x11e2   :  { %v1548_v59 = vpop.permute.xlu1 %1547 }
0x11ff   :  { %v1339_v22 = vpop.xlane.xlu2 %1338 }
0x1200   :  { %2732 = vrcp.f32 %v1339_v22 }
0x1206   :  { %v2733_v39 = vpop.eup %2732 }
0x1207   :  { %v1341_v17 = vmul.f32 %v2733_v39, %v2731_v47 }
0x1209   :  { %2486 = vmatmul.msk.f32.vlgmr.msrb.gmra.mxu1 %vm254_vm9, %v1341_v17 }
0x120a   :  { %1606 = vmatpush.msrb.mxu1 %v2499_v16  ;;  %v2515_v16 = vld [vmem:[%s4163_s13 + $0x98] sm:$0xff] }
0x120c   :  { %1607 = vmatpush.msrb.mxu1 %v2498_v18 }
0x120e   :  { %1608 = vmatpush.msrb.mxu1 %v2497_v5 }
0x1210   :  { %1609 = vmatpush.msrb.mxu1 %v2496_v43 }
0x1211   :  { %2491 = vmatmul.msk.f32.vlgmr.msra.gmra.mxu1 %vm227_vm7, %v3574_v61 }
0x121b   :  { %v1393_v41 = vpop.f32.mrf.mxu3 }
0x121c   :  { %v1396_v42 = vmul.f32 0.25, %v1393_v41 }
0x121e   :  { %v1397_v44 = vadd.f32 %v1396_v42, %v3059_v11 }
0x1220   :  { %v1398_v45 = vsel %vm254_vm9, %v1397_v44, -inf }
0x1221   :  { %1399 = vmax.xlane.f32.xlu0 %v1398_v45 }
0x1235   :  { %1409 = vrot.lane.b32.xlu0 %v1297_v10, %s4191_s6 }
0x1286   :  { %v3604_v46 = vpop.f32.mrf.mxu1 }
0x128e   :  { %v1464_v48 = vpop.f32.mrf.mxu1 }
0x128f   :  { %v1467_v49 = vmul.f32 0.25, %v1464_v48 }
0x1291   :  { %v1468_v50 = vadd.f32 %v1467_v49, %v3059_v11 }
0x1293   :  { %v1469_v51 = vsel %vm254_vm9, %v1468_v50, -inf }
0x1294   :  { %1470 = vmax.xlane.f32.xlu2 %v1469_v51  ;;  %v1400_v24 = vpop.xlane.xlu0 %1399  ;;  %v2508_v51 = vld [vmem:[%s4161_s11 + $0x38] sm:$0xff] }
0x1295   :  { %v1401_v6 = vsub.f32 %v1397_v44, %v1400_v24  ;;  %v2525_v24 = vld [vmem:[%s4163_s13 + $0xe8] sm:$0xff] }
0x1297   :  { %v1402_v55 = vmul.f32 1.442695, %v1401_v6  ;;  %v2526_v6 = vld [vmem:[%s4163_s13 + $0xf0] sm:$0xff] }
0x1298   :  { %1950 = vmatpush.msra.mxu1 %v2526_v6 }
0x1299   :  { %2734 = vpow2.f32 %v1402_v55  ;;  %v2520_v55 = vld [vmem:[%s4163_s13 + $0xc0] sm:$0xff] }
0x129a   :  { %2736 = vpow2.f32 %v1540_v53  ;;  %v2521_v53 = vld [vmem:[%s4163_s13 + $0xc8] sm:$0xff]  ;;  %1905 = vmatpush.msrb.mxu2 %v2520_v55 }
0x129f   :  { %v2735_v63 = vpop.eup %2734 }
0x12a0   :  { %v1404_v56 = vsel %vm254_vm9, %v2735_v63, 0.0  ;;  %v2737_v57 = vpop.eup %2736 }
0x12a1   :  { %1405 = vadd.xlane.f32.xlu2 %v1404_v56  ;;  %v1542_v11 = vsel %vm254_vm9, %v2737_v57, 0.0  ;;  %v2506_v56 = vld [vmem:[%s4161_s11 + $0x28] sm:$0xff] }
0x12a7   :  { %v1410_v58 = vpop.permute.xlu0 %1409 }
0x12a8   :  { %1430 = vmatpush.msra.mxu0 %v1410_v58  ;;  %v2517_v58 = vld [vmem:[%s4163_s13 + $0xa8] sm:$0xff] }
0x12a9   :  { %1543 = vadd.xlane.f32.xlu2 %v1542_v11  ;;  %v2505_v11 = vld [vmem:[%s4161_s11 + $0x20] sm:$0xff] }
0x12aa   :  { %1568 = vmatpush.msrb.mxu0 %v1548_v59  ;;  %v2518_v59 = vld [vmem:[%s4163_s13 + $0xb0] sm:$0xff] }
0x1307   :  { %v1471_v60 = vpop.xlane.xlu2 %1470 }
0x1308   :  { %v1472_v1 = vsub.f32 %v1468_v50, %v1471_v60  ;;  %v2512_v60 = vld [vmem:[%s4163_s13 + $0x80] sm:$0xff] }
0x130a   :  { %v1473_v2 = vmul.f32 1.442695, %v1472_v1  ;;  %v2513_v1 = vld [vmem:[%s4163_s13 + $0x88] sm:$0xff] }
0x130c   :  { %2738 = vpow2.f32 %v1473_v2  ;;  %v2514_v2 = vld [vmem:[%s4163_s13 + $0x90] sm:$0xff] }
0x1312   :  { %v2739_v62 = vpop.eup %2738 }
0x1313   :  { %v1475_v33 = vsel %vm254_vm9, %v2739_v62, 0.0 }
0x1314   :  { %1476 = vadd.xlane.f32.xlu2 %v1475_v33  ;;  %v1406_v4 = vpop.xlane.xlu2 %1405 }
0x1315   :  { %2740 = vrcp.f32 %v1406_v4 }
0x131b   :  { %v2741_v8 = vpop.eup %2740 }
0x131c   :  { %v1408_v13 = vmul.f32 %v2741_v8, %v2735_v63  ;;  %v1544_v14 = vpop.xlane.xlu2 %1543  ;;  %v2522_v63 = vld [vmem:[%s4163_s13 + $0xd0] sm:$0xff]  ;;  %v2527_v8 = vld [vmem:[%s4163_s13 + $0xf8] sm:$0xff] }
0x131d   :  { %2742 = vrcp.f32 %v1544_v14  ;;  %1951 = vmatpush.msra.mxu1 %v2522_v63 }
0x131e   :  { %2489 = vmatmul.msk.f32.vlgmr.msra.gmra.mxu0 %vm254_vm9, %v1408_v13  ;;  %v2523_v13 = vld [vmem:[%s4163_s13 + $0xd8] sm:$0xff] }
0x131f   :  { %1927 = vmatpush.msra.mxu0 %v2525_v24  ;;  %1952 = vmatpush.msra.mxu1 %v2518_v59 }
0x1321   :  { %1928 = vmatpush.msra.mxu0 %v2521_v53  ;;  %1953 = vmatpush.msra.mxu1 %v2514_v2 }
0x1323   :  { %v2743_v10 = vpop.eup %2742  ;;  %1929 = vmatpush.msra.mxu0 %v2517_v58 }
0x1324   :  { %v1546_v7 = vmul.f32 %v2743_v10, %v2737_v57  ;;  %v2516_v57 = vld [vmem:[%s4163_s13 + $0xa0] sm:$0xff]  ;;  %v2519_v10 = vld [vmem:[%s4163_s13 + $0xb8] sm:$0xff] }
0x1325   :  { %1906 = vmatpush.msrb.mxu2 %v2516_v57  ;;  %1930 = vmatpush.msra.mxu0 %v2513_v1 }
0x1326   :  { %2495 = vmatmul.msk.f32.vlgmr.msrb.gmra.mxu0 %vm254_vm9, %v1546_v7 }
0x1327   :  { %1907 = vmatpush.msrb.mxu2 %v2512_v60 }
0x132c   :  { %1480 = vrot.lane.b32.xlu2 %v3574_v61, %s4190_s21 }
0x1387   :  { %v1477_v21 = vpop.xlane.xlu2 %1476 }
0x1388   :  { %2744 = vrcp.f32 %v1477_v21 }
0x138e   :  { %v2745_v9 = vpop.eup %2744 }
0x138f   :  { %v1479_v40 = vmul.f32 %v2745_v9, %v2739_v62  ;;  %v1481_v61 = vpop.permute.xlu2 %1480 }
0x1390   :  { %1501 = vmatpush.msrb.mxu3 %v1481_v61 }
0x1391   :  { %2492 = vmatmul.msk.f32.vlgmr.msrb.gmra.mxu3 %vm254_vm9, %v1479_v40 }
0x1392   :  { %1705 = vmatpush.msra.mxu3 %v2508_v51 }
0x1394   :  { %1706 = vmatpush.msra.mxu3 %v2507_v54 }
0x1396   :  { %1707 = vmatpush.msra.mxu3 %v2506_v56 }
0x1398   :  { %1708 = vmatpush.msra.mxu3 %v2505_v11 }
0x139a   :  { %1973 = vmatpush.msrb.mxu3 %v2527_v8 }
0x139b   :  { %v1432_v23 = vpop.f32.mrf.mxu0 }
0x139c   :  { %1436 = vrot.lane.b32.xlu0 %v1432_v23, %s4192_s25  ;;  %1974 = vmatpush.msrb.mxu3 %v2523_v13 }
0x139e   :  { %1975 = vmatpush.msrb.mxu3 %v2519_v10 }
0x13a0   :  { %1976 = vmatpush.msrb.mxu3 %v2515_v16 }
0x13a3   :  { %v1570_v27 = vpop.f32.mrf.mxu0 }
0x13a4   :  { %1574 = vrot.lane.b32.xlu1 %v1570_v27, %s4192_s25  ;;  %s2838_s25 = smov 128  }
0x140e   :  { %v1437_v28 = vpop.permute.xlu0 %1436 }
0x140f   :  { %v1439_v29 = vsel %vm227_vm7, %v3604_v46, %v1437_v28  ;;  %v2667_v28 = vld [vmem:[%s4159_s9 + $0x1] ss:$0 sm:$0xff] }
0x1410   :  { %2501 = vmatmul.msk.f32.vlgmr.msrb.gmra.mxu1 %vm125_vm1, %v1439_v29 }
0x1414   :  { %v1503_v30 = vpop.f32.mrf.mxu3 }
0x1416   :  { %v1575_v0 = vpop.permute.xlu1 %1574 }
0x1417   :  { %v1577_v12 = vsel %vm227_vm7, %v1503_v30, %v1575_v0 }
0x1418   :  { %2502 = vmatmul.msk.f32.gmra.mxu1 %vm125_vm1, %v1577_v12  ;;  %v2668_v12 = vld [vmem:[%s4160_s10 + $0x1] ss:$0 sm:$0xff] }
0x148d   :  { %v1611_v36 = vpop.f32.mrf.mxu1 }
0x148e   :  { %v1612_v47 = vadd.f32 %v2666_v31, %v1611_v36 }
0x1490   :  { %v3639_v37 = vadd.f32 %v1612_v47, %v3532_v15 }
0x1492   :  { %v1623_v38 = vsel %vm125_vm1, %v3639_v37, 0.0 }
0x1493   :  { %1624 = vadd.xlane.f32.xlu0 %v1623_v38 }
0x1495   :  { %v1614_v26 = vpop.f32.mrf.mxu1 }
0x1496   :  { %v1615_v22 = vadd.f32 %v2666_v31, %v1614_v26 }
0x1498   :  { %v3644_v39 = vadd.f32 %v1615_v22, %v3537_v25 }
0x149a   :  { %v1626_v17 = vsel %vm125_vm1, %v3644_v39, 0.0 }
0x149b   :  { %1627 = vadd.xlane.f32.xlu1 %v1626_v17 }
0x1506   :  { %v1625_v41 = vpop.xlane.xlu0 %1624 }
0x1507   :  { %v1629_v42 = vmul.f32 %v1625_v41, %v3004_v32 }
0x1509   :  { %v3650_v44 = vsub.f32 %v3639_v37, %v1629_v42 }
0x150b   :  { %v1633_v15 = vmul.f32 %v3650_v44, %v3650_v44 }
0x150d   :  { %v1635_v45 = vsel %vm125_vm1, %v1633_v15, 0.0 }
0x150e   :  { %1636 = vadd.xlane.f32.xlu2 %v1635_v45  ;;  %v1628_v46 = vpop.xlane.xlu1 %1627 }
0x150f   :  { %v1630_v25 = vmul.f32 %v1628_v46, %v3004_v32 }
0x1511   :  { %v3657_v48 = vsub.f32 %v3644_v39, %v1630_v25 }
0x1513   :  { %v1634_v49 = vmul.f32 %v3657_v48, %v3657_v48 }
0x1515   :  { %v1638_v50 = vsel %vm125_vm1, %v1634_v49, 0.0 }
0x1516   :  { %1639 = vadd.xlane.f32.xlu0 %v1638_v50 }
0x1581   :  { %v1637_v62 = vpop.xlane.xlu2 %1636 }
0x1582   :  { %v1641_v33 = vmul.f32 %v1637_v62, %v3004_v32 }
0x1584   :  { %v1643_v4 = vadd.f32 1e-05, %v1641_v33 }
0x1586   :  { %2746 = vrsqrt.f32 %v1643_v4  ;;  %vm1651_vm9 = vweird.f32 %v1643_v4 }
0x1589   :  { %v1640_v14 = vpop.xlane.xlu0 %1639 }
0x158a   :  { %v1642_v7 = vmul.f32 %v1640_v14, %v3004_v32 }
0x158c   :  { %v2747_v18 = vpop.eup %2746  ;;  %v1644_v5 = vadd.f32 1e-05, %v1642_v7 }
0x158d   :  { %v1646_v21 = vmul.f32 %v2747_v18, %v1643_v4  ;;  %vm1652_vm7 = vweird.f32 %v2747_v18 }
0x158e   :  { %2748 = vrsqrt.f32 %v1644_v5  ;;  %vm1653_vm13 = vmor %vm1651_vm9, %vm1652_vm7  ;;  %vm1661_vm15 = vweird.f32 %v1644_v5 }
0x158f   :  { %v1647_v9 = vmul.f32 %v2747_v18, %v1646_v21 }
0x1591   :  { %v1648_v40 = vmul.f32 0.5, %v1647_v9 }
0x1593   :  { %v1649_v61 = vsub.f32 1.5, %v1648_v40 }
0x1594   :  { %v2749_v23 = vpop.eup %2748 }
0x1595   :  { %v1650_v27 = vmul.f32 %v2747_v18, %v1649_v61  ;;  %v1656_v43 = vmul.f32 %v2749_v23, %v1644_v5  ;;  %vm1662_vm14 = vweird.f32 %v2749_v23 }
0x1596   :  { %vm1663_vm0 = vmor %vm1661_vm15, %vm1662_vm14 }
0x1597   :  { %v1654_v29 = vsel %vm1653_vm13, %v2747_v18, %v1650_v27  ;;  %v1657_v30 = vmul.f32 %v2749_v23, %v1656_v43 }
0x1598   :  { %v1665_v0 = vmul.f32 %v1654_v29, %v3650_v44  ;;  %v2669_v44 = vld [vmem:[%s4162_s12 + $0x1] ss:$0 sm:$0xff] }
0x1599   :  { %v1658_v31 = vmul.f32 0.5, %v1657_v30 }
0x159a   :  { %v1670_v36 = vmul.f32 %v2667_v28, %v1665_v0 }
0x159b   :  { %v1659_v47 = vsub.f32 1.5, %v1658_v31 }
0x159c   :  { %v1675_v38 = vadd.f32 %v2668_v12, %v1670_v36 }
0x159d   :  { %v1660_v26 = vmul.f32 %v2749_v23, %v1659_v47 }
0x159e   :  { %2510 = vmatmul.msk.f32.vlgmr.msra.gmra.mxu3 %vm125_vm1, %v1675_v38  ;;  %2529 = vmatmul.msk.f32.vlgmr.msrb.gmra.mxu2 %vm125_vm1, %v1675_v38 }
0x159f   :  { %v1664_v22 = vsel %vm1663_vm0, %v2749_v23, %v1660_v26  ;;  %2531 = vmatmul.msk.f32.vlgmr.msra.gmra.mxu0 %vm125_vm1, %v1675_v38  ;;  %2533 = vmatmul.msk.f32.vlgmr.msra.gmra.mxu1 %vm125_vm1, %v1675_v38 }
0x15a0   :  { %v1666_v17 = vmul.f32 %v1664_v22, %v3657_v48 }
0x15a2   :  { %v1671_v41 = vmul.f32 %v2667_v28, %v1666_v17 }
0x15a4   :  { %v1676_v42 = vadd.f32 %v2668_v12, %v1671_v41 }
0x15a6   :  { %2511 = vmatmul.msk.f32.gmra.mxu3 %vm125_vm1, %v1676_v42  ;;  %2530 = vmatmul.msk.f32.gmra.mxu2 %vm125_vm1, %v1676_v42 }
0x15a7   :  { %2532 = vmatmul.msk.f32.gmra.mxu0 %vm125_vm1, %v1676_v42  ;;  %2534 = vmatmul.msk.f32.gmra.mxu1 %vm125_vm1, %v1676_v42 }
0x15ae   :  { %2535 = vmatmul.msk.f32.vlgmr.msrb.gmra.mxu3 %vm125_vm1, %v1675_v38 }
0x15b6   :  { %2536 = vmatmul.msk.f32.gmra.mxu3 %vm125_vm1, %v1676_v42 }
0x1621   :  { %v1710_v15 = vpop.f32.mrf.mxu3 }
0x1622   :  { %v1711_v45 = vadd.f32 %v2669_v44, %v1710_v15 }
0x1624   :  { %v1716_v46 = vsel %vm634_vm4, %v1711_v45, -inf }
0x1625   :  { %1717 = vmax.xlane.f32.xlu1 %v1716_v46 }
0x1629   :  { %v1713_v25 = vpop.f32.mrf.mxu3 }
0x162a   :  { %v1714_v48 = vadd.f32 %v2669_v44, %v1713_v25 }
0x162c   :  { %v1719_v49 = vsel %vm634_vm4, %v1714_v48, -inf }
0x162d   :  { %1720 = vmax.xlane.f32.xlu0 %v1719_v49 }
0x1698   :  { %v1718_v50 = vpop.xlane.xlu1 %1717 }
0x1699   :  { %v1722_v51 = vsub.f32 %v1711_v45, %v1718_v50 }
0x169b   :  { %v1724_v52 = vmul.f32 1.442695, %v1722_v51 }
0x169d   :  { %2750 = vpow2.f32 %v1724_v52 }
0x16a0   :  { %v1721_v24 = vpop.xlane.xlu0 %1720 }
0x16a1   :  { %v1723_v6 = vsub.f32 %v1714_v48, %v1721_v24 }
0x16a3   :  { %v2751_v54 = vpop.eup %2750  ;;  %v1726_v55 = vmul.f32 1.442695, %v1723_v6 }
0x16a4   :  { %v1728_v53 = vsel %vm634_vm4, %v2751_v54, 0.0 }
0x16a5   :  { %2752 = vpow2.f32 %v1726_v55  ;;  %1729 = vadd.xlane.f32.xlu2 %v1728_v53 }
0x16ab   :  { %v2753_v63 = vpop.eup %2752 }
0x16ac   :  { %v1731_v56 = vsel %vm634_vm4, %v2753_v63, 0.0 }
0x16ad   :  { %1732 = vadd.xlane.f32.xlu1 %v1731_v56 }
0x1718   :  { %v1730_v57 = vpop.xlane.xlu2 %1729 }
0x1719   :  { %2754 = vrcp.f32 %v1730_v57 }
0x171f   :  { %v2755_v58 = vpop.eup %2754 }
0x1720   :  { %v3749_v59 = vmul.f32 %v2755_v58, %v2751_v54  ;;  %v1733_v11 = vpop.xlane.xlu1 %1732 }
0x1721   :  { %2756 = vrcp.f32 %v1733_v11 }
0x1722   :  { %v1738_v60 = vsel %vm634_vm4, %v3749_v59, -inf }
0x1723   :  { %1739 = vmax.xlane.f32.xlu0 %v1738_v60 }
0x1727   :  { %v2757_v1 = vpop.eup %2756 }
0x1728   :  { %v3753_v2 = vmul.f32 %v2757_v1, %v2753_v63 }
0x172a   :  { %v1741_v62 = vsel %vm634_vm4, %v3753_v2, -inf }
0x172b   :  { %1742 = vmax.xlane.f32.xlu2 %v1741_v62 }
0x1796   :  { %v1740_v33 = vpop.xlane.xlu0 %1739 }
0x1797   :  { %vm1744_vm2 = vcmp.eq.f32.partialorder %v3749_v59, %v1740_v33 }
0x1798   :  { %v1746_v4 = vsel %vm1744_vm2, %v2994_v19, 4 }
0x1799   :  { %v1748_v8 = vsel %vm634_vm4, %v1746_v4, 2147483647 }
0x179a   :  { %v1750_v13 = vshra.s32 %v1748_v8, 16  ;;  %v1749_v21 = vand.u32 65535, %v1748_v8 }
0x179c   :  { %v1752_v14 = vcvt.s32.f32 %v1750_v13  ;;  %v1751_v40 = vcvt.s32.f32 %v1749_v21 }
0x179e   :  { %1753 = vmin.xlane.f32.xlu1 %v1752_v14  ;;  %v1743_v10 = vpop.xlane.xlu2 %1742 }
0x179f   :  { %vm1745_vm3 = vcmp.eq.f32.partialorder %v3753_v2, %v1743_v10 }
0x17a0   :  { %v1747_v7 = vsel %vm1745_vm3, %v2994_v19, 4 }
0x17a1   :  { %v1763_v16 = vsel %vm634_vm4, %v1747_v7, 2147483647 }
0x17a2   :  { %v1765_v18 = vshra.s32 %v1763_v16, 16  ;;  %v1764_v23 = vand.u32 65535, %v1763_v16 }
0x17a4   :  { %v1767_v5 = vcvt.s32.f32 %v1765_v18  ;;  %v1766_v43 = vcvt.s32.f32 %v1764_v23 }
0x17a6   :  { %1768 = vmin.xlane.f32.xlu0 %v1767_v5 }
0x1811   :  { %v1754_v9 = vpop.xlane.xlu1 %1753 }
0x1812   :  { %vm1755_vm5 = vcmp.eq.f32.partialorder %v1752_v14, %v1754_v9  ;;  %v1760_v29 = vcvt.f32.s32 %v1754_v9 }
0x1813   :  { %v1756_v61 = vsel %vm1755_vm5, %v1751_v40, inf }
0x1814   :  { %1757 = vmin.xlane.f32.xlu2 %v1756_v61  ;;  %v1761_v0 = vshll.u32 %v1760_v29, 16 }
0x1819   :  { %v1769_v27 = vpop.xlane.xlu0 %1768 }
0x181a   :  { %vm1770_vm6 = vcmp.eq.f32.partialorder %v1767_v5, %v1769_v27  ;;  %v1775_v36 = vcvt.f32.s32 %v1769_v27 }
0x181b   :  { %v1771_v28 = vsel %vm1770_vm6, %v1766_v43, inf }
0x181c   :  { %1772 = vmin.xlane.f32.xlu1 %v1771_v28  ;;  %v1776_v22 = vshll.u32 %v1775_v36, 16 }
0x1887   :  { %v1758_v30 = vpop.xlane.xlu2 %1757 }
0x1888   :  { %v1759_v12 = vcvt.f32.s32 %v1758_v30 }
0x188a   :  { %v1762_v31 = vadd.s32 %v1761_v0, %v1759_v12  ;;  %v2600_v12 = vld [vmem:[%s4165_s15 + $0x3f8] sm:$0xff] }
0x188c   :  { %vm1778_vm10 = vcmp.eq.s32.totalorder %v2994_v19, %v1762_v31  ;;  %v2599_v31 = vld [vmem:[%s4165_s15 + $0x3f0] sm:$0xff] }
0x188d   :  { %v1780_v47 = vsel %vm1778_vm10, -1.0, %v3749_v59 }
0x188e   :  { %v1782_v38 = vsel %vm634_vm4, %v1780_v47, -inf }
0x188f   :  { %1783 = vmax.xlane.f32.xlu0 %v1782_v38  ;;  %v1773_v26 = vpop.xlane.xlu1 %1772 }
0x1890   :  { %v1774_v17 = vcvt.f32.s32 %v1773_v26 }
0x1892   :  { %v1777_v41 = vadd.s32 %v1776_v22, %v1774_v17  ;;  %v2598_v22 = vld [vmem:[%s4165_s15 + $0x3e8] sm:$0xff] }
0x1894   :  { %vm1779_vm11 = vcmp.eq.s32.totalorder %v2994_v19, %v1777_v41 }
0x1895   :  { %v1781_v42 = vsel %vm1779_vm11, -1.0, %v3753_v2 }
0x1896   :  { %v1785_v44 = vsel %vm634_vm4, %v1781_v42, -inf }
0x1897   :  { %1786 = vmax.xlane.f32.xlu2 %v1785_v44  ;;  %v2584_v44 = vld [vmem:[%s4165_s15 + $0x378] sm:$0xff] }
0x1898   :  { %2241 = vmatpush.msra.mxu3 %v2584_v44  ;;  %v2541_v44 = vld [vmem:[%s4165_s15 + $0x220] sm:$0xff] }
0x1902   :  { %v1784_v15 = vpop.xlane.xlu0 %1783 }
0x1903   :  { %vm1788_vm12 = vcmp.eq.f32.partialorder %v1780_v47, %v1784_v15  ;;  %v2597_v15 = vld [vmem:[%s4165_s15 + $0x3e0] sm:$0xff] }
0x1904   :  { %v1790_v45 = vsel %vm1788_vm12, %v2994_v19, 4 }
0x1905   :  { %v1792_v46 = vsel %vm634_vm4, %v1790_v45, 2147483647  ;;  %v2551_v45 = vld [vmem:[%s4165_s15 + $0x270] sm:$0xff] }
0x1906   :  { %v1794_v25 = vshra.s32 %v1792_v46, 16  ;;  %v1793_v6 = vand.u32 65535, %v1792_v46 }
0x1908   :  { %v1796_v48 = vcvt.s32.f32 %v1794_v25  ;;  %v1795_v55 = vcvt.s32.f32 %v1793_v6  ;;  %v2583_v25 = vld [vmem:[%s4165_s15 + $0x370] sm:$0xff] }
0x1909   :  { %v2595_v6 = vld [vmem:[%s4165_s15 + $0x3d0] sm:$0xff]  ;;  %2242 = vmatpush.msra.mxu3 %v2583_v25 }
0x190a   :  { %1797 = vmin.xlane.f32.xlu1 %v1796_v48  ;;  %v1787_v49 = vpop.xlane.xlu2 %1786 }
0x190b   :  { %vm1789_vm7 = vcmp.eq.f32.partialorder %v1781_v42, %v1787_v49  ;;  %v2552_v42 = vld [vmem:[%s4165_s15 + $0x278] sm:$0xff] }
0x190c   :  { %v1791_v50 = vsel %vm1789_vm7, %v2994_v19, 4  ;;  %2195 = vmatpush.msrb.mxu0 %v2552_v42  ;;  %v2596_v49 = vld [vmem:[%s4165_s15 + $0x3d8] sm:$0xff]  ;;  %v2562_v42 = vld [vmem:[%s4165_s15 + $0x2c8] sm:$0xff] }
0x190d   :  { %v1807_v51 = vsel %vm634_vm4, %v1791_v50, 2147483647  ;;  %v2550_v50 = vld [vmem:[%s4165_s15 + $0x268] sm:$0xff] }
0x190e   :  { %v1809_v52 = vshra.s32 %v1807_v51, 16  ;;  %v1808_v63 = vand.u32 65535, %v1807_v51  ;;  %2196 = vmatpush.msrb.mxu0 %v2551_v45 }
0x1910   :  { %v1811_v24 = vcvt.s32.f32 %v1809_v52  ;;  %v1810_v57 = vcvt.s32.f32 %v1808_v63  ;;  %v2582_v52 = vld [vmem:[%s4165_s15 + $0x368] sm:$0xff]  ;;  %2197 = vmatpush.msrb.mxu0 %v2550_v50  ;;  %v2592_v63 = vld [vmem:[%s4165_s15 + $0x3b8] sm:$0xff] }
0x1911   :  { %2243 = vmatpush.msra.mxu3 %v2582_v52  ;;  %v2572_v50 = vld [vmem:[%s4165_s15 + $0x318] sm:$0xff] }
0x1912   :  { %1812 = vmin.xlane.f32.xlu0 %v1811_v24 }
0x197d   :  { %v1798_v54 = vpop.xlane.xlu1 %1797 }
0x197e   :  { %vm1799_vm9 = vcmp.eq.f32.partialorder %v1796_v48, %v1798_v54  ;;  %v1804_v11 = vcvt.f32.s32 %v1798_v54 }
0x197f   :  { %v1800_v53 = vsel %vm1799_vm9, %v1795_v55, inf  ;;  %v2594_v55 = vld [vmem:[%s4165_s15 + $0x3c8] sm:$0xff] }
0x1980   :  { %1801 = vmin.xlane.f32.xlu2 %v1800_v53  ;;  %v1805_v1 = vshll.u32 %v1804_v11, 16  ;;  %v2593_v53 = vld [vmem:[%s4165_s15 + $0x3c0] sm:$0xff]  ;;  %v2587_v11 = vld [vmem:[%s4165_s15 + $0x390] sm:$0xff] }
0x1985   :  { %v1813_v56 = vpop.xlane.xlu0 %1812 }
0x1986   :  { %vm1814_vm13 = vcmp.eq.f32.partialorder %v1811_v24, %v1813_v56  ;;  %v1819_v4 = vcvt.f32.s32 %v1813_v56  ;;  %v2590_v56 = vld [vmem:[%s4165_s15 + $0x3a8] sm:$0xff] }
0x1987   :  { %v1815_v58 = vsel %vm1814_vm13, %v1810_v57, inf  ;;  %v2589_v57 = vld [vmem:[%s4165_s15 + $0x3a0] sm:$0xff] }
0x1988   :  { %1816 = vmin.xlane.f32.xlu1 %v1815_v58  ;;  %v1820_v10 = vshll.u32 %v1819_v4, 16  ;;  %v2588_v58 = vld [vmem:[%s4165_s15 + $0x398] sm:$0xff]  ;;  %v2549_v4 = vld [vmem:[%s4165_s15 + $0x260] sm:$0xff] }
0x1989   :  { %2198 = vmatpush.msrb.mxu0 %v2549_v4  ;;  %v2569_v4 = vld [vmem:[%s4165_s15 + $0x300] sm:$0xff] }
0x19f3   :  { %v1802_v60 = vpop.xlane.xlu2 %1801 }
0x19f4   :  { %v1803_v62 = vcvt.f32.s32 %v1802_v60 }
0x19f6   :  { %v1806_v33 = vadd.s32 %v1805_v1, %v1803_v62  ;;  %v1978_v1 = vpop.f32.mrf.mxu3 }
0x19f8   :  { %vm1822_vm14 = vcmp.eq.s32.totalorder %v2994_v19, %v1806_v33 }
0x19f9   :  { %vm1824_vm15 = vmor %vm1778_vm10, %vm1822_vm14 }
0x19fa   :  { %v1826_v8 = vsel %vm1824_vm15, %v3749_v59, 0.0  ;;  %v2601_v59 = vld [vmem:[%s4166_s16 + $0x4] sm:$0xf] }
0x19fb   :  { %v1817_v13 = vpop.xlane.xlu1 %1816  ;;  %v1828_v14 = vsel %vm634_vm4, %v1826_v8, 0.0  ;;  %2602 = vmatpush.msk.msra.mxu2 %vm1084_vm8, %v2601_v59  ;;  %v2546_v59 = vld [vmem:[%s4165_s15 + $0x248] sm:$0xff] }
0x19fc   :  { %v1818_v7 = vcvt.f32.s32 %v1817_v13  ;;  %1829 = vadd.xlane.f32.xlu0 %v1828_v14  ;;  %v2548_v14 = vld [vmem:[%s4165_s15 + $0x258] sm:$0xff] }
0x19fd   :  { %2264 = vmatpush.msrb.mxu2 %v2600_v12  ;;  %2199 = vmatpush.msrb.mxu0 %v2548_v14  ;;  %v2556_v14 = vld [vmem:[%s4165_s15 + $0x298] sm:$0xff] }
0x19fe   :  { %v1821_v16 = vadd.s32 %v1820_v10, %v1818_v7  ;;  %v2580_v10 = vld [vmem:[%s4165_s15 + $0x358] sm:$0xff] }
0x19ff   :  { %2265 = vmatpush.msrb.mxu2 %v2599_v31  ;;  %v2568_v7 = vld [vmem:[%s4165_s15 + $0x2f8] sm:$0xff]  ;;  %v1955_v31 = vpop.f32.mrf.mxu1 }
0x1a00   :  { %vm1823_vm0 = vcmp.eq.s32.totalorder %v2994_v19, %v1821_v16  ;;  %v2547_v16 = vld [vmem:[%s4165_s15 + $0x250] sm:$0xff]  ;;  %2218 = vmatpush.msrb.mxu1 %v2568_v7 }
0x1a01   :  { %vm1825_vm2 = vmor %vm1779_vm11, %vm1823_vm0  ;;  %2266 = vmatpush.msrb.mxu2 %v2598_v22  ;;  %2200 = vmatpush.msrb.mxu0 %v2547_v16  ;;  %v2574_v22 = vld [vmem:[%s4165_s15 + $0x328] sm:$0xff]  ;;  %v2782_v16 = vld [vmem:[%s4186_s14 + $0x78] sm:$0xff] }
0x1a02   :  { %v1827_v18 = vsel %vm1825_vm2, %v3753_v2, 0.0 }
0x1a03   :  { %v1831_v5 = vsel %vm634_vm4, %v1827_v18, 0.0  ;;  %2267 = vmatpush.msrb.mxu2 %v2597_v15  ;;  %2201 = vmatpush.msrb.mxu0 %v2546_v59  ;;  %v2573_v15 = vld [vmem:[%s4165_s15 + $0x320] sm:$0xff]  ;;  %v2555_v59 = vld [vmem:[%s4165_s15 + $0x290] sm:$0xff] }
0x1a04   :  { %1832 = vadd.xlane.f32.xlu2 %v1831_v5  ;;  %v2567_v5 = vld [vmem:[%s4165_s15 + $0x2f0] sm:$0xff] }
0x1a05   :  { %2268 = vmatpush.msrb.mxu2 %v2596_v49  ;;  %2219 = vmatpush.msrb.mxu1 %v2567_v5  ;;  %v2540_v49 = vld [vmem:[%s4165_s15 + $0x218] sm:$0xff] }
0x1a07   :  { %2269 = vmatpush.msrb.mxu2 %v2595_v6 }
0x1a09   :  { %2270 = vmatpush.msrb.mxu2 %v2594_v55  ;;  %v2571_v55 = vld [vmem:[%s4165_s15 + $0x310] sm:$0xff] }
0x1a0b   :  { %2271 = vmatpush.msrb.mxu2 %v2593_v53  ;;  %v2559_v53 = vld [vmem:[%s4165_s15 + $0x2b0] sm:$0xff] }
0x1a0d   :  { %2272 = vmatpush.msrb.mxu2 %v2592_v63  ;;  %v1958_v63 = vpop.f32.mrf.mxu1 }
0x1a6f   :  { %v1830_v21 = vpop.xlane.xlu0 %1829 }
0x1a70   :  { %2758 = vrcp.f32 %v1830_v21  ;;  %v1845_v19 = vand.u32 2147483648, %v1830_v21  ;;  %v1843_v2 = vand.u32 2147483647, %v1830_v21  ;;  %vm1839_vm5 = vweird.f32 %v1830_v21 }
0x1a72   :  { %v1846_v29 = vor.u32 1.1754944e-38, %v1845_v19  ;;  %vm1844_vm10 = vcmp.eq.f32.partialorder %v1843_v2, 8.507059e+37  ;;  %v2577_v19 = vld [vmem:[%s4165_s15 + $0x340] sm:$0xff] }
0x1a73   :  { %v2565_v2 = vld [vmem:[%s4165_s15 + $0x2e0] sm:$0xff] }
0x1a76   :  { %v2759_v9 = vpop.eup %2758 }
0x1a77   :  { %v1835_v40 = vmul.f32 %v2759_v9, %v1830_v21  ;;  %v1833_v61 = vpop.xlane.xlu2 %1832  ;;  %vm1840_vm3 = vweird.f32 %v2759_v9  ;;  %v2578_v21 = vld [vmem:[%s4165_s15 + $0x348] sm:$0xff] }
0x1a78   :  { %2760 = vrcp.f32 %v1833_v61  ;;  %vm1841_vm6 = vmor %vm1839_vm5, %vm1840_vm3  ;;  %v1860_v26 = vand.u32 2147483648, %v1833_v61  ;;  %v1858_v41 = vand.u32 2147483647, %v1833_v61  ;;  %vm1854_vm11 = vweird.f32 %v1833_v61 }
0x1a79   :  { %v1836_v23 = vsub.f32 1.0, %v1835_v40  ;;  %v2566_v40 = vld [vmem:[%s4165_s15 + $0x2e8] sm:$0xff] }
0x1a7a   :  { %v1861_v48 = vor.u32 1.1754944e-38, %v1860_v26  ;;  %vm1859_vm7 = vcmp.eq.f32.partialorder %v1858_v41, 8.507059e+37  ;;  %2220 = vmatpush.msrb.mxu1 %v2566_v40  ;;  %v2542_v26 = vld [vmem:[%s4165_s15 + $0x228] sm:$0xff] }
0x1a7b   :  { %v1837_v27 = vmul.f32 %v2759_v9, %v1836_v23  ;;  %v2545_v23 = vld [vmem:[%s4165_s15 + $0x240] sm:$0xff] }
0x1a7c   :  { %2202 = vmatpush.msrb.mxu0 %v2545_v23  ;;  %2221 = vmatpush.msrb.mxu1 %v2565_v2 }
0x1a7d   :  { %v1838_v43 = vadd.f32 %v2759_v9, %v1837_v27 }
0x1a7e   :  { %v2761_v28 = vpop.eup %2760 }
0x1a7f   :  { %v1842_v30 = vsel %vm1841_vm6, %v2759_v9, %v1838_v43  ;;  %v1850_v0 = vmul.f32 %v2761_v28, %v1833_v61  ;;  %vm1855_vm8 = vweird.f32 %v2761_v28  ;;  %v1981_v61 = vpop.f32.mrf.mxu3  ;;  %v2544_v43 = vld [vmem:[%s4165_s15 + $0x238] sm:$0xff] }
0x1a80   :  { %v1847_v36 = vsel %vm1844_vm10, %v1846_v29, %v1842_v30  ;;  %vm1856_vm12 = vmor %vm1854_vm11, %vm1855_vm8  ;;  %v2564_v29 = vld [vmem:[%s4165_s15 + $0x2d8] sm:$0xff]  ;;  %v2543_v30 = vld [vmem:[%s4165_s15 + $0x230] sm:$0xff]  ;;  %2203 = vmatpush.msrb.mxu0 %v2544_v43 }
0x1a81   :  { %v1851_v47 = vsub.f32 1.0, %v1850_v0  ;;  %v1848_v38 = vmul.f32 %v1847_v36, %v1826_v8  ;;  %v2585_v8 = vld [vmem:[%s4165_s15 + $0x380] sm:$0xff]  ;;  %v2575_v0 = vld [vmem:[%s4165_s15 + $0x330] sm:$0xff]  ;;  %2222 = vmatpush.msrb.mxu1 %v2564_v29 }
0x1a82   :  { %2204 = vmatpush.msrb.mxu0 %v2543_v30 }
0x1a83   :  { %v1852_v17 = vmul.f32 %v2761_v28, %v1851_v47  ;;  %2058 = vperm.xlu0 %2649, %v1848_v38   ;;  %2079 = vperm.xlu1 %2648, %v1848_v38   ;;  %v2563_v47 = vld [vmem:[%s4165_s15 + $0x2d0] sm:$0xff] }
0x1a84   :  { %2603 = vmatmul.msk.f32.vlgmr.msra.gmra.mxu2 %vm634_vm4, %v1848_v38  ;;  %2089 = vperm.xlu2 %2646, %v1848_v38  }
0x1a85   :  { %v1853_v46 = vadd.f32 %v2761_v28, %v1852_v17  ;;  %v1909_v17 = vpop.f32.mrf.mxu2  ;;  %2223 = vmatpush.msrb.mxu1 %v2563_v47  ;;  %2205 = vmatpush.msrb.mxu0 %v2542_v26 }
0x1a87   :  { %v1857_v51 = vsel %vm1856_vm12, %v2761_v28, %v1853_v46  ;;  %v2576_v28 = vld [vmem:[%s4165_s15 + $0x338] sm:$0xff]  ;;  %2224 = vmatpush.msrb.mxu1 %v2562_v42  ;;  %2206 = vmatpush.msrb.mxu0 %v2541_v44 }
0x1a88   :  { %v1862_v24 = vsel %vm1859_vm7, %v1861_v48, %v1857_v51  ;;  %v2561_v48 = vld [vmem:[%s4165_s15 + $0x2c0] sm:$0xff]  ;;  %v2560_v51 = vld [vmem:[%s4165_s15 + $0x2b8] sm:$0xff] }
0x1a89   :  { %v1863_v54 = vmul.f32 %v1862_v24, %v1827_v18  ;;  %v2579_v18 = vld [vmem:[%s4165_s15 + $0x350] sm:$0xff]  ;;  %2225 = vmatpush.msrb.mxu1 %v2561_v48  ;;  %2207 = vmatpush.msrb.mxu0 %v2540_v49 }
0x1a8b   :  { %2650 = vset.pattern.permute.xlu1 %v2834_v20  ;;  %2655 = vset.pattern.permute.xlu0 %v2835_v34 }
0x1a8c   :  { %2651 = vset.pattern.permute.xlu2 %v2836_v35  ;;  %2604 = vmatmul.msk.f32.gmra.mxu2 %vm634_vm4, %v1863_v54  ;;  %v2591_v35 = vld [vmem:[%s4165_s15 + $0x3b0] sm:$0xff] }
0x1a8d   :  { %2069 = vperm.xlu1 %2650, %v1848_v38   ;;  %2083 = vperm.xlu2 %2651, %v1863_v54  }
0x1a8e   :  { %2273 = vmatpush.msrb.mxu2 %v2591_v35  ;;  %2226 = vmatpush.msrb.mxu1 %v2560_v51  ;;  %v2538_v35 = vld [vmem:[%s4165_s15 + $0x208] sm:$0xff] }
0x1a90   :  { %2274 = vmatpush.msrb.mxu2 %v2590_v56  ;;  %v2570_v56 = vld [vmem:[%s4165_s15 + $0x308] sm:$0xff]  ;;  %2227 = vmatpush.msrb.mxu1 %v2559_v53 }
0x1a92   :  { %2275 = vmatpush.msrb.mxu2 %v2589_v57 }
0x1a94   :  { %2276 = vmatpush.msrb.mxu2 %v2588_v58 }
0x1a95   :  { %2652 = vset.pattern.permute.xlu1 %v2824_v3  ;;  %2653 = vset.pattern.permute.xlu2 %v2835_v34  ;;  %v2586_v3 = vld [vmem:[%s4165_s15 + $0x388] sm:$0xff]  ;;  %v3866_v34 = vld [vmem:[%s4189_s0 + $0x4] sm:$0xf] }
0x1a96   :  { %2063 = vperm.xlu1 %2652, %v1863_v54   ;;  %2093 = vperm.xlu2 %2653, %v1863_v54   ;;  %v1887_v60 = vperm.slane %v3866_v34, 3  ;;  %v1886_v12 = vperm.slane %v3866_v34, 2  ;;  %v1884_v38 = vperm.slane %v3866_v34, 0  ;;  %v1885_v57 = vperm.slane %v3866_v34, 1 }
0x1a97   :  { %2277 = vmatpush.msrb.mxu2 %v2587_v11  ;;  %v1932_v11 = vpop.f32.mrf.mxu0 }
0x1a98   :  { %v3869_v62 = vadd.f32 %v1978_v1, %v1887_v60  ;;  %v3936_v36 = vadd.f32 %v1981_v61, %v1887_v60  ;;  %v3957_v45 = vadd.f32 %v1955_v31, %v1886_v12  ;;  %v3962_v25 = vadd.f32 %v1909_v17, %v1884_v38  ;;  %v2558_v1 = vld [vmem:[%s4165_s15 + $0x2a8] sm:$0xff] }
0x1a99   :  { %2278 = vmatpush.msrb.mxu2 %v2586_v3  ;;  %2228 = vmatpush.msrb.mxu1 %v2558_v1  ;;  %v2554_v61 = vld [vmem:[%s4165_s15 + $0x288] sm:$0xff] }
0x1a9a   :  { %v1995_v33 = vmul.f32 0.044715, %v3869_v62  ;;  %v1999_v46 = vmul.f32 0.044715, %v3936_v36  ;;  %v1994_v52 = vmul.f32 0.044715, %v3957_v45 }
0x1a9b   :  { %2279 = vmatpush.msrb.mxu2 %v2585_v8  ;;  %v1992_v6 = vmul.f32 0.044715, %v3962_v25 }
0x1a9c   :  { %v2003_v13 = vmul.f32 %v1995_v33, %v3869_v62  ;;  %v2007_v24 = vmul.f32 %v1999_v46, %v3936_v36  ;;  %v2002_v60 = vmul.f32 %v1994_v52, %v3957_v45  ;;  %v2537_v33 = vld [vmem:[%s4165_s15 + $0x200] sm:$0xff]  ;;  %v2786_v52 = vld [vmem:[%s4186_s14 + $0x58] sm:$0xff] }
0x1a9d   :  { %v2000_v8 = vmul.f32 %v1992_v6, %v3962_v25 }
0x1a9e   :  { %2654 = vset.pattern.permute.xlu1 %v2834_v20  ;;  %v2581_v20 = vld [vmem:[%s4165_s15 + $0x360] sm:$0xff]  ;;  %v2011_v9 = vmul.f32 %v2003_v13, %v3869_v62  ;;  %v2015_v3 = vmul.f32 %v2007_v24, %v3936_v36  ;;  %v2010_v5 = vmul.f32 %v2002_v60, %v3957_v45 }
0x1a9f   :  { %2073 = vperm.xlu1 %2654, %v1863_v54   ;;  %2244 = vmatpush.msra.mxu3 %v2581_v20  ;;  %v2539_v54 = vld [vmem:[%s4165_s15 + $0x210] sm:$0xff]  ;;  %v4006_v20 = vadd.f32 %v1958_v63, %v1886_v12  ;;  %v2557_v13 = vld [vmem:[%s4165_s15 + $0x2a0] sm:$0xff]  ;;  %v2008_v40 = vmul.f32 %v2000_v8, %v3962_v25  ;;  %v1935_v49 = vpop.f32.mrf.mxu0  ;;  %v1991_v63 = vmul.f32 0.5, %v3936_v36  ;;  %v2788_v8 = vld [vmem:[%s4186_s14 + $0x48] sm:$0xff] }
0x1aa0   :  { %v2019_v27 = vadd.f32 %v2011_v9, %v3869_v62  ;;  %2208 = vmatpush.msrb.mxu0 %v2539_v54  ;;  %2229 = vmatpush.msrb.mxu1 %v2557_v13  ;;  %v1987_v9 = vmul.f32 0.5, %v3869_v62  ;;  %v2018_v62 = vadd.f32 %v2010_v5, %v3957_v45  ;;  %v2553_v12 = vld [vmem:[%s4165_s15 + $0x280] sm:$0xff]  ;;  %v4070_v24 = vadd.f32 %v1935_v49, %v1885_v57 }
0x1aa1   :  { %2245 = vmatpush.msra.mxu3 %v2580_v10  ;;  %v4017_v10 = vadd.f32 %v1932_v11, %v1885_v57 }
0x1aa2   :  { %v2027_v41 = vmul.f32 0.7978846, %v2019_v27  ;;  %2209 = vmatpush.msrb.mxu0 %v2538_v35  ;;  %2230 = vmatpush.msrb.mxu1 %v2556_v14  ;;  %v2783_v27 = vld [vmem:[%s4186_s14 + $0x70] sm:$0xff]  ;;  %v2026_v26 = vmul.f32 0.7978846, %v2018_v62 }
0x1aa3   :  { %2246 = vmatpush.msra.mxu3 %v2579_v18  ;;  %v2023_v18 = vadd.f32 %v2015_v3, %v3936_v36  ;;  %v1993_v23 = vmul.f32 0.044715, %v4017_v10  ;;  %v1997_v11 = vmul.f32 0.044715, %v4070_v24  ;;  %v1984_v36 = vmul.f32 0.5, %v3962_v25 }
0x1aa4   :  { %2762 = vtanh.f32 %v2027_v41  ;;  %2210 = vmatpush.msrb.mxu0 %v2537_v33  ;;  %2231 = vmatpush.msrb.mxu1 %v2555_v59  ;;  %v1986_v33 = vmul.f32 0.5, %v3957_v45  ;;  %v2789_v45 = vld [vmem:[%s4186_s14 + $0x40] sm:$0xff]  ;;  %v1985_v62 = vmul.f32 0.5, %v4017_v10 }
0x1aa5   :  { %2247 = vmatpush.msra.mxu3 %v2578_v21  ;;  %v1998_v21 = vmul.f32 0.044715, %v4006_v20  ;;  %v2031_v43 = vmul.f32 0.7978846, %v2023_v18  ;;  %v2001_v31 = vmul.f32 %v1993_v23, %v4017_v10  ;;  %v2005_v13 = vmul.f32 %v1997_v11, %v4070_v24 }
0x1aa6   :  { %2605 = vmatpush.xpose.msk.msra.mxu0 %vm125_vm1, %v2782_v16  ;;  %2232 = vmatpush.msrb.mxu1 %v2554_v61  ;;  %v1990_v23 = vmul.f32 0.5, %v4006_v20 }
0x1aa7   :  { %2248 = vmatpush.msra.mxu3 %v2577_v19  ;;  %v2006_v30 = vmul.f32 %v1998_v21, %v4006_v20  ;;  %2764 = vtanh.f32 %v2031_v43  ;;  %v2009_v42 = vmul.f32 %v2001_v31, %v4017_v10 }
0x1aa8   :  { %2233 = vmatpush.msrb.mxu1 %v2553_v12  ;;  %2766 = vtanh.f32 %v2026_v26  ;;  %v2792_v26 = vld [vmem:[%s4186_s14 + $0x28] sm:$0xff] }
0x1aa9   :  { %2249 = vmatpush.msra.mxu3 %v2576_v28  ;;  %v1912_v28 = vpop.f32.mrf.mxu2  ;;  %v2014_v17 = vmul.f32 %v2006_v30, %v4006_v20  ;;  %v2791_v30 = vld [vmem:[%s4186_s14 + $0x30] sm:$0xff] }
0x1aaa   :  { %v2763_v58 = vpop.eup %2762  ;;  %2606 = vmatpush.xpose.msk.msra.mxu0 %vm125_vm1, %v2783_v27  ;;  %v4048_v47 = vadd.f32 %v1912_v28, %v1884_v38  ;;  %v2785_v38 = vld [vmem:[%s4186_s14 + $0x60] sm:$0xff]  ;;  %v2790_v27 = vld [vmem:[%s4186_s14 + $0x38] sm:$0xff] }
0x1aab   :  { %2250 = vmatpush.msra.mxu3 %v2575_v0  ;;  %v2043_v7 = vadd.f32 1.0, %v2763_v58  ;;  %v2016_v0 = vadd.f32 %v2008_v40, %v3962_v25  ;;  %v2787_v58 = vld [vmem:[%s4186_s14 + $0x50] sm:$0xff]  ;;  %v2013_v40 = vmul.f32 %v2005_v13, %v4070_v24 }
0x1aac   :  { %v1996_v44 = vmul.f32 0.044715, %v4048_v47 }
0x1aad   :  { %2251 = vmatpush.msra.mxu3 %v2574_v22  ;;  %v2051_v19 = vmul.f32 %v2043_v7, %v1987_v9  ;;  %v2784_v22 = vld [vmem:[%s4186_s14 + $0x68] sm:$0xff]  ;;  %v2024_v41 = vmul.f32 0.7978846, %v2016_v0  ;;  %v2765_v48 = vpop.eup %2764 }
0x1aae   :  { %2607 = vmatpush.xpose.msk.msra.mxu0 %vm125_vm1, %v2784_v22  ;;  %v2004_v51 = vmul.f32 %v1996_v44, %v4048_v47  ;;  %v2047_v54 = vadd.f32 1.0, %v2765_v48  ;;  %v1988_v22 = vmul.f32 0.5, %v4048_v47  ;;  %v2795_v48 = vld [vmem:[%s4186_s14 + $0x10] sm:$0xff] }
0x1aaf   :  { %2252 = vmatpush.msra.mxu3 %v2573_v15  ;;  %v2022_v15 = vadd.f32 %v2014_v17, %v4006_v20  ;;  %2768 = vtanh.f32 %v2024_v41  ;;  %v2793_v17 = vld [vmem:[%s4186_s14 + $0x20] sm:$0xff] }
0x1ab0   :  { %v2055_v34 = vmul.f32 %v2047_v54, %v1991_v63 }
0x1ab1   :  { %2253 = vmatpush.msra.mxu3 %v2572_v50  ;;  %v2017_v50 = vadd.f32 %v2009_v42, %v4017_v10  ;;  %v2030_v6 = vmul.f32 0.7978846, %v2022_v15  ;;  %v2794_v15 = vld [vmem:[%s4186_s14 + $0x18] sm:$0xff] }
0x1ab2   :  { %2608 = vmatpush.xpose.msk.msra.mxu0 %vm125_vm1, %v2785_v38 }
0x1ab3   :  { %2254 = vmatpush.msra.mxu3 %v2571_v55  ;;  %v2767_v55 = vpop.eup %2766  ;;  %v2025_v35 = vmul.f32 0.7978846, %v2017_v50  ;;  %2770 = vtanh.f32 %v2030_v6 }
0x1ab4   :  { %v2042_v60 = vadd.f32 1.0, %v2767_v55 }
0x1ab5   :  { %2255 = vmatpush.msra.mxu3 %v2570_v56  ;;  %v2769_v53 = vpop.eup %2768  ;;  %v2012_v56 = vmul.f32 %v2004_v51, %v4048_v47  ;;  %2772 = vtanh.f32 %v2025_v35 }
0x1ab6   :  { %2609 = vmatpush.xpose.msk.msra.mxu0 %vm125_vm1, %v2786_v52  ;;  %v2040_v3 = vadd.f32 1.0, %v2769_v53  ;;  %v2050_v7 = vmul.f32 %v2042_v60, %v1986_v33  ;;  %v2796_v52 = vld [vmem:[%s4186_s14 + $0x8] sm:$0xff] }
0x1ab7   :  { %2256 = vmatpush.msra.mxu3 %v2569_v4  ;;  %v2020_v4 = vadd.f32 %v2012_v56, %v4048_v47  ;;  %v1989_v47 = vmul.f32 0.5, %v4070_v24 }
0x1ab8   :  { %v2048_v14 = vmul.f32 %v2040_v3, %v1984_v36 }
0x1ab9   :  { %v2771_v16 = vpop.eup %2770  ;;  %v2028_v21 = vmul.f32 0.7978846, %v2020_v4 }
0x1aba   :  { %2610 = vmatpush.xpose.msk.msra.mxu0 %vm125_vm1, %v2787_v58  ;;  %v2046_v61 = vadd.f32 1.0, %v2771_v16 }
0x1abb   :  { %v2773_v9 = vpop.eup %2772  ;;  %2774 = vtanh.f32 %v2028_v21 }
0x1abc   :  { %v2054_v43 = vmul.f32 %v2046_v61, %v1990_v23 }
0x1abe   :  { %2611 = vmatpush.xpose.msk.msra.mxu0 %vm125_vm1, %v2788_v8 }
0x1ac1   :  { %v2775_v12 = vpop.eup %2774 }
0x1ac2   :  { %2612 = vmatpush.xpose.msk.msra.mxu0 %vm125_vm1, %v2789_v45  ;;  %v2044_v10 = vadd.f32 1.0, %v2775_v12 }
0x1ac4   :  { %v2052_v41 = vmul.f32 %v2044_v10, %v1988_v22  ;;  %v2671_v10 = vld [vmem:[%s4168_s18] ss:$0 sm:$0xff] }
0x1ac6   :  { %2613 = vmatpush.xpose.msk.msra.mxu0 %vm125_vm1, %v2790_v27 }
0x1aca   :  { %2614 = vmatpush.xpose.msk.msra.mxu0 %vm125_vm1, %v2791_v30 }
0x1ace   :  { %2615 = vmatpush.xpose.msk.msra.mxu0 %vm125_vm1, %v2792_v26 }
0x1ad2   :  { %2616 = vmatpush.xpose.msk.msra.mxu0 %vm125_vm1, %v2793_v17 }
0x1ad6   :  { %2617 = vmatpush.xpose.msk.msra.mxu0 %vm125_vm1, %v2794_v15 }
0x1ada   :  { %2618 = vmatpush.xpose.msk.msra.mxu0 %vm125_vm1, %v2795_v48 }
0x1ade   :  { %v2090_v2 = vpop.permute.xlu2 %2089  ;;  %2619 = vmatpush.xpose.msk.msra.mxu0 %vm125_vm1, %v2796_v52 }
0x1adf   :  { %v2096_v29 = vmul.f32 %v2090_v2, %v2051_v19  ;;  %v2041_v19 = vadd.f32 1.0, %v2773_v9  ;;  %v2021_v2 = vadd.f32 %v2013_v40, %v4070_v24  ;;  %v2797_v24 = vld [vmem:[%s4186_s14] sm:$0xff] }
0x1ae1   :  { %2280 = vmatmul.f32.vlgmr.msrb.gmra.mxu2 %v2096_v29  ;;  %v2049_v29 = vmul.f32 %v2041_v19, %v1985_v62  ;;  %v2029_v0 = vmul.f32 0.7978846, %v2021_v2 }
0x1ae2   :  { %2620 = vmatpush.xpose.msk.msra.mxu0 %vm125_vm1, %v2797_v24 }
0x1ae3   :  { %2776 = vtanh.f32 %v2029_v0  ;;  %v2670_v0 = vld [vmem:[%s4167_s17] ss:$0 sm:$0xff]  ;;  %s2837_s17 = smov [#allocation2]  }
0x1ae4   :  { %s2428_s18 = sshll.u32 %s2837_s17, 4  ;;  %s2429_s18 = int_to_ptr.vmem [resolvable:$true] %s2428_s18 }
0x1ae7   :  { %v2084_v46 = vpop.permute.xlu2 %2083 }
0x1ae8   :  { %v2087_v28 = vmul.f32 %v2084_v46, %v2054_v43 }
0x1ae9   :  { %v2777_v44 = vpop.eup %2776 }
0x1aea   :  { %v2045_v46 = vadd.f32 1.0, %v2777_v44 }
0x1aec   :  { %v2053_v49 = vmul.f32 %v2045_v46, %v1989_v47 }
0x1af0   :  { %v2094_v57 = vpop.permute.xlu2 %2093 }
0x1af1   :  { %v2097_v1 = vmul.f32 %v2094_v57, %v2055_v34 }
0x1af3   :  { %2283 = vmatmul.f32.gmra.mxu2 %v2097_v1 }
0x1af5   :  { %v2059_v18 = vpop.permute.xlu0 %2058  ;;  %v2080_v5 = vpop.permute.xlu1 %2079 }
0x1af6   :  { %v2066_v59 = vmul.f32 %v2059_v18, %v2048_v14  ;;  %v2086_v25 = vmul.f32 %v2080_v5, %v2050_v7 }
0x1af8   :  { %2211 = vmatmul.f32.vlgmr.msrb.gmra.mxu0 %v2066_v59  ;;  %2257 = vmatmul.f32.vlgmr.msra.gmra.mxu3 %v2086_v25 }
0x1aff   :  { %v2070_v20 = vpop.permute.xlu1 %2069 }
0x1b00   :  { %v2076_v31 = vmul.f32 %v2070_v20, %v2049_v29  ;;  %2260 = vmatmul.f32.gmra.mxu3 %v2087_v28 }
0x1b02   :  { %2234 = vmatmul.f32.vlgmr.msrb.gmra.mxu1 %v2076_v31 }
0x1b07   :  { %v2189_v6 = vpop.f32.mrf.mxu2 }
0x1b08   :  { %v2064_v42 = vpop.permute.xlu1 %2063 }
0x1b09   :  { %v2067_v38 = vmul.f32 %v2064_v42, %v2052_v41 }
0x1b0b   :  { %2214 = vmatmul.f32.gmra.mxu0 %v2067_v38 }
0x1b0f   :  { %v2192_v54 = vpop.f32.mrf.mxu2 }
0x1b11   :  { %v2074_v50 = vpop.permute.xlu1 %2073 }
0x1b12   :  { %v2077_v51 = vmul.f32 %v2074_v50, %v2053_v49 }
0x1b14   :  { %2237 = vmatmul.f32.gmra.mxu1 %v2077_v51 }
0x1b64   :  { %v2281_v11 = vpop.f32.mrf.mxu2 }
0x1b75   :  { %v2212_v55 = vpop.f32.mrf.mxu0 }
0x1b76   :  { %v2213_v53 = vadd.f32 %v2212_v55, %v2189_v6  ;;  %v2284_v13 = vpop.f32.mrf.mxu2 }
0x1b7b   :  { %v2258_v56 = vpop.f32.mrf.mxu3 }
0x1b7f   :  { %v2235_v63 = vpop.f32.mrf.mxu1 }
0x1b80   :  { %v2236_v35 = vadd.f32 %v2235_v63, %v2213_v53 }
0x1b82   :  { %v2259_v58 = vadd.f32 %v2258_v56, %v2236_v35 }
0x1b83   :  { %v2261_v4 = vpop.f32.mrf.mxu3 }
0x1b84   :  { %v2282_v34 = vadd.f32 %v2281_v11, %v2259_v58 }
0x1b86   :  { %v2287_v57 = vadd.f32 %v2282_v34, %v3639_v37 }
0x1b88   :  { %v2291_v3 = vsel %vm125_vm1, %v2287_v57, 0.0  ;;  %v2215_v60 = vpop.f32.mrf.mxu0 }
0x1b89   :  { %2292 = vadd.xlane.f32.xlu0 %v2291_v3  ;;  %v2216_v1 = vadd.f32 %v2215_v60, %v2192_v54 }
0x1b91   :  { %v2238_v36 = vpop.f32.mrf.mxu1 }
0x1b92   :  { %v2239_v33 = vadd.f32 %v2238_v36, %v2216_v1 }
0x1b94   :  { %v2262_v8 = vadd.f32 %v2261_v4, %v2239_v33 }
0x1b96   :  { %v2285_v14 = vadd.f32 %v2284_v13, %v2262_v8 }
0x1b98   :  { %v2288_v7 = vadd.f32 %v2285_v14, %v3644_v39 }
0x1b9a   :  { %v2294_v16 = vsel %vm125_vm1, %v2288_v7, 0.0 }
0x1b9b   :  { %2295 = vadd.xlane.f32.xlu2 %v2294_v16 }
0x1bfc   :  { %v2293_v18 = vpop.xlane.xlu0 %2292 }
0x1bfd   :  { %v2297_v5 = vmul.f32 %v2293_v18, %v3004_v32 }
0x1bff   :  { %v2299_v37 = vsub.f32 %v2287_v57, %v2297_v5 }
0x1c01   :  { %v2301_v59 = vmul.f32 %v2299_v37, %v2299_v37 }
0x1c03   :  { %v2303_v25 = vsel %vm125_vm1, %v2301_v59, 0.0 }
0x1c04   :  { %2304 = vadd.xlane.f32.xlu1 %v2303_v25 }
0x1c0e   :  { %v2296_v21 = vpop.xlane.xlu2 %2295 }
0x1c0f   :  { %v2298_v45 = vmul.f32 %v2296_v21, %v3004_v32 }
0x1c11   :  { %v2300_v9 = vsub.f32 %v2288_v7, %v2298_v45 }
0x1c13   :  { %v2302_v40 = vmul.f32 %v2300_v9, %v2300_v9 }
0x1c15   :  { %v2306_v61 = vsel %vm125_vm1, %v2302_v40, 0.0 }
0x1c16   :  { %2307 = vadd.xlane.f32.xlu0 %v2306_v61 }
0x1c77   :  { %v2305_v39 = vpop.xlane.xlu1 %2304 }
0x1c78   :  { %v2309_v23 = vmul.f32 %v2305_v39, %v3004_v32 }
0x1c7a   :  { %v2311_v19 = vadd.f32 1e-05, %v2309_v23 }
0x1c7c   :  { %2778 = vrsqrt.f32 %v2311_v19  ;;  %vm2319_vm9 = vweird.f32 %v2311_v19 }
0x1c82   :  { %v2779_v27 = vpop.eup %2778 }
0x1c83   :  { %v2314_v2 = vmul.f32 %v2779_v27, %v2311_v19  ;;  %vm2320_vm4 = vweird.f32 %v2779_v27 }
0x1c84   :  { %vm2321_vm13 = vmor %vm2319_vm9, %vm2320_vm4 }
0x1c85   :  { %v2315_v43 = vmul.f32 %v2779_v27, %v2314_v2 }
0x1c87   :  { %v2316_v62 = vmul.f32 0.5, %v2315_v43 }
0x1c89   :  { %v2317_v28 = vsub.f32 1.5, %v2316_v62  ;;  %v2308_v29 = vpop.xlane.xlu0 %2307 }
0x1c8a   :  { %v2310_v30 = vmul.f32 %v2308_v29, %v3004_v32 }
0x1c8b   :  { %v2318_v20 = vmul.f32 %v2779_v27, %v2317_v28 }
0x1c8c   :  { %v2312_v12 = vadd.f32 1e-05, %v2310_v30 }
0x1c8d   :  { %v2322_v31 = vsel %vm2321_vm13, %v2779_v27, %v2318_v20 }
0x1c8e   :  { %v2333_v26 = vmul.f32 %v2322_v31, %v2299_v37  ;;  %2780 = vrsqrt.f32 %v2312_v12  ;;  %vm2329_vm15 = vweird.f32 %v2312_v12 }
0x1c90   :  { %v2338_v22 = vmul.f32 %v2670_v0, %v2333_v26 }
0x1c92   :  { %v2343_v17 = vadd.f32 %v2671_v10, %v2338_v22 }
0x1c94   :  { %v2781_v41 = vpop.eup %2780  ;;  %2621 = vmatmul.msk.f32.vlgmr.msra.gmra.mxu0 %vm125_vm1, %v2343_v17 }
0x1c95   :  { %v2324_v32 = vmul.f32 %v2781_v41, %v2312_v12  ;;  %vm2330_vm14 = vweird.f32 %v2781_v41 }
0x1c96   :  { %vm2331_vm0 = vmor %vm2329_vm15, %vm2330_vm14 }
0x1c97   :  { %v2325_v42 = vmul.f32 %v2781_v41, %v2324_v32 }
0x1c99   :  { %v2326_v44 = vmul.f32 0.5, %v2325_v42 }
0x1c9b   :  { %v2327_v38 = vsub.f32 1.5, %v2326_v44 }
0x1c9d   :  { %v2328_v15 = vmul.f32 %v2781_v41, %v2327_v38 }
0x1c9f   :  { %v2332_v46 = vsel %vm2331_vm0, %v2781_v41, %v2328_v15 }
0x1ca0   :  { %v2334_v47 = vmul.f32 %v2332_v46, %v2300_v9 }
0x1ca2   :  { %v2339_v48 = vmul.f32 %v2670_v0, %v2334_v47 }
0x1ca4   :  { %v2344_v49 = vadd.f32 %v2671_v10, %v2339_v48 }
0x1ca6   :  { %2622 = vmatmul.msk.f32.gmra.mxu0 %vm125_vm1, %v2344_v49 }
0x1d11   :  { %v2416_v50 = vpop.f32.mrf.mxu0 }
0x1d12   :  { %2422 = vst [vmem:[#allocation2] sm:$0xff] %v2416_v50 }
0x1d23   :  { %v2419_v51 = vpop.f32.mrf.mxu0 }
0x1d24   :  { %2423 = vst [vmem:[#allocation2 + $0x8] sm:$0xff] %v2419_v51 }
0x1d25   :  { %2436 = dma.vmem_to_hbm [thread:$0]  %s2429_s18, 256, %s2431_s24, [#allocation3], %s2838_s25, %s2838_s25, %s2839_s3  }
0x1d26   :  { %2822 = dma.done.wait [#allocation3], 256  }
0x1d27   :  { %2823 = vsyncadd [#allocation3], 4294967040 }
0x1d28   :  { %2441 = vsyncpa [#allocation3], 1 }

</bundles_post_ra>
